<compile_context>
chip_gen: v7x
topology: tpu7x:2x2x1
jax: 0.10.0
libtpu: 0.0.40
codegen_flags: <defaults>
</compile_context>

<pallas_src>
import jax
import jax.numpy as jnp
from jax.experimental import pallas as pl
from jax.experimental.pallas import tpu as pltpu

# ---- module hyper-parameters (hard-coded in the torch module) ----------------
DIM_IN = 512
DIM_H1 = 1024          # dim_hidden[0]
DIM_H2 = 2048          # dim_hidden[1]
CENTROID_SCALE = 0.1
BIAS_SCALE = 1.0       # == 1.0 -> multiply folded away
OBJ_SCALE = 0.5

# ---- synthetic "template mesh" sizes (small) ---------------------------------
NV = 128               # number of vertices
NF = 64                # number of faces
B = 2                  # batch size

NV3 = NV * 3                    # 384
COMB_N = NV3 + 128              # 512: [0:384]=fc_bias, [384:387]=fc_centroid*0.1, rest 0
NBLK = 1024                     # fc2 N-block / wcomb K-block streamed per grid step
N_STEPS = DIM_H2 // NBLK        # 2
ROW_PAD = 8                     # sublane multiple for the batch/rows dim

# mesh_pack row layout (f32, shape (MESH_ROWS, NV3)):
#   row 0 : base = log(|v*OBJ_SCALE| / (1 - |v*OBJ_SCALE|)) flattened
#   row 1 : sign = sign(v*OBJ_SCALE) flattened
#   row 2 : mask (col % 3 == 0)
#   row 3 : mask (col % 3 == 1)
#   row 4 : mask (col % 3 == 2)
#   rows 5..7 : zero padding
MESH_ROWS = 8


def decoder_kernel(x_ref, w1_ref, w2q_ref, wcomb_ref, b2s2_ref, bres_ref, mesh_ref,
                   out_ref, h1_ref, acc_ref):
    """Grid over fc2's N dim (== wcomb's K dim).

    Step 0: fc1.  Every step: fc2 N-block fused with its slice of the wcomb
    reduction.  Last step: vertex assembly (VPU only)."""
    j = pl.program_id(0)

    # ---- init: fc1 + relu (stored bf16), zero the comb accumulator -----------
    @pl.when(j == 0)
    def _():
        xb = x_ref[...].astype(jnp.bfloat16)
        h1 = jnp.dot(xb, w1_ref[...], preferred_element_type=jnp.float32)
        h1 = h1 + bres_ref[:, 0:DIM_H1]
        h1_ref[...] = jnp.maximum(h1, 0.0).astype(jnp.bfloat16)
        acc_ref[...] = jnp.zeros_like(acc_ref)

    # ---- fc2 N-block j (+ bias, relu) fused with its wcomb partial sum --------
    # int8 -> f32 -> bf16 dequant on the VPU (two-step cast keeps lowering simple);
    # per-column scale is applied to the f32 accumulator after the bf16 MXU dot.
    w2b = w2q_ref[...].astype(jnp.float32).astype(jnp.bfloat16)
    h2 = jnp.dot(h1_ref[...], w2b, preferred_element_type=jnp.float32)
    h2 = h2 * b2s2_ref[1:2, :] + b2s2_ref[0:1, :]
    h2 = jnp.maximum(h2, 0.0).astype(jnp.bfloat16)
    acc_ref[...] += jnp.dot(h2, wcomb_ref[...], preferred_element_type=jnp.float32)

    # ---- finalize: fused bias/centroid, vertex assembly (no MXU work) ---------
    @pl.when(j == N_STEPS - 1)
    def _():
        comb = acc_ref[...] + bres_ref[:, DIM_H1:DIM_H1 + COMB_N]
        bias = comb[:, 0:NV3]                        # (bp, 384) == fc_bias(h2), BIAS_SCALE=1
        t0 = jnp.tanh(comb[:, NV3 + 0:NV3 + 1])      # tanh(fc_centroid(h2) * scale), per-axis
        t1 = jnp.tanh(comb[:, NV3 + 1:NV3 + 2])
        t2 = jnp.tanh(comb[:, NV3 + 2:NV3 + 3])

        base = mesh_ref[0:1, :]                      # (1, 384)
        sign = mesh_ref[1:2, :]                      # (1, 384)
        # centroid broadcast over vertices via precomputed 0/1 "col % 3" masks
        c_tiled = (t0 * mesh_ref[2:3, :]
                   + t1 * mesh_ref[3:4, :]
                   + t2 * mesh_ref[4:5, :])          # (bp, 384)

        v = jax.nn.sigmoid(base + bias) * sign
        v = jnp.maximum(v, 0.0) * (1.0 - c_tiled) - jnp.maximum(-v, 0.0) * (1.0 + c_tiled)
        out_ref[...] = (v + c_tiled) * 0.5


# ---- one-time host-side prep (hoisted out of the per-call path) ---------------
def prepare_kernel_params(params):
    """bf16 w1/wcomb, int8 per-column-quantized w2, fused centroid, packed biases."""
    w1, b1, w2, b2, wc, bc, wb, bb = params
    pad_n = COMB_N - NV3 - 3

    w1_bf = w1.astype(jnp.bfloat16)

    # int8 per-output-column quantization of w2 (f32 accumulation + f32 scale in kernel)
    amax = jnp.max(jnp.abs(w2), axis=0, keepdims=True)            # (1, 2048)
    s2 = jnp.maximum(amax, 1e-12) / 127.0
    w2q = jnp.clip(jnp.round(w2 / s2), -127, 127).astype(jnp.int8)
    # packed per-N-block rows: row0 = b2, row1 = scale, rows 2..7 zero (sublane pad)
    b2s2 = jnp.concatenate([b2, s2.astype(jnp.float32),
                            jnp.zeros((6, DIM_H2), jnp.float32)], axis=0)  # (8, 2048)

    # fuse fc_centroid into fc_bias; cols [387:512] are exactly zero by construction
    wcomb = jnp.concatenate(
        [wb, wc * CENTROID_SCALE, jnp.zeros((DIM_H2, pad_n), jnp.float32)],
        axis=1).astype(jnp.bfloat16)                                        # (2048, 512)
    bcomb = jnp.concatenate(
        [bb, bc * CENTROID_SCALE, jnp.zeros((1, pad_n), jnp.float32)], axis=1)
    bres = jnp.concatenate([b1, bcomb], axis=1).astype(jnp.float32)         # (1, 1536)
    return w1_bf, w2q, b2s2, wcomb, bres


def prepare_mesh_constants(vertices_base):
    """Template-mesh-only constants (computed once, reused across calls)."""
    base = vertices_base * OBJ_SCALE
    sign = jnp.sign(base)
    # clamp guards |v*OBJ_SCALE| == 0 or >= 1 from a real .obj mesh (reference would
    # produce inf/nan there); it is a no-op for this synthetic data.
    absb = jnp.clip(jnp.abs(base), 1e-6, 1.0 - 1e-6)
    base_log = jnp.log(absb / (1.0 - absb))
    base_flat = base_log.reshape(1, NV3).astype(jnp.float32)
    sign_flat = sign.reshape(1, NV3).astype(jnp.float32)
    cols = jnp.arange(NV3) % 3
    masks = (cols[None, :] == jnp.arange(3)[:, None]).astype(jnp.float32)   # (3, 384)
    pad = jnp.zeros((MESH_ROWS - 5, NV3), jnp.float32)
    return jnp.concatenate([base_flat, sign_flat, masks, pad], axis=0)      # (8, 384)


def decoder_forward(x, kparams, mesh_pack, faces):
    """jit-able forward: pad rows, run the fused Pallas kernel, reshape + faces."""
    w1_bf, w2q, b2s2, wcomb, bres = kparams
    batch = x.shape[0]
    pad_rows = (-batch) % ROW_PAD
    xp = jnp.pad(x, ((0, pad_rows), (0, 0))) if pad_rows else x
    bp = xp.shape[0]

    grid_spec = pltpu.PrefetchScalarGridSpec(
        num_scalar_prefetch=0,
        grid=(N_STEPS,),
        in_specs=[
            pl.BlockSpec((bp, DIM_IN), lambda j: (0, 0)),            # x (resident)
            pl.BlockSpec((DIM_IN, DIM_H1), lambda j: (0, 0)),        # w1 bf16 (resident)
            pl.BlockSpec((DIM_H1, NBLK), lambda j: (0, j)),          # w2 int8 (N-streamed)
            pl.BlockSpec((NBLK, COMB_N), lambda j: (j, 0)),          # fused wb|wc (K-streamed)
            pl.BlockSpec((8, NBLK), lambda j: (0, j)),               # [b2; s2] per N-block
            pl.BlockSpec((1, DIM_H1 + COMB_N), lambda j: (0, 0)),    # [b1 | bcomb] (resident)
            pl.BlockSpec((MESH_ROWS, NV3), lambda j: (0, 0)),        # mesh constants
        ],
        out_specs=pl.BlockSpec((bp, NV3), lambda j: (0, 0)),
        scratch_shapes=[
            pltpu.VMEM((bp, DIM_H1), jnp.bfloat16),                  # h1 (relu(fc1)), bf16
            pltpu.VMEM((bp, COMB_N), jnp.float32),                   # fused bias/centroid acc
        ],
    )

    verts_flat = pl.pallas_call(
        decoder_kernel,
        out_shape=jax.ShapeDtypeStruct((bp, NV3), jnp.float32),
        grid_spec=grid_spec,
        compiler_params=pltpu.CompilerParams(
            dimension_semantics=("arbitrary",),      # reduction axis (wcomb K)
            vmem_limit_bytes=32 << 20,
        ),
    )(xp, w1_bf, w2q, wcomb, b2s2, bres, mesh_pack)

    vertices = verts_flat[:batch].reshape(batch, NV, 3)
    faces_out = jnp.broadcast_to(faces[None, :, :], (batch,) + faces.shape)
    return vertices, faces_out


decoder_forward_jit = jax.jit(decoder_forward)


def reference_forward(x, params, vertices_base):
    """Pure-JAX f32 reproduction of the torch module (correctness oracle)."""
    w1, b1, w2, b2, wc, bc, wb, bb = params
    h = jnp.maximum(x @ w1 + b1, 0.0)
    h = jnp.maximum(h @ w2 + b2, 0.0)
    centroid = (h @ wc + bc) * CENTROID_SCALE
    bias = ((h @ wb + bb) * BIAS_SCALE).reshape(-1, NV, 3)
    base = vertices_base * OBJ_SCALE
    sign = jnp.sign(base)
    base = jnp.abs(base)
    base = jnp.log(base / (1.0 - base))
    centroid = jnp.tanh(centroid)[:, None, :]
    scale_pos = 1.0 - centroid
    scale_neg = centroid + 1.0
    v = jax.nn.sigmoid(base + bias) * sign
    v = jnp.maximum(v, 0.0) * scale_pos - jnp.maximum(-v, 0.0) * scale_neg
    v = v + centroid
    return v * 0.5


def init_params(key):
    """Deterministic parameter init (Linear weights stored as (in, out))."""
    def linear(k, fan_in, fan_out):
        kw, kb = jax.random.split(k)
        bound = 1.0 / jnp.sqrt(fan_in)
        w = jax.random.uniform(kw, (fan_in, fan_out), jnp.float32, -bound, bound)
        b = jax.random.uniform(kb, (1, fan_out), jnp.float32, -bound, bound)
        return w, b

    k1, k2, k3, k4 = jax.random.split(key, 4)
    w1, b1 = linear(k1, DIM_IN, DIM_H1)
    w2, b2 = linear(k2, DIM_H1, DIM_H2)
    wc, bc = linear(k3, DIM_H2, 3)
    wb, bb = linear(k4, DIM_H2, NV * 3)
    return (w1, b1, w2, b2, wc, bc, wb, bb)


if __name__ == "__main__":
    key = jax.random.PRNGKey(0)
    k_x, k_p, k_v, k_f = jax.random.split(key, 4)

    # inputs / synthetic template mesh
    x = jax.random.normal(k_x, (B, DIM_IN), jnp.float32)
    params = init_params(k_p)
    # TODO(synk): real module loads the template mesh from an .obj via soft-renderer;
    # here we synthesize vertices in (-0.9, 0.9) and random int faces instead.
    vertices_base = jax.random.uniform(k_v, (NV, 3), jnp.float32, -0.9, 0.9)
    faces = jax.random.randint(k_f, (NF, 3), 0, NV, dtype=jnp.int32)

    # one-time prep (hoisted out of the per-call path)
    kparams = prepare_kernel_params(params)
    mesh_pack = prepare_mesh_constants(vertices_base)

    vertices, faces_out = decoder_forward_jit(x, kparams, mesh_pack, faces)
    vertices = jax.block_until_ready(vertices)
    faces_out = jax.block_until_ready(faces_out)

    assert vertices.shape == (B, NV, 3) and vertices.dtype == jnp.float32
    assert faces_out.shape == (B, NF, 3)

    ref = reference_forward(x, params, vertices_base)
    if not jnp.allclose(vertices, ref, atol=2e-2, rtol=2e-2):
        raise AssertionError("Pallas kernel output mismatch vs JAX reference")

    print("KERNEL_OK")
</pallas_src>

<mosaic_0001>
module attributes {stable_mosaic.version = 11 : i64} {
  func.func @decoder_kernel(%arg0: i32, %arg1: memref<8x512xf32, #tpu.memory_space<vmem>>, %arg2: memref<512x1024xbf16, #tpu.memory_space<vmem>>, %arg3: memref<1024x1024xi8, #tpu.memory_space<vmem>>, %arg4: memref<1024x512xbf16, #tpu.memory_space<vmem>>, %arg5: memref<8x1024xf32, #tpu.memory_space<vmem>>, %arg6: memref<1x1536xf32, #tpu.memory_space<vmem>>, %arg7: memref<8x384xf32, #tpu.memory_space<vmem>>, %arg8: memref<8x384xf32, #tpu.memory_space<vmem>>, %arg9: memref<8x1024xbf16, #tpu.memory_space<vmem>>, %arg10: memref<8x512xf32, #tpu.memory_space<vmem>>) attributes {dimension_semantics = [#tpu.dimension_semantics<arbitrary>], iteration_bounds = array<i64: 2>, scalar_prefetch = 0 : i64, scratch_operands = 2 : i64, tpu.core_type = #tpu.core_type<tc>, window_params = [{pipeline_mode = #tpu.pipeline_mode<synchronous>, transform_indices = @transform_0, window_bounds = array<i64: 8, 512>}, {pipeline_mode = #tpu.pipeline_mode<synchronous>, transform_indices = @transform_1, window_bounds = array<i64: 512, 1024>}, {transform_indices = @transform_2, window_bounds = array<i64: 1024, 1024>}, {transform_indices = @transform_3, window_bounds = array<i64: 1024, 512>}, {transform_indices = @transform_4, window_bounds = array<i64: 8, 1024>}, {pipeline_mode = #tpu.pipeline_mode<synchronous>, transform_indices = @transform_5, window_bounds = array<i64: 1, 1536>}, {pipeline_mode = #tpu.pipeline_mode<synchronous>, transform_indices = @transform_6, window_bounds = array<i64: 8, 384>}, {pipeline_mode = #tpu.pipeline_mode<synchronous>, transform_indices = @transform_7, window_bounds = array<i64: 8, 384>}]} {
    %c0_i32 = arith.constant 0 : i32
    %0 = arith.cmpi eq, %arg0, %c0_i32 : i32
    %1 = arith.extui %0 : i1 to i32
    %c0_i32_0 = arith.constant 0 : i32
    %2 = arith.cmpi ne, %1, %c0_i32_0 : i32
    scf.if %2 {
      %c0_16 = arith.constant 0 : index
      %c0_17 = arith.constant 0 : index
      %25 = vector.load %arg1[%c0_16, %c0_17] : memref<8x512xf32, #tpu.memory_space<vmem>>, vector<8x512xf32>
      %26 = arith.truncf %25 : vector<8x512xf32> to vector<8x512xbf16>
      %c0_18 = arith.constant 0 : index
      %c0_19 = arith.constant 0 : index
      %27 = vector.load %arg2[%c0_18, %c0_19] : memref<512x1024xbf16, #tpu.memory_space<vmem>>, vector<512x1024xbf16>
      %cst_20 = arith.constant dense<0.000000e+00> : vector<8x1024xf32>
      %28 = tpu.matmul %26, %27, %cst_20 {dimension_numbers = #tpu.dot_dimension_numbers<[1], [0], [0], [1], [0, 0, 1, 1], [], []>} : vector<8x512xbf16>, vector<512x1024xbf16>, vector<8x1024xf32> -> vector<8x1024xf32>
      %c0_21 = arith.constant 0 : index
      %c0_22 = arith.constant 0 : index
      %29 = vector.load %arg6[%c0_21, %c0_22] : memref<1x1536xf32, #tpu.memory_space<vmem>>, vector<1x1024xf32>
      %30 = vector.broadcast %29 : vector<1x1024xf32> to vector<8x1024xf32>
      %31 = arith.addf %28, %30 : vector<8x1024xf32>
      %cst_23 = arith.constant 0.000000e+00 : f32
      %32 = vector.broadcast %cst_23 : f32 to vector<8x1024xf32>
      %33 = arith.maximumf %31, %32 : vector<8x1024xf32>
      %34 = arith.truncf %33 : vector<8x1024xf32> to vector<8x1024xbf16>
      %c0_24 = arith.constant 0 : index
      %c0_25 = arith.constant 0 : index
      %35 = vector.load %arg9[%c0_24, %c0_25] : memref<8x1024xbf16, #tpu.memory_space<vmem>>, vector<8x1024xbf16>
      tpu.vector_store %arg9[%c0_24, %c0_25], %34 {strides = array<i32>} : memref<8x1024xbf16, #tpu.memory_space<vmem>>, vector<8x1024xbf16>,
      %cst_26 = arith.constant 0.000000e+00 : f32
      %36 = vector.broadcast %cst_26 : f32 to vector<8x512xf32>
      %c0_27 = arith.constant 0 : index
      %c0_28 = arith.constant 0 : index
      %37 = vector.load %arg10[%c0_27, %c0_28] : memref<8x512xf32, #tpu.memory_space<vmem>>, vector<8x512xf32>
      tpu.vector_store %arg10[%c0_27, %c0_28], %36 {strides = array<i32>} : memref<8x512xf32, #tpu.memory_space<vmem>>, vector<8x512xf32>,
    } else {
    }
    %c0 = arith.constant 0 : index
    %c0_1 = arith.constant 0 : index
    %3 = vector.load %arg3[%c0, %c0_1] : memref<1024x1024xi8, #tpu.memory_space<vmem>>, vector<1024x1024xi8>
    %4 = arith.sitofp %3 : vector<1024x1024xi8> to vector<1024x1024xf32>
    %5 = arith.truncf %4 : vector<1024x1024xf32> to vector<1024x1024xbf16>
    %c0_2 = arith.constant 0 : index
    %c0_3 = arith.constant 0 : index
    %6 = vector.load %arg9[%c0_2, %c0_3] : memref<8x1024xbf16, #tpu.memory_space<vmem>>, vector<8x1024xbf16>
    %cst = arith.constant dense<0.000000e+00> : vector<8x1024xf32>
    %7 = tpu.matmul %6, %5, %cst {dimension_numbers = #tpu.dot_dimension_numbers<[1], [0], [0], [1], [0, 0, 1, 1], [], []>} : vector<8x1024xbf16>, vector<1024x1024xbf16>, vector<8x1024xf32> -> vector<8x1024xf32>
    %c1 = arith.constant 1 : index
    %c0_4 = arith.constant 0 : index
    %8 = vector.load %arg5[%c1, %c0_4] : memref<8x1024xf32, #tpu.memory_space<vmem>>, vector<1x1024xf32>
    %9 = vector.broadcast %8 : vector<1x1024xf32> to vector<8x1024xf32>
    %10 = arith.mulf %7, %9 : vector<8x1024xf32>
    %c0_5 = arith.constant 0 : index
    %c0_6 = arith.constant 0 : index
    %11 = vector.load %arg5[%c0_5, %c0_6] : memref<8x1024xf32, #tpu.memory_space<vmem>>, vector<1x1024xf32>
    %12 = vector.broadcast %11 : vector<1x1024xf32> to vector<8x1024xf32>
    %13 = arith.addf %10, %12 : vector<8x1024xf32>
    %cst_7 = arith.constant 0.000000e+00 : f32
    %14 = vector.broadcast %cst_7 : f32 to vector<8x1024xf32>
    %15 = arith.maximumf %13, %14 : vector<8x1024xf32>
    %16 = arith.truncf %15 : vector<8x1024xf32> to vector<8x1024xbf16>
    %c0_8 = arith.constant 0 : index
    %c0_9 = arith.constant 0 : index
    %17 = vector.load %arg10[%c0_8, %c0_9] : memref<8x512xf32, #tpu.memory_space<vmem>>, vector<8x512xf32>
    %c0_10 = arith.constant 0 : index
    %c0_11 = arith.constant 0 : index
    %18 = vector.load %arg4[%c0_10, %c0_11] : memref<1024x512xbf16, #tpu.memory_space<vmem>>, vector<1024x512xbf16>
    %cst_12 = arith.constant dense<0.000000e+00> : vector<8x512xf32>
    %19 = tpu.matmul %16, %18, %cst_12 {dimension_numbers = #tpu.dot_dimension_numbers<[1], [0], [0], [1], [0, 0, 1, 1], [], []>} : vector<8x1024xbf16>, vector<1024x512xbf16>, vector<8x512xf32> -> vector<8x512xf32>
    %20 = arith.addf %17, %19 : vector<8x512xf32>
    %c0_13 = arith.constant 0 : index
    %c0_14 = arith.constant 0 : index
    %21 = vector.load %arg10[%c0_13, %c0_14] : memref<8x512xf32, #tpu.memory_space<vmem>>, vector<8x512xf32>
    tpu.vector_store %arg10[%c0_13, %c0_14], %20 {strides = array<i32>} : memref<8x512xf32, #tpu.memory_space<vmem>>, vector<8x512xf32>,
    %c1_i32 = arith.constant 1 : i32
    %22 = arith.cmpi eq, %arg0, %c1_i32 : i32
    %23 = arith.extui %22 : i1 to i32
    %c0_i32_15 = arith.constant 0 : i32
    %24 = arith.cmpi ne, %23, %c0_i32_15 : i32
    scf.if %24 {
      %c0_16 = arith.constant 0 : index
      %c0_17 = arith.constant 0 : index
      %25 = vector.load %arg10[%c0_16, %c0_17] : memref<8x512xf32, #tpu.memory_space<vmem>>, vector<8x512xf32>
      %c0_18 = arith.constant 0 : index
      %c1024 = arith.constant 1024 : index
      %26 = vector.load %arg6[%c0_18, %c1024] : memref<1x1536xf32, #tpu.memory_space<vmem>>, vector<1x512xf32>
      %27 = vector.broadcast %26 : vector<1x512xf32> to vector<8x512xf32>
      %28 = arith.addf %25, %27 : vector<8x512xf32>
      %29 = vector.extract_strided_slice %28 {offsets = [0, 0], sizes = [8, 384], strides = [1, 1]} : vector<8x512xf32> to vector<8x384xf32>
      %30 = vector.extract_strided_slice %28 {offsets = [0, 384], sizes = [8, 1], strides = [1, 1]} : vector<8x512xf32> to vector<8x1xf32>
      %31 = math.tanh %30 : vector<8x1xf32>
      %32 = vector.extract_strided_slice %28 {offsets = [0, 385], sizes = [8, 1], strides = [1, 1]} : vector<8x512xf32> to vector<8x1xf32>
      %33 = math.tanh %32 : vector<8x1xf32>
      %34 = vector.extract_strided_slice %28 {offsets = [0, 386], sizes = [8, 1], strides = [1, 1]} : vector<8x512xf32> to vector<8x1xf32>
      %35 = math.tanh %34 : vector<8x1xf32>
      %c0_19 = arith.constant 0 : index
      %c0_20 = arith.constant 0 : index
      %36 = vector.load %arg7[%c0_19, %c0_20] : memref<8x384xf32, #tpu.memory_space<vmem>>, vector<1x384xf32>
      %c1_21 = arith.constant 1 : index
      %c0_22 = arith.constant 0 : index
      %37 = vector.load %arg7[%c1_21, %c0_22] : memref<8x384xf32, #tpu.memory_space<vmem>>, vector<1x384xf32>
      %c2 = arith.constant 2 : index
      %c0_23 = arith.constant 0 : index
      %38 = vector.load %arg7[%c2, %c0_23] : memref<8x384xf32, #tpu.memory_space<vmem>>, vector<1x384xf32>
      %39 = vector.broadcast %31 : vector<8x1xf32> to vector<8x384xf32>
      %40 = vector.broadcast %38 : vector<1x384xf32> to vector<8x384xf32>
      %41 = arith.mulf %39, %40 : vector<8x384xf32>
      %c3 = arith.constant 3 : index
      %c0_24 = arith.constant 0 : index
      %42 = vector.load %arg7[%c3, %c0_24] : memref<8x384xf32, #tpu.memory_space<vmem>>, vector<1x384xf32>
      %43 = vector.broadcast %33 : vector<8x1xf32> to vector<8x384xf32>
      %44 = vector.broadcast %42 : vector<1x384xf32> to vector<8x384xf32>
      %45 = arith.mulf %43, %44 : vector<8x384xf32>
      %46 = arith.addf %41, %45 : vector<8x384xf32>
      %c4 = arith.constant 4 : index
      %c0_25 = arith.constant 0 : index
      %47 = vector.load %arg7[%c4, %c0_25] : memref<8x384xf32, #tpu.memory_space<vmem>>, vector<1x384xf32>
      %48 = vector.broadcast %35 : vector<8x1xf32> to vector<8x384xf32>
      %49 = vector.broadcast %47 : vector<1x384xf32> to vector<8x384xf32>
      %50 = arith.mulf %48, %49 : vector<8x384xf32>
      %51 = arith.addf %46, %50 : vector<8x384xf32>
      %52 = vector.broadcast %36 : vector<1x384xf32> to vector<8x384xf32>
      %53 = arith.addf %52, %29 : vector<8x384xf32>
      %54 = arith.negf %53 : vector<8x384xf32>
      %55 = math.exp %54 : vector<8x384xf32>
      %cst_26 = arith.constant 1.000000e+00 : f32
      %56 = vector.broadcast %cst_26 : f32 to vector<8x384xf32>
      %57 = arith.addf %56, %55 : vector<8x384xf32>
      %58 = arith.divf %56, %57 : vector<8x384xf32>
      %59 = vector.broadcast %37 : vector<1x384xf32> to vector<8x384xf32>
      %60 = arith.mulf %58, %59 : vector<8x384xf32>
      %cst_27 = arith.constant 0.000000e+00 : f32
      %61 = vector.broadcast %cst_27 : f32 to vector<8x384xf32>
      %62 = arith.maximumf %60, %61 : vector<8x384xf32>
      %cst_28 = arith.constant 1.000000e+00 : f32
      %63 = vector.broadcast %cst_28 : f32 to vector<8x384xf32>
      %64 = arith.subf %63, %51 : vector<8x384xf32>
      %65 = arith.mulf %62, %64 : vector<8x384xf32>
      %cst_29 = arith.constant 0.000000e+00 : f32
      %66 = vector.broadcast %cst_29 : f32 to vector<8x384xf32>
      %67 = arith.subf %66, %60 : vector<8x384xf32>
      %cst_30 = arith.constant 0.000000e+00 : f32
      %68 = vector.broadcast %cst_30 : f32 to vector<8x384xf32>
      %69 = arith.maximumf %67, %68 : vector<8x384xf32>
      %cst_31 = arith.constant 1.000000e+00 : f32
      %70 = vector.broadcast %cst_31 : f32 to vector<8x384xf32>
      %71 = arith.addf %70, %51 : vector<8x384xf32>
      %72 = arith.mulf %69, %71 : vector<8x384xf32>
      %73 = arith.subf %65, %72 : vector<8x384xf32>
      %74 = arith.addf %73, %51 : vector<8x384xf32>
      %cst_32 = arith.constant 5.000000e-01 : f32
      %75 = vector.broadcast %cst_32 : f32 to vector<8x384xf32>
      %76 = arith.mulf %74, %75 : vector<8x384xf32>
      %c0_33 = arith.constant 0 : index
      %c0_34 = arith.constant 0 : index
      %77 = vector.load %arg8[%c0_33, %c0_34] : memref<8x384xf32, #tpu.memory_space<vmem>>, vector<8x384xf32>
      tpu.vector_store %arg8[%c0_33, %c0_34], %76 {strides = array<i32>} : memref<8x384xf32, #tpu.memory_space<vmem>>, vector<8x384xf32>,
    } else {
    }
    return
  }
  func.func @transform_0(%arg0: i32) -> (i32, i32) {
    %c0_i32 = arith.constant 0 : i32
    %c0_i32_0 = arith.constant 0 : i32
    %c0_i32_1 = arith.constant 0 : i32
    return %c0_i32, %c0_i32_0 : i32, i32
  }
  func.func @transform_1(%arg0: i32) -> (i32, i32) {
    %c0_i32 = arith.constant 0 : i32
    %c0_i32_0 = arith.constant 0 : i32
    %c0_i32_1 = arith.constant 0 : i32
    return %c0_i32, %c0_i32_0 : i32, i32
  }
  func.func @transform_2(%arg0: i32) -> (i32, i32) {
    %c0_i32 = arith.constant 0 : i32
    %c0_i32_0 = arith.constant 0 : i32
    return %c0_i32, %arg0 : i32, i32
  }
  func.func @transform_3(%arg0: i32) -> (i32, i32) {
    %c0_i32 = arith.constant 0 : i32
    %c0_i32_0 = arith.constant 0 : i32
    return %arg0, %c0_i32 : i32, i32
  }
  func.func @transform_4(%arg0: i32) -> (i32, i32) {
    %c0_i32 = arith.constant 0 : i32
    %c0_i32_0 = arith.constant 0 : i32
    return %c0_i32, %arg0 : i32, i32
  }
  func.func @transform_5(%arg0: i32) -> (i32, i32) {
    %c0_i32 = arith.constant 0 : i32
    %c0_i32_0 = arith.constant 0 : i32
    %c0_i32_1 = arith.constant 0 : i32
    return %c0_i32, %c0_i32_0 : i32, i32
  }
  func.func @transform_6(%arg0: i32) -> (i32, i32) {
    %c0_i32 = arith.constant 0 : i32
    %c0_i32_0 = arith.constant 0 : i32
    %c0_i32_1 = arith.constant 0 : i32
    return %c0_i32, %c0_i32_0 : i32, i32
  }
  func.func @transform_7(%arg0: i32) -> (i32, i32) {
    %c0_i32 = arith.constant 0 : i32
    %c0_i32_0 = arith.constant 0 : i32
    %c0_i32_1 = arith.constant 0 : i32
    return %c0_i32, %c0_i32_0 : i32, i32
  }
}

</mosaic_0001>

<bundles_post_ra>
// kernel: decoder_forward.1
= control target key start
LH: loop header
LB: loop body
LE: loop exit
PB: predicated region body
PF: predicated region fallthrough
CT: control target
= control target key end

     0   :  { %s8593_s0 = inlined_call_operand.vmem [shape: f32[8,512], index: 0, kind: input, shape index: {}]   ;;  %s8594_s1 = inlined_call_operand.hbm [shape: bf16[512,1024], index: 1, kind: input, shape index: {}]   ;;  %s8595_s2 = inlined_call_operand.hbm [shape: s8[1024,2048], index: 2, kind: input, shape index: {}]   ;;  %s8596_s3 = inlined_call_operand.hbm [shape: bf16[2048,512], index: 3, kind: input, shape index: {}]   ;;  %s8597_s4 = inlined_call_operand.hbm [shape: f32[8,2048], index: 4, kind: input, shape index: {}]   ;;  %s8598_s5 = inlined_call_operand.hbm [shape: f32[1,1536], index: 5, kind: input, shape index: {}]   ;;  %s8599_s6 = inlined_call_operand.hbm [shape: f32[8,384], index: 6, kind: input, shape index: {}]   ;;  %s8600_s7 = inlined_call_operand.vmem [shape: f32[8,384], index: 7, kind: output, shape index: {}]  }
   0x1   :  { %8621 = sst [smem:[#allocation22_spill]] %s8593_s0 }
   0x2   :  { %8622 = sst [smem:[#allocation23_spill]] %s8595_s2 }
   0x3   :  { %8623 = sst [smem:[#allocation24_spill]] %s8598_s5 }
   0x4   :  { %8624 = sst [smem:[#allocation25_spill]] %s8600_s7 }
   0x5   :  { %12 = vsyncpa [#allocation5], 0 }
   0x6   :  { %13 = vsyncpa [#allocation7], 0 }
   0x7   :  { %15 = vsyncpa [#allocation7 + $0x1], 0 }
   0x8   :  { %16 = vsyncpa [#allocation10], 0 }
   0x9   :  { %18 = vsyncpa [#allocation10 + $0x1], 0 }
   0xa   :  { %19 = vsyncpa [#allocation13], 0  ;;  %s7564_s24 = smov 0   ;;  %s7566_s25 = smov 0  }
   0xb   :  { %s7568_s26 = smov 0   ;;  %s7570_s27 = smov 0  }
   0xc LB: > { %s7583_s28 = sadd.s32 4294967295, %s7505_s27   ;;  %s7586_s29 = sadd.s32 1, %s7505_s27   ;;  %s7505_s27 = sphi %s7570_s27, %s8659_s27   ;;  %s7501_s26 = sphi %s7568_s26, %s8663_s26   ;;  %s7497_s25 = sphi %s7566_s25, %s8662_s25   ;;  %s7493_s24 = sphi %s7564_s24, %s8661_s24  }
   0xd   : > { %8625 = sst [smem:[#allocation19_spill]] %s7586_s29  ;;  %s71_s30 = ssub.s32 %s7505_s27, %s7586_s29 }
   0xe   : > { %s74_s8 = sadd.s32 1, %s7501_s26  ;;  %p72_p0 = scmp.eq.s32.totalorder %s71_s30, 0 }
   0xf   : > { %p81_p1 = scmp.ne.s32.totalorder %s7501_s26, %s7497_s25  ;;  %p82_p2 = scmp.eq.s32.totalorder %s7505_s27, 0 }
  0x10   : > { %p87_p3 = scmp.ne.s32.totalorder %s7497_s25, %s7493_s24  ;;  %p8601_p5 = scmp.eq.s32.totalorder %s7583_s28, 0 }
  0x11   : > { %s7596_s9 = scalar_select %p72_p0, %s7501_s26, %s74_s8  }
  0x12   : > { %p7598_p4 = por %p82_p2, %p81_p1  ;;  %p6145_p6 = scmp.ge.s32.totalorder %s7505_s27, 1 }
  0x13   : > { %8626 = sst [smem:[#allocation20_spill]] %s7596_s9  ;;  %p213_p7 = scmp.lt.s32.totalorder %s7505_s27, 3 }
  0x14   : > { %p7607_p8 = por %p8601_p5, %p87_p3  ;;  %s7507_s13 = smov [#allocation11]  }
  0x15   : > { %p7612_p10 = pnand %p6145_p6, %p213_p7  ;;  %s242_s14 = sshll.u32 %s7507_s13, 4  ;;  %s243_s14 = int_to_ptr.vmem [resolvable:$true] %s242_s14 }
  0x16   : > { %s8628_s11 = scalar_select %p7607_p8, 1, 0 }
  0x17   : > { %s8630_s12 = scalar_select %p7612_p10, 1, 0 }
  0x18   : > { %8629 = sst [smem:[#allocation21_spill]] %s8628_s11  ;;  %p6798_p11 = pneg %p7612_p10 }
  0x19   : > { %p6821_p12 = scmp.lt.s32.totalorder %s7505_s27, 2  ;;  %s8607_s15 = sand.u32 1, %s7505_s27  }
  0x1a   : > { %p7622_p13 = pnand %p6798_p11, %p8601_p5  ;;  %s8606_s18 = sand.u32 1, %s7501_s26  }
  0x1b   : > { %p7628_p0 = pnand %p6821_p12, %p7598_p4  ;;  %s7635_s19 = sshll.u32 %s8606_s18, 11 }
  0x1c   : > { %s8631_s16 = scalar_select %p7622_p13, 1, 0 }
  0x1d   : > { %s8632_s17 = scalar_select %p7628_p0, 1, 0 }
  0x1e   : > { %s8633_s5 = sld [smem:[#allocation24_spill]]  ;;  %p7645_p2 = pneg %p7622_p13 }
  0x20   : > { %s8634_s30 = scalar_select %p7645_p2, 1, 0 }
  0x24   : > { %s7281_s22 = scalar_lea.hbm %s8633_s5, 192 }
  0x25   : > { %p7282_p1 = scmp.ne.s32.totalorder %s8633_s5, %s7281_s22  ;;  %p7288_p6 = scmp.lt.u32.totalorder %s7281_s22, %s8633_s5 }
  0x27   : > { %p7284_p3 = pnand %p7645_p2, %p7282_p1 }
  0x29   : > { %p7285_p4 = pneg %p7284_p3 }
  0x2b   : > { %p7290_p7 = pnand %p7288_p6, %p7285_p4 }
  0x2d   : > { %7293 = shalt.err (!%p7290_p7)
}
  0x2e   : > { %s7294_s13 = scalar_lea.vmem %s243_s14, 192  ;;  %p7302_p5 = scmp.lt.s32.totalorder %s243_s14, %s243_s14 }
  0x2f   : > { %p7295_p11 = scmp.ne.s32.totalorder %s243_s14, %s7294_s13  ;;  %p7303_p8 = scmp.lt.s32.totalorder %s7294_s13, %s7294_s13 }
  0x31   : > { %p7297_p12 = pnand %p7295_p11, %p7645_p2  ;;  %p7304_p10 = por %p7303_p8, %p7302_p5 }
  0x33   : > { %p7298_p9 = pneg %p7297_p12 }
  0x35   : > { %p7305_p0 = pnand %p7304_p10, %p7298_p9 }
  0x37   : > { %7308 = shalt.err (!%p7305_p0)
}
  0x38   : > { %6804 = dma.hbm_to_vmem [thread:$0]  (!%p7622_p13), %s8633_s5, 192, %s243_s14, [#allocation10]  }
  0x39   : > { %s8605_s22 = sshll.u32 %s7505_s27, 10  ;;  %s268_s23 = scalar_lea.vmem [#allocation6], %s7635_s19 }
  0x3a   : > { %s275_s24 = sshll.u32 %s268_s23, 4  ;;  %s8635_s2 = sld [smem:[#allocation23_spill]]  ;;  %s7670_s24 = int_to_ptr.vmem [resolvable:$true] %s275_s24 }
  0x3b   : > { %s7674_s20 = scalar_lea.sflag [#allocation7], %s8607_s15  ;;  %p8636_p8 = scmp.ne.s32.totalorder %s8632_s17, 0 }
  0x3d   : > { %p7680_p9 = pneg %p8636_p8 }
  0x3f   : > { %s8637_s14 = scalar_select %p7680_p9, 1, 0 }
  0x40   : > { %s7668_s13 = scalar_lea.hbm %s8635_s2, %s8605_s22  ;;  %s7314_s10 = scalar_lea.hbm %s8635_s2, 65536 }
  0x41   : > { %s7309_s21 = scalar_lea.hbm %s7668_s13, 32768  ;;  %p7315_p1 = scmp.lt.u32.totalorder %s7668_s13, %s8635_s2 }
  0x42   : > { %p7310_p5 = scmp.ne.s32.totalorder %s7668_s13, %s7309_s21  ;;  %p7316_p3 = scmp.lt.u32.totalorder %s7314_s10, %s7309_s21 }
  0x43   : > { %p7318_p6 = scmp.lt.u32.totalorder %s7309_s21, %s7668_s13 }
  0x44   : > { %p7312_p10 = pnand %p7680_p9, %p7310_p5  ;;  %p7317_p4 = por %p7316_p3, %p7315_p1 }
  0x46   : > { %p7313_p0 = pneg %p7312_p10  ;;  %p7319_p7 = por %p7318_p6, %p7317_p4 }
  0x48   : > { %p7320_p11 = pnand %p7319_p7, %p7313_p0 }
  0x4a   : > { %7323 = shalt.err (!%p7320_p11)
}
  0x4b   : > { %s7324_s15 = scalar_lea.vmem %s7670_s24, 32768  ;;  %s7508_s23 = smov [#allocation6]  }
  0x4c   : > { %p7325_p12 = scmp.ne.s32.totalorder %s7670_s24, %s7324_s15  ;;  %s7329_s8 = sshll.u32 %s7508_s23, 4  ;;  %s7330_s8 = int_to_ptr.vmem [resolvable:$false] %s7329_s8 }
  0x4d   : > { %s7331_s18 = scalar_lea.vmem %s7330_s8, 65536  ;;  %p7332_p13 = scmp.lt.s32.totalorder %s7670_s24, %s7330_s8 }
  0x4e   : > { %p7327_p5 = pnand %p7325_p12, %p7680_p9  ;;  %p7333_p2 = scmp.lt.s32.totalorder %s7331_s18, %s7324_s15 }
  0x50   : > { %p7328_p10 = pneg %p7327_p5  ;;  %p7334_p1 = por %p7333_p2, %p7332_p13 }
  0x52   : > { %p7335_p3 = pnand %p7334_p1, %p7328_p10 }
  0x54   : > { %7338 = shalt.err (!%p7335_p3)
}
  0x55   : > { %s7509_s22 = smov 2048   ;;  %s7510_s21 = smov 1024  }
  0x56   : > { %s7511_s10 = smov 64   ;;  %s7512_s2 = smov [#allocation4]  }
  0x57   : > { %6811 = dma.hbm_to_vmem [thread:$0]  (!%p8636_p8), %s7668_s13, 32768, %s7670_s24, %s7674_s20, %s7509_s22, %s7510_s21, %s7511_s10  }
  0x58   : > { %s228_s5 = sshll.u32 %s7512_s2, 4  ;;  %s7339_s15 = scalar_lea.hbm %s8594_s1, 32768  ;;  %s229_s5 = int_to_ptr.vmem [resolvable:$true] %s228_s5 }
  0x59   : > { %p7340_p13 = scmp.ne.s32.totalorder %s8594_s1, %s7339_s15  ;;  %p8638_p2 = scmp.ne.s32.totalorder %s8634_s30, 0 }
  0x5a   : > { %p7346_p6 = scmp.lt.u32.totalorder %s7339_s15, %s8594_s1 }
  0x5b   : > { %p7342_p0 = pnand %p7340_p13, %p8638_p2 }
  0x5d   : > { %p7343_p4 = pneg %p7342_p0 }
  0x5f   : > { %p7348_p7 = pnand %p7346_p6, %p7343_p4 }
  0x61   : > { %7351 = shalt.err (!%p7348_p7)
}
  0x62   : > { %s7352_s24 = scalar_lea.vmem %s229_s5, 32768  ;;  %p7360_p10 = scmp.lt.s32.totalorder %s229_s5, %s229_s5 }
  0x63   : > { %p7353_p11 = scmp.ne.s32.totalorder %s229_s5, %s7352_s24  ;;  %p7361_p1 = scmp.lt.s32.totalorder %s7352_s24, %s7352_s24 }
  0x65   : > { %p7355_p12 = pnand %p7353_p11, %p8638_p2  ;;  %p7362_p3 = por %p7361_p1, %p7360_p10 }
  0x67   : > { %p7356_p5 = pneg %p7355_p12 }
  0x69   : > { %p7363_p8 = pnand %p7362_p3, %p7356_p5 }
  0x6b   : > { %7366 = shalt.err (!%p7363_p8)
}
  0x6c   : > { %s7513_s2 = smov 512   ;;  %s7514_s9 = smov 32  }
  0x6d   : > { %p8639_p13 = scmp.ne.s32.totalorder %s8631_s16, 0  ;;  %s7515_s13 = smov [#allocation12]  }
  0x6e   : > { %s253_s22 = sshll.u32 %s7515_s13, 4  ;;  %s6702_s21 = sshll.u32 %s7505_s27, 15  ;;  %s254_s22 = int_to_ptr.vmem [resolvable:$true] %s253_s22 }
  0x6f   : > { %6801 = dma.hbm_to_vmem [thread:$0]  (!%p8639_p13), %s8594_s1, 32768, %s229_s5, [#allocation5], %s7513_s2, %s7513_s2, %s7514_s9  }
  0x70   : > { %s7726_s15 = scalar_lea.hbm %s8596_s3, %s6702_s21  ;;  %s7367_s24 = scalar_lea.hbm %s8599_s6, 384 }
  0x71   : > { %p7368_p8 = scmp.ne.s32.totalorder %s8599_s6, %s7367_s24  ;;  %p7374_p6 = scmp.lt.u32.totalorder %s7367_s24, %s8599_s6 }
  0x73   : > { %p7370_p0 = pnand %p7368_p8, %p8638_p2 }
  0x75   : > { %p7371_p4 = pneg %p7370_p0 }
  0x77   : > { %p7376_p7 = pnand %p7374_p6, %p7371_p4 }
  0x79   : > { %7379 = shalt.err (!%p7376_p7)
}
  0x7a   : > { %s7380_s9 = scalar_lea.vmem %s254_s22, 384  ;;  %p7388_p10 = scmp.lt.s32.totalorder %s254_s22, %s254_s22 }
  0x7b   : > { %p7381_p11 = scmp.ne.s32.totalorder %s254_s22, %s7380_s9  ;;  %p7389_p1 = scmp.lt.s32.totalorder %s7380_s9, %s7380_s9 }
  0x7d   : > { %p7383_p12 = pnand %p7381_p11, %p8638_p2  ;;  %p7390_p3 = por %p7389_p1, %p7388_p10 }
  0x7f   : > { %p7384_p5 = pneg %p7383_p12 }
  0x81   : > { %p7391_p9 = pnand %p7390_p3, %p7384_p5 }
  0x83   : > { %7394 = shalt.err (!%p7391_p9)
}
  0x84   : > { %6807 = dma.hbm_to_vmem [thread:$0]  (!%p8639_p13), %s8599_s6, 384, %s254_s22, [#allocation13]  }
  0x85   : > { %s289_s30 = scalar_lea.vmem [#allocation8], %s7635_s19  ;;  %s7395_s29 = scalar_lea.hbm %s7726_s15, 32768 }
  0x86   : > { %s297_s7 = sshll.u32 %s289_s30, 4  ;;  %p7396_p2 = scmp.ne.s32.totalorder %s7726_s15, %s7395_s29  ;;  %s7747_s7 = int_to_ptr.vmem [resolvable:$true] %s297_s7 }
  0x87   : > { %p8640_p8 = scmp.ne.s32.totalorder %s8637_s14, 0  ;;  %s7400_s21 = scalar_lea.hbm %s8596_s3, 65536 }
  0x88   : > { %p7401_p4 = scmp.lt.u32.totalorder %s7726_s15, %s8596_s3  ;;  %p7402_p6 = scmp.lt.u32.totalorder %s7400_s21, %s7395_s29 }
  0x89   : > { %p7398_p9 = pnand %p7396_p2, %p8640_p8  ;;  %p7404_p13 = scmp.lt.u32.totalorder %s7395_s29, %s7726_s15 }
  0x8a   : > { %p7403_p7 = por %p7402_p6, %p7401_p4 }
  0x8b   : > { %p7399_p0 = pneg %p7398_p9 }
  0x8c   : > { %p7405_p11 = por %p7404_p13, %p7403_p7 }
  0x8e   : > { %p7406_p12 = pnand %p7405_p11, %p7399_p0 }
  0x90   : > { %7409 = shalt.err (!%p7406_p12)
}
  0x91   : > { %s7410_s19 = scalar_lea.vmem %s7747_s7, 32768  ;;  %s7516_s22 = smov [#allocation8]  }
  0x92   : > { %p7411_p5 = scmp.ne.s32.totalorder %s7747_s7, %s7410_s19  ;;  %s7415_s8 = sshll.u32 %s7516_s22, 4  ;;  %s7416_s8 = int_to_ptr.vmem [resolvable:$false] %s7415_s8 }
  0x93   : > { %s7417_s18 = scalar_lea.vmem %s7416_s8, 65536  ;;  %p7418_p3 = scmp.lt.s32.totalorder %s7747_s7, %s7416_s8 }
  0x94   : > { %p7413_p10 = pnand %p7411_p5, %p8640_p8  ;;  %p7419_p2 = scmp.lt.s32.totalorder %s7417_s18, %s7410_s19 }
  0x96   : > { %p7414_p1 = pneg %p7413_p10  ;;  %p7420_p9 = por %p7419_p2, %p7418_p3 }
  0x98   : > { %p7421_p4 = pnand %p7420_p9, %p7414_p1 }
  0x9a   : > { %7424 = shalt.err (!%p7421_p4)
}
  0x9b   : > { %s7517_s24 = smov 256   ;;  %s7518_s5 = smov 16  }
  0x9c   : > { %p8641_p0 = scmp.ne.s32.totalorder %s8632_s17, 0  ;;  %s8642_s2 = sand.u32 1, %s7501_s26  }
  0x9d   : > { %s6157_s9 = sshll.u32 %s8642_s2, 6  ;;  %s8643_s0 = sshll.u32 %s7505_s27, 10 }
  0x9e   : > { %6814 = dma.hbm_to_vmem [thread:$0]  (!%p8641_p0), %s7726_s15, 32768, %s7747_s7, %s7674_s20, %s7517_s24, %s7517_s24, %s7518_s5  }
  0x9f   : > { %s7778_s29 = scalar_lea.hbm %s8597_s4, %s8643_s0  ;;  %s311_s16 = scalar_lea.vmem [#allocation9], %s6157_s9 }
  0xa0   : > { %s319_s13 = sshll.u32 %s311_s16, 4  ;;  %s8644_s21 = sand.u32 1, %s7505_s27   ;;  %s320_s13 = int_to_ptr.vmem [resolvable:$true] %s319_s13 }
  0xa1   : > { %s308_s10 = scalar_lea.sflag [#allocation10], %s8644_s21  ;;  %s7425_s23 = scalar_lea.hbm %s7778_s29, 1024 }
  0xa2   : > { %p7426_p6 = scmp.ne.s32.totalorder %s7778_s29, %s7425_s23  ;;  %s7430_s7 = scalar_lea.hbm %s8597_s4, 2048 }
  0xa3   : > { %p7431_p11 = scmp.lt.u32.totalorder %s7778_s29, %s8597_s4  ;;  %p7432_p12 = scmp.lt.u32.totalorder %s7430_s7, %s7425_s23 }
  0xa4   : > { %p7428_p7 = pnand %p7426_p6, %p8640_p8  ;;  %p7434_p10 = scmp.lt.u32.totalorder %s7425_s23, %s7778_s29 }
  0xa5   : > { %p7433_p5 = por %p7432_p12, %p7431_p11 }
  0xa6   : > { %p7429_p13 = pneg %p7428_p7 }
  0xa7   : > { %p7435_p1 = por %p7434_p10, %p7433_p5 }
  0xa9   : > { %p7436_p3 = pnand %p7435_p1, %p7429_p13 }
  0xab   : > { %7439 = shalt.err (!%p7436_p3)
}
  0xac   : > { %s7440_s27 = scalar_lea.vmem %s320_s13, 1024  ;;  %s7519_s8 = smov [#allocation9]  }
  0xad   : > { %p7441_p2 = scmp.ne.s32.totalorder %s320_s13, %s7440_s27  ;;  %s7445_s18 = sshll.u32 %s7519_s8, 4  ;;  %s7446_s18 = int_to_ptr.vmem [resolvable:$false] %s7445_s18 }
  0xae   : > { %s7447_s24 = scalar_lea.vmem %s7446_s18, 2048  ;;  %p7448_p6 = scmp.lt.s32.totalorder %s320_s13, %s7446_s18 }
  0xaf   : > { %p7443_p9 = pnand %p7441_p2, %p8640_p8  ;;  %p7449_p7 = scmp.lt.s32.totalorder %s7447_s24, %s7440_s27 }
  0xb1   : > { %p7444_p4 = pneg %p7443_p9  ;;  %p7450_p0 = por %p7449_p7, %p7448_p6 }
  0xb3   : > { %p7451_p11 = pnand %p7450_p0, %p7444_p4 }
  0xb5   : > { %7454 = shalt.err (!%p7451_p11)
}
  0xb6   : > { %p8645_p12 = scmp.ne.s32.totalorder %s8632_s17, 0  ;;  %p8646_p13 = scmp.ne.s32.totalorder %s8630_s12, 0 }
  0xb7   : > { %p8647_p5 = scmp.eq.s32.totalorder (!%p8646_p13), %s7583_s28, 0 }
  0xb8   : > { %6817 = dma.hbm_to_vmem [thread:$0]  (!%p8645_p12), %s7778_s29, 1024, %s320_s13, %s308_s10  }
  0xb9   : > { %328 = sbr.rel (%p8646_p13) target bundleno = 1948 (0x79c), region = 48 }
  0xc0   : > { %7472 = dma.done.wait (%p8647_p5), [#allocation5], 32768   ;;  %p8648_p8 = pmov %p8647_p5 }
  0xc1   : > { %s8649_s14 = sld [smem:[#allocation21_spill]]  ;;  %s334_s5 = sand.u32 1, %s7583_s28  }
  0xc2   : > { %7474 = vsyncadd (%p8648_p8), [#allocation5], 4294934528  ;;  %s336_s2 = sand.u32 1, %s7497_s25   ;;  %s335_s0 = scalar_lea.sflag [#allocation7], %s334_s5 }
  0xc3   : > { %s6162_s9 = sshll.u32 %s336_s2, 11 }
  0xc4   : > { %s7807_s11 = scalar_lea.vmem [#allocation6], %s6162_s9 }
  0xc7   : > { %p8650_p0 = scmp.ne.s32.totalorder %s8649_s14, 0 }
  0xc9   : > { %7476 = dma.done.wait (%p8650_p0), %s335_s0, 65536  }
  0xca   : > { %7478 = vsyncadd (%p8650_p0), %s335_s0, 4294901760  ;;  %s6164_s12 = sshll.u32 %s336_s2, 6  ;;  %s7813_s17 = scalar_lea.vmem [#allocation8], %s6162_s9 }
  0xcb   : > { %s353_s30 = scalar_lea.sflag [#allocation10], %s334_s5  ;;  %s7815_s29 = scalar_lea.vmem [#allocation9], %s6164_s12 }
  0xcc   : > { %7480 = dma.done.wait (%p8650_p0), %s353_s30, 1024  }
  0xcd   : > { %7482 = vsyncadd (%p8650_p0), %s353_s30, 4294966272  ;;  %p8651_p10 = pmov %p8647_p5 }
  0xce   : > { %p8652_p1 = pmov %p8647_p5 }
  0xcf   : > { %7484 = dma.done.wait (%p8651_p10), [#allocation10], 192  }
  0xd0   : > { %7486 = vsyncadd (%p8652_p1), [#allocation10], 4294967104  ;;  %p8653_p3 = pmov %p8652_p1 }
  0xd1   : > { %p8654_p2 = pmov %p8652_p1 }
  0xd2   : > { %7488 = dma.done.wait (%p8653_p3), [#allocation13], 384  }
  0xd3   : > { %7490 = vsyncadd (%p8654_p2), [#allocation13], 4294966912  ;;  %p8655_p9 = scmp.ne.s32.totalorder %s7583_s28, 0 }
  0xd4   : > { %v415_v0 = vld [vmem:[#allocation4] sm:$0xff] (!%p8655_p9)  ;;  %v416_v2 = vld [vmem:[#allocation4 + $0x8] sm:$0xff] (!%p8655_p9)  ;;  %s8656_s21 = sld [smem:[#allocation22_spill]] (!%p8655_p9) }
  0xd5   : > { %406 = sbr.rel (%p8655_p9) target bundleno = 692 (0x2b4), region = 76  ;;  %v419_v1 = vld [vmem:[#allocation4 + $0x20] sm:$0xff] (!%p8655_p9)  ;;  %v420_v4 = vld [vmem:[#allocation4 + $0x28] sm:$0xff] (!%p8655_p9) }
  0xd6   : > { %v6169_v3 = vcombine.high (!%p8655_p9), %v415_v0, %v419_v1  ;;  %v6168_v5 = vcombine.low (!%p8655_p9), %v415_v0, %v419_v1  ;;  %v423_v6 = vld [vmem:[#allocation4 + $0x40] sm:$0xff] (!%p8655_p9)  ;;  %v6171_v8 = vcombine.high (!%p8655_p9), %v416_v2, %v420_v4  ;;  %v6170_v9 = vcombine.low (!%p8655_p9), %v416_v2, %v420_v4  ;;  %v424_v11 = vld [vmem:[#allocation4 + $0x48] sm:$0xff] (!%p8655_p9) }
  0xd7   : > { %v427_v7 = vld [vmem:[#allocation4 + $0x60] sm:$0xff] (!%p8655_p9)  ;;  %v428_v12 = vld [vmem:[#allocation4 + $0x68] sm:$0xff] (!%p8655_p9) }
  0xd8   : > { %v6177_v10 = vcombine.high (!%p8655_p9), %v423_v6, %v427_v7  ;;  %v431_v13 = vld [vmem:[#allocation4 + $0x80] sm:$0xff] (!%p8655_p9)  ;;  %1993 = vmatprep.subr.bf16.mxu0 (!%p8655_p9), %v6169_v3  ;;  %v6179_v14 = vcombine.high (!%p8655_p9), %v424_v11, %v428_v12  ;;  %v432_v16 = vld [vmem:[#allocation4 + $0x88] sm:$0xff] (!%p8655_p9)  ;;  %2075 = vmatprep.subr.bf16.mxu1 (!%p8655_p9), %v6171_v8  ;;  %v6176_v18 = vcombine.low (!%p8655_p9), %v423_v6, %v427_v7 }
  0xd9   : > { %v435_v15 = vld [vmem:[#allocation4 + $0xa0] sm:$0xff] (!%p8655_p9)  ;;  %v436_v17 = vld [vmem:[#allocation4 + $0xa8] sm:$0xff] (!%p8655_p9)  ;;  %1994 = vmatpush1.bf16.msra.mxu0 (!%p8655_p9), %v6168_v5  ;;  %2076 = vmatpush1.bf16.msra.mxu1 (!%p8655_p9), %v6170_v9  ;;  %v6178_v19 = vcombine.low (!%p8655_p9), %v424_v11, %v428_v12 }
  0xda   : > { %1995 = vmatprep.subr.bf16.mxu0 (!%p8655_p9), %v6177_v10  ;;  %v6185_v20 = vcombine.high (!%p8655_p9), %v431_v13, %v435_v15  ;;  %2077 = vmatprep.subr.bf16.mxu1 (!%p8655_p9), %v6179_v14  ;;  %v6187_v21 = vcombine.high (!%p8655_p9), %v432_v16, %v436_v17  ;;  %v439_v22 = vld [vmem:[#allocation4 + $0xc0] sm:$0xff] (!%p8655_p9)  ;;  %v440_v24 = vld [vmem:[#allocation4 + $0xc8] sm:$0xff] (!%p8655_p9)  ;;  %v6184_v26 = vcombine.low (!%p8655_p9), %v431_v13, %v435_v15 }
  0xdb   : > { %v443_v23 = vld [vmem:[#allocation4 + $0xe0] sm:$0xff] (!%p8655_p9)  ;;  %v444_v25 = vld [vmem:[#allocation4 + $0xe8] sm:$0xff] (!%p8655_p9)  ;;  %v6186_v27 = vcombine.low (!%p8655_p9), %v432_v16, %v436_v17 }
  0xdc   : > { %v6193_v28 = vcombine.high %v439_v22, %v443_v23  ;;  %v6195_v29 = vcombine.high %v440_v24, %v444_v25  ;;  %v447_v30 = vld [vmem:[#allocation4 + $0x100] sm:$0xff]  ;;  %v448_v32 = vld [vmem:[#allocation4 + $0x108] sm:$0xff]  ;;  %v6192_v34 = vcombine.low %v439_v22, %v443_v23  ;;  %v6194_v35 = vcombine.low %v440_v24, %v444_v25 }
  0xdd   : > { %1996 = vmatpush1.bf16.msra.mxu0 %v6176_v18  ;;  %2078 = vmatpush1.bf16.msra.mxu1 %v6178_v19  ;;  %v451_v31 = vld [vmem:[#allocation4 + $0x120] sm:$0xff]  ;;  %v452_v33 = vld [vmem:[#allocation4 + $0x128] sm:$0xff] }
  0xde   : > { %1997 = vmatprep.subr.bf16.mxu0 %v6185_v20  ;;  %2079 = vmatprep.subr.bf16.mxu1 %v6187_v21  ;;  %v6201_v36 = vcombine.high %v447_v30, %v451_v31  ;;  %v6203_v37 = vcombine.high %v448_v32, %v452_v33  ;;  %v455_v38 = vld [vmem:[#allocation4 + $0x140] sm:$0xff]  ;;  %v456_v40 = vld [vmem:[#allocation4 + $0x148] sm:$0xff]  ;;  %v6200_v42 = vcombine.low %v447_v30, %v451_v31 }
  0xdf   : > { %v459_v39 = vld [vmem:[#allocation4 + $0x160] sm:$0xff]  ;;  %v460_v41 = vld [vmem:[#allocation4 + $0x168] sm:$0xff]  ;;  %v6202_v43 = vcombine.low %v448_v32, %v452_v33 }
  0xe0   : > { %v6209_v44 = vcombine.high %v455_v38, %v459_v39  ;;  %v6211_v45 = vcombine.high %v456_v40, %v460_v41  ;;  %v463_v46 = vld [vmem:[#allocation4 + $0x180] sm:$0xff]  ;;  %v464_v48 = vld [vmem:[#allocation4 + $0x188] sm:$0xff]  ;;  %v6208_v50 = vcombine.low %v455_v38, %v459_v39  ;;  %v6210_v51 = vcombine.low %v456_v40, %v460_v41 }
  0xe1   : > { %1998 = vmatpush1.bf16.msra.mxu0 %v6184_v26  ;;  %2080 = vmatpush1.bf16.msra.mxu1 %v6186_v27  ;;  %v467_v47 = vld [vmem:[#allocation4 + $0x1a0] sm:$0xff]  ;;  %v468_v49 = vld [vmem:[#allocation4 + $0x1a8] sm:$0xff] }
  0xe2   : > { %1999 = vmatprep.subr.bf16.mxu0 %v6193_v28  ;;  %2081 = vmatprep.subr.bf16.mxu1 %v6195_v29  ;;  %v6217_v52 = vcombine.high %v463_v46, %v467_v47  ;;  %v408_v53 = vld [vmem:[%s8656_s21 + $0x8] sm:$0xff]  ;;  %v6219_v54 = vcombine.high %v464_v48, %v468_v49  ;;  %v471_v55 = vld [vmem:[#allocation4 + $0x1c0] sm:$0xff]  ;;  %v6216_v60 = vcombine.low %v463_v46, %v467_v47 }
  0xe3   : > { %v475_v56 = vld [vmem:[#allocation4 + $0x1e0] sm:$0xff]  ;;  %v7834_v57 = vpack.c.bf16 %v408_v53, %v408_v53  ;;  %v472_v58 = vld [vmem:[#allocation4 + $0x1c8] sm:$0xff]  ;;  %v6218_v61 = vcombine.low %v464_v48, %v468_v49 }
  0xe4   : > { %v476_v59 = vld [vmem:[#allocation4 + $0x1e8] sm:$0xff]  ;;  %v6225_v62 = vcombine.high %v471_v55, %v475_v56  ;;  %v479_v0 = vld [vmem:[#allocation4 + $0x200] sm:$0xff]  ;;  %v6224_v4 = vcombine.low %v471_v55, %v475_v56 }
  0xe5   : > { %2000 = vmatpush1.bf16.msra.mxu0 %v6192_v34  ;;  %2082 = vmatpush1.bf16.msra.mxu1 %v6194_v35  ;;  %v6227_v63 = vcombine.high %v472_v58, %v476_v59  ;;  %v483_v1 = vld [vmem:[#allocation4 + $0x220] sm:$0xff]  ;;  %v480_v2 = vld [vmem:[#allocation4 + $0x208] sm:$0xff]  ;;  %v6226_v5 = vcombine.low %v472_v58, %v476_v59 }
  0xe6   : > { %2001 = vmatprep.subr.bf16.mxu0 %v6201_v36  ;;  %2083 = vmatprep.subr.bf16.mxu1 %v6203_v37  ;;  %v484_v3 = vld [vmem:[#allocation4 + $0x228] sm:$0xff]  ;;  %v6233_v6 = vcombine.high %v479_v0, %v483_v1  ;;  %v487_v8 = vld [vmem:[#allocation4 + $0x240] sm:$0xff]  ;;  %v6232_v12 = vcombine.low %v479_v0, %v483_v1 }
  0xe7   : > { %2025 = vmatprep.mubr.bf16.mxu0 %v7834_v57  ;;  %2107 = vmatprep.mubr.bf16.mxu1 %v7834_v57  ;;  %v6235_v7 = vcombine.high %v480_v2, %v484_v3  ;;  %v491_v9 = vld [vmem:[#allocation4 + $0x260] sm:$0xff]  ;;  %v488_v10 = vld [vmem:[#allocation4 + $0x248] sm:$0xff]  ;;  %v6234_v13 = vcombine.low %v480_v2, %v484_v3 }
  0xe8   : > { %v492_v11 = vld [vmem:[#allocation4 + $0x268] sm:$0xff]  ;;  %v6241_v14 = vcombine.high %v487_v8, %v491_v9  ;;  %v495_v16 = vld [vmem:[#allocation4 + $0x280] sm:$0xff]  ;;  %v6240_v20 = vcombine.low %v487_v8, %v491_v9 }
  0xe9   : > { %2002 = vmatpush1.bf16.msra.mxu0 %v6200_v42  ;;  %2084 = vmatpush1.bf16.msra.mxu1 %v6202_v43  ;;  %v6243_v15 = vcombine.high %v488_v10, %v492_v11  ;;  %v499_v17 = vld [vmem:[#allocation4 + $0x2a0] sm:$0xff]  ;;  %v496_v18 = vld [vmem:[#allocation4 + $0x288] sm:$0xff]  ;;  %v6242_v21 = vcombine.low %v488_v10, %v492_v11 }
  0xea   : > { %2003 = vmatprep.subr.bf16.mxu0 %v6209_v44  ;;  %2085 = vmatprep.subr.bf16.mxu1 %v6211_v45  ;;  %v500_v19 = vld [vmem:[#allocation4 + $0x2a8] sm:$0xff]  ;;  %v6249_v22 = vcombine.high %v495_v16, %v499_v17  ;;  %v503_v24 = vld [vmem:[#allocation4 + $0x2c0] sm:$0xff]  ;;  %v6248_v28 = vcombine.low %v495_v16, %v499_v17 }
  0xeb   : > { %v6251_v23 = vcombine.high %v496_v18, %v500_v19  ;;  %v507_v25 = vld [vmem:[#allocation4 + $0x2e0] sm:$0xff]  ;;  %v504_v26 = vld [vmem:[#allocation4 + $0x2c8] sm:$0xff]  ;;  %v6250_v29 = vcombine.low %v496_v18, %v500_v19 }
  0xec   : > { %v508_v27 = vld [vmem:[#allocation4 + $0x2e8] sm:$0xff]  ;;  %v6257_v30 = vcombine.high %v503_v24, %v507_v25  ;;  %v511_v32 = vld [vmem:[#allocation4 + $0x300] sm:$0xff]  ;;  %v6256_v36 = vcombine.low %v503_v24, %v507_v25 }
  0xed   : > { %2004 = vmatpush1.bf16.msra.mxu0 %v6208_v50  ;;  %2086 = vmatpush1.bf16.msra.mxu1 %v6210_v51  ;;  %v6259_v31 = vcombine.high %v504_v26, %v508_v27  ;;  %v515_v33 = vld [vmem:[#allocation4 + $0x320] sm:$0xff]  ;;  %v512_v34 = vld [vmem:[#allocation4 + $0x308] sm:$0xff]  ;;  %v6258_v37 = vcombine.low %v504_v26, %v508_v27 }
  0xee   : > { %2005 = vmatprep.subr.bf16.mxu0 %v6217_v52  ;;  %2087 = vmatprep.subr.bf16.mxu1 %v6219_v54  ;;  %v516_v35 = vld [vmem:[#allocation4 + $0x328] sm:$0xff]  ;;  %v6265_v38 = vcombine.high %v511_v32, %v515_v33  ;;  %v519_v40 = vld [vmem:[#allocation4 + $0x340] sm:$0xff]  ;;  %v6264_v44 = vcombine.low %v511_v32, %v515_v33 }
  0xef   : > { %v6267_v39 = vcombine.high %v512_v34, %v516_v35  ;;  %v523_v41 = vld [vmem:[#allocation4 + $0x360] sm:$0xff]  ;;  %v520_v42 = vld [vmem:[#allocation4 + $0x348] sm:$0xff]  ;;  %v6266_v45 = vcombine.low %v512_v34, %v516_v35 }
  0xf0   : > { %v524_v43 = vld [vmem:[#allocation4 + $0x368] sm:$0xff]  ;;  %v6273_v46 = vcombine.high %v519_v40, %v523_v41  ;;  %v527_v48 = vld [vmem:[#allocation4 + $0x380] sm:$0xff]  ;;  %v6272_v52 = vcombine.low %v519_v40, %v523_v41 }
  0xf1   : > { %2006 = vmatpush1.bf16.msra.mxu0 %v6216_v60  ;;  %2088 = vmatpush1.bf16.msra.mxu1 %v6218_v61  ;;  %v6275_v47 = vcombine.high %v520_v42, %v524_v43  ;;  %v531_v49 = vld [vmem:[#allocation4 + $0x3a0] sm:$0xff]  ;;  %v528_v50 = vld [vmem:[#allocation4 + $0x388] sm:$0xff]  ;;  %v6274_v53 = vcombine.low %v520_v42, %v524_v43 }
  0xf2   : > { %2007 = vmatprep.subr.bf16.mxu0 %v6225_v62  ;;  %2089 = vmatprep.subr.bf16.mxu1 %v6227_v63  ;;  %v532_v51 = vld [vmem:[#allocation4 + $0x3a8] sm:$0xff]  ;;  %v6281_v54 = vcombine.high %v527_v48, %v531_v49  ;;  %v535_v56 = vld [vmem:[#allocation4 + $0x3c0] sm:$0xff]  ;;  %v6280_v61 = vcombine.low %v527_v48, %v531_v49 }
  0xf3   : > { %v6283_v55 = vcombine.high %v528_v50, %v532_v51  ;;  %v539_v58 = vld [vmem:[#allocation4 + $0x3e0] sm:$0xff]  ;;  %v536_v59 = vld [vmem:[#allocation4 + $0x3c8] sm:$0xff]  ;;  %v6282_v62 = vcombine.low %v528_v50, %v532_v51 }
  0xf4   : > { %v540_v60 = vld [vmem:[#allocation4 + $0x3e8] sm:$0xff]  ;;  %v6289_v63 = vcombine.high %v535_v56, %v539_v58  ;;  %v543_v1 = vld [vmem:[#allocation4 + $0x400] sm:$0xff] }
  0xf5   : > { %2008 = vmatpush1.bf16.msra.mxu0 %v6224_v4  ;;  %2090 = vmatpush1.bf16.msra.mxu1 %v6226_v5  ;;  %v6291_v0 = vcombine.high %v536_v59, %v540_v60  ;;  %v547_v2 = vld [vmem:[#allocation4 + $0x420] sm:$0xff]  ;;  %v544_v3 = vld [vmem:[#allocation4 + $0x408] sm:$0xff]  ;;  %v6288_v5 = vcombine.low %v535_v56, %v539_v58 }
  0xf6   : > { %2009 = vmatprep.subr.bf16.mxu0 %v6233_v6  ;;  %2091 = vmatprep.subr.bf16.mxu1 %v6235_v7  ;;  %v548_v4 = vld [vmem:[#allocation4 + $0x428] sm:$0xff]  ;;  %v407_v6 = vld [vmem:[%s8656_s21] sm:$0xff]  ;;  %v6290_v7 = vcombine.low %v536_v59, %v540_v60  ;;  %v6297_v8 = vcombine.high %v543_v1, %v547_v2  ;;  %v6296_v16 = vcombine.low %v543_v1, %v547_v2 }
  0xf7   : > { %v6299_v9 = vcombine.high %v544_v3, %v548_v4  ;;  %v551_v10 = vld [vmem:[#allocation4 + $0x440] sm:$0xff]  ;;  %v6298_v17 = vcombine.low %v544_v3, %v548_v4  ;;  %v564_v24 = vld [vmem:[#allocation4 + $0x4a8] sm:$0xff] }
  0xf8   : > { %v555_v11 = vld [vmem:[#allocation4 + $0x460] sm:$0xff]  ;;  %v572_v32 = vld [vmem:[#allocation4 + $0x4e8] sm:$0xff] }
  0xf9   : > { %2010 = vmatpush1.bf16.msra.mxu0 %v6232_v12  ;;  %2092 = vmatpush1.bf16.msra.mxu1 %v6234_v13  ;;  %v7841_v12 = vpack.c.bf16 %v407_v6, %v407_v6  ;;  %v552_v13 = vld [vmem:[#allocation4 + $0x448] sm:$0xff]  ;;  %v6305_v18 = vcombine.high %v551_v10, %v555_v11  ;;  %v6304_v25 = vcombine.low %v551_v10, %v555_v11  ;;  %v607_v6 = vld [vmem:[#allocation4 + $0x600] sm:$0xff] }
  0xfa   : > { %2011 = vmatprep.subr.bf16.mxu0 %v6241_v14  ;;  %2093 = vmatprep.subr.bf16.mxu1 %v6243_v15  ;;  %v556_v14 = vld [vmem:[#allocation4 + $0x468] sm:$0xff]  ;;  %v410_v15 = vld [vmem:[%s8656_s21 + $0x18] sm:$0xff] }
  0xfb   : > { %v6307_v19 = vcombine.high %v552_v13, %v556_v14  ;;  %v6306_v26 = vcombine.low %v552_v13, %v556_v14  ;;  %v580_v40 = vld [vmem:[#allocation4 + $0x528] sm:$0xff] }
  0xfc   : > { %v588_v48 = vld [vmem:[#allocation4 + $0x568] sm:$0xff] }
  0xfd   : > { %2012 = vmatpush1.bf16.msra.mxu0 %v6240_v20  ;;  %2094 = vmatpush1.bf16.msra.mxu1 %v6242_v21  ;;  %v559_v20 = vld [vmem:[#allocation4 + $0x480] sm:$0xff]  ;;  %v596_v56 = vld [vmem:[#allocation4 + $0x5a8] sm:$0xff] }
  0xfe   : > { %2013 = vmatprep.subr.bf16.mxu0 %v6249_v22  ;;  %2095 = vmatprep.subr.bf16.mxu1 %v6251_v23  ;;  %v563_v21 = vld [vmem:[#allocation4 + $0x4a0] sm:$0xff]  ;;  %v7846_v22 = vpack.c.bf16 %v410_v15, %v410_v15  ;;  %v560_v23 = vld [vmem:[#allocation4 + $0x488] sm:$0xff] }
  0xff   : > { %v6313_v27 = vcombine.high %v559_v20, %v563_v21  ;;  %v6312_v33 = vcombine.low %v559_v20, %v563_v21  ;;  %v6314_v34 = vcombine.low %v560_v23, %v564_v24  ;;  %v604_v1 = vld [vmem:[#allocation4 + $0x5e8] sm:$0xff]  ;;  %v615_v15 = vld [vmem:[#allocation4 + $0x640] sm:$0xff] }
 0x101   : > { %2014 = vmatpush1.bf16.msra.mxu0 %v6248_v28  ;;  %2096 = vmatpush1.bf16.msra.mxu1 %v6250_v29  ;;  %v6315_v28 = vcombine.high %v560_v23, %v564_v24  ;;  %v567_v29 = vld [vmem:[#allocation4 + $0x4c0] sm:$0xff] }
 0x102   : > { %2015 = vmatprep.subr.bf16.mxu0 %v6257_v30  ;;  %2097 = vmatprep.subr.bf16.mxu1 %v6259_v31  ;;  %v571_v30 = vld [vmem:[#allocation4 + $0x4e0] sm:$0xff]  ;;  %v568_v31 = vld [vmem:[#allocation4 + $0x4c8] sm:$0xff] }
 0x103   : > { %v6321_v35 = vcombine.high %v567_v29, %v571_v30  ;;  %v6320_v41 = vcombine.low %v567_v29, %v571_v30  ;;  %v6322_v42 = vcombine.low %v568_v31, %v572_v32  ;;  %v623_v24 = vld [vmem:[#allocation4 + $0x680] sm:$0xff] }
 0x105   : > { %2016 = vmatpush1.bf16.msra.mxu0 %v6256_v36  ;;  %2098 = vmatpush1.bf16.msra.mxu1 %v6258_v37  ;;  %v6323_v36 = vcombine.high %v568_v31, %v572_v32  ;;  %v575_v37 = vld [vmem:[#allocation4 + $0x500] sm:$0xff] }
 0x106   : > { %2017 = vmatprep.subr.bf16.mxu0 %v6265_v38  ;;  %2099 = vmatprep.subr.bf16.mxu1 %v6267_v39  ;;  %v579_v38 = vld [vmem:[#allocation4 + $0x520] sm:$0xff]  ;;  %v576_v39 = vld [vmem:[#allocation4 + $0x508] sm:$0xff] }
 0x107   : > { %v6329_v43 = vcombine.high %v575_v37, %v579_v38  ;;  %v6328_v49 = vcombine.low %v575_v37, %v579_v38  ;;  %v6330_v50 = vcombine.low %v576_v39, %v580_v40  ;;  %v631_v32 = vld [vmem:[#allocation4 + $0x6c0] sm:$0xff] }
 0x109   : > { %2018 = vmatpush1.bf16.msra.mxu0 %v6264_v44  ;;  %2100 = vmatpush1.bf16.msra.mxu1 %v6266_v45  ;;  %v6331_v44 = vcombine.high %v576_v39, %v580_v40  ;;  %v583_v45 = vld [vmem:[#allocation4 + $0x540] sm:$0xff] }
 0x10a   : > { %2019 = vmatprep.subr.bf16.mxu0 %v6273_v46  ;;  %2101 = vmatprep.subr.bf16.mxu1 %v6275_v47  ;;  %v587_v46 = vld [vmem:[#allocation4 + $0x560] sm:$0xff]  ;;  %v584_v47 = vld [vmem:[#allocation4 + $0x548] sm:$0xff] }
 0x10b   : > { %v6337_v51 = vcombine.high %v583_v45, %v587_v46  ;;  %v6336_v58 = vcombine.low %v583_v45, %v587_v46  ;;  %v6338_v59 = vcombine.low %v584_v47, %v588_v48  ;;  %v639_v40 = vld [vmem:[#allocation4 + $0x700] sm:$0xff] }
 0x10d   : > { %2020 = vmatpush1.bf16.msra.mxu0 %v6272_v52  ;;  %2102 = vmatpush1.bf16.msra.mxu1 %v6274_v53  ;;  %v6339_v52 = vcombine.high %v584_v47, %v588_v48  ;;  %v591_v53 = vld [vmem:[#allocation4 + $0x580] sm:$0xff] }
 0x10e   : > { %2021 = vmatprep.subr.bf16.mxu0 %v6281_v54  ;;  %2103 = vmatprep.subr.bf16.mxu1 %v6283_v55  ;;  %v595_v54 = vld [vmem:[#allocation4 + $0x5a0] sm:$0xff]  ;;  %v592_v55 = vld [vmem:[#allocation4 + $0x588] sm:$0xff] }
 0x10f   : > { %v6345_v60 = vcombine.high %v591_v53, %v595_v54  ;;  %v6344_v2 = vcombine.low %v591_v53, %v595_v54  ;;  %v6346_v3 = vcombine.low %v592_v55, %v596_v56  ;;  %v647_v48 = vld [vmem:[#allocation4 + $0x740] sm:$0xff] }
 0x111   : > { %2022 = vmatpush1.bf16.msra.mxu0 %v6280_v61  ;;  %2104 = vmatpush1.bf16.msra.mxu1 %v6282_v62  ;;  %v6347_v61 = vcombine.high %v592_v55, %v596_v56  ;;  %v599_v62 = vld [vmem:[#allocation4 + $0x5c0] sm:$0xff] }
 0x112   : > { %2023 = vmatprep.subr.bf16.mxu0 %v6289_v63  ;;  %2105 = vmatprep.subr.bf16.mxu1 %v6291_v0  ;;  %v603_v63 = vld [vmem:[#allocation4 + $0x5e0] sm:$0xff]  ;;  %v600_v0 = vld [vmem:[#allocation4 + $0x5c8] sm:$0xff] }
 0x113   : > { %v6353_v4 = vcombine.high %v599_v62, %v603_v63  ;;  %v6352_v10 = vcombine.low %v599_v62, %v603_v63  ;;  %v6354_v11 = vcombine.low %v600_v0, %v604_v1  ;;  %v655_v56 = vld [vmem:[#allocation4 + $0x780] sm:$0xff] }
 0x115   : > { %2024 = vmatpush1.bf16.msra.mxu0 %v6288_v5  ;;  %2106 = vmatpush1.bf16.msra.mxu1 %v6290_v7  ;;  %v6355_v5 = vcombine.high %v600_v0, %v604_v1  ;;  %v611_v7 = vld [vmem:[#allocation4 + $0x620] sm:$0xff] }
 0x116   : > { %2034 = vmatprep.subr.bf16.mxu0 %v6297_v8  ;;  %2116 = vmatprep.subr.bf16.mxu1 %v6299_v9  ;;  %v608_v8 = vld [vmem:[#allocation4 + $0x608] sm:$0xff]  ;;  %v6361_v13 = vcombine.high %v607_v6, %v611_v7  ;;  %v663_v1 = vld [vmem:[#allocation4 + $0x7c0] sm:$0xff] }
 0x117   : > { %v612_v9 = vld [vmem:[#allocation4 + $0x628] sm:$0xff] }
 0x118   : > { %2026 = vmatmul.mubr.bf16.vlgmr.msra.gmra.mrb[0].mxu0 %v7841_v12  ;;  %2108 = vmatmul.mubr.bf16.vlgmr.msra.gmra.mrb[0].mxu1 %v7841_v12  ;;  %v6363_v14 = vcombine.high %v608_v8, %v612_v9  ;;  %v6362_v20 = vcombine.low %v608_v8, %v612_v9  ;;  %v417_v9 = vld [vmem:[#allocation4 + $0x10] sm:$0xff] }
 0x119   : > { %2035 = vmatpush1.bf16.msra.mxu0 %v6296_v16  ;;  %2117 = vmatpush1.bf16.msra.mxu1 %v6298_v17  ;;  %v619_v16 = vld [vmem:[#allocation4 + $0x660] sm:$0xff]  ;;  %v616_v17 = vld [vmem:[#allocation4 + $0x648] sm:$0xff] }
 0x11a   : > { %2036 = vmatprep.subr.bf16.mxu0 %v6305_v18  ;;  %2118 = vmatprep.subr.bf16.mxu1 %v6307_v19  ;;  %v620_v18 = vld [vmem:[#allocation4 + $0x668] sm:$0xff]  ;;  %v6360_v19 = vcombine.low %v607_v6, %v611_v7  ;;  %v6369_v21 = vcombine.high %v615_v15, %v619_v16 }
 0x11b   : > { %2066 = vmatprep.mubr.bf16.mxu0 %v7846_v22  ;;  %2148 = vmatprep.mubr.bf16.mxu1 %v7846_v22  ;;  %v6371_v23 = vcombine.high %v616_v17, %v620_v18  ;;  %v6370_v29 = vcombine.low %v616_v17, %v620_v18 }
 0x11d   : > { %2037 = vmatpush1.bf16.msra.mxu0 %v6304_v25  ;;  %2119 = vmatpush1.bf16.msra.mxu1 %v6306_v26  ;;  %v627_v25 = vld [vmem:[#allocation4 + $0x6a0] sm:$0xff]  ;;  %v624_v26 = vld [vmem:[#allocation4 + $0x688] sm:$0xff] }
 0x11e   : > { %2038 = vmatprep.subr.bf16.mxu0 %v6313_v27  ;;  %2120 = vmatprep.subr.bf16.mxu1 %v6315_v28  ;;  %v628_v27 = vld [vmem:[#allocation4 + $0x6a8] sm:$0xff]  ;;  %v6368_v28 = vcombine.low %v615_v15, %v619_v16  ;;  %v6377_v30 = vcombine.high %v623_v24, %v627_v25  ;;  %v409_v15 = vld [vmem:[%s8656_s21 + $0x10] sm:$0xff] }
 0x11f   : > { %v6379_v31 = vcombine.high %v624_v26, %v628_v27  ;;  %v6378_v37 = vcombine.low %v624_v26, %v628_v27 }
 0x121   : > { %2039 = vmatpush1.bf16.msra.mxu0 %v6312_v33  ;;  %2121 = vmatpush1.bf16.msra.mxu1 %v6314_v34  ;;  %v635_v33 = vld [vmem:[#allocation4 + $0x6e0] sm:$0xff]  ;;  %v632_v34 = vld [vmem:[#allocation4 + $0x6c8] sm:$0xff] }
 0x122   : > { %2040 = vmatprep.subr.bf16.mxu0 %v6321_v35  ;;  %2122 = vmatprep.subr.bf16.mxu1 %v6323_v36  ;;  %v636_v35 = vld [vmem:[#allocation4 + $0x6e8] sm:$0xff]  ;;  %v6376_v36 = vcombine.low %v623_v24, %v627_v25  ;;  %v6385_v38 = vcombine.high %v631_v32, %v635_v33  ;;  %v430_v24 = vld [vmem:[#allocation4 + $0x78] sm:$0xff] }
 0x123   : > { %v6387_v39 = vcombine.high %v632_v34, %v636_v35  ;;  %v6386_v45 = vcombine.low %v632_v34, %v636_v35 }
 0x125   : > { %2041 = vmatpush1.bf16.msra.mxu0 %v6320_v41  ;;  %2123 = vmatpush1.bf16.msra.mxu1 %v6322_v42  ;;  %v643_v41 = vld [vmem:[#allocation4 + $0x720] sm:$0xff]  ;;  %v640_v42 = vld [vmem:[#allocation4 + $0x708] sm:$0xff] }
 0x126   : > { %2042 = vmatprep.subr.bf16.mxu0 %v6329_v43  ;;  %2124 = vmatprep.subr.bf16.mxu1 %v6331_v44  ;;  %v644_v43 = vld [vmem:[#allocation4 + $0x728] sm:$0xff]  ;;  %v6384_v44 = vcombine.low %v631_v32, %v635_v33  ;;  %v6393_v46 = vcombine.high %v639_v40, %v643_v41  ;;  %v438_v32 = vld [vmem:[#allocation4 + $0xb8] sm:$0xff] }
 0x127   : > { %v6395_v47 = vcombine.high %v640_v42, %v644_v43  ;;  %v6394_v53 = vcombine.low %v640_v42, %v644_v43 }
 0x129   : > { %2043 = vmatpush1.bf16.msra.mxu0 %v6328_v49  ;;  %2125 = vmatpush1.bf16.msra.mxu1 %v6330_v50  ;;  %v651_v49 = vld [vmem:[#allocation4 + $0x760] sm:$0xff]  ;;  %v648_v50 = vld [vmem:[#allocation4 + $0x748] sm:$0xff] }
 0x12a   : > { %2044 = vmatprep.subr.bf16.mxu0 %v6337_v51  ;;  %2126 = vmatprep.subr.bf16.mxu1 %v6339_v52  ;;  %v652_v51 = vld [vmem:[#allocation4 + $0x768] sm:$0xff]  ;;  %v6392_v52 = vcombine.low %v639_v40, %v643_v41  ;;  %v6401_v54 = vcombine.high %v647_v48, %v651_v49  ;;  %v446_v40 = vld [vmem:[#allocation4 + $0xf8] sm:$0xff] }
 0x12b   : > { %v6403_v55 = vcombine.high %v648_v50, %v652_v51  ;;  %v6402_v62 = vcombine.low %v648_v50, %v652_v51 }
 0x12d   : > { %2045 = vmatpush1.bf16.msra.mxu0 %v6336_v58  ;;  %2127 = vmatpush1.bf16.msra.mxu1 %v6338_v59  ;;  %v659_v58 = vld [vmem:[#allocation4 + $0x7a0] sm:$0xff]  ;;  %v656_v59 = vld [vmem:[#allocation4 + $0x788] sm:$0xff] }
 0x12e   : > { %2046 = vmatprep.subr.bf16.mxu0 %v6345_v60  ;;  %2128 = vmatprep.subr.bf16.mxu1 %v6347_v61  ;;  %v660_v60 = vld [vmem:[#allocation4 + $0x7a8] sm:$0xff]  ;;  %v6400_v61 = vcombine.low %v647_v48, %v651_v49  ;;  %v6409_v63 = vcombine.high %v655_v56, %v659_v58  ;;  %v454_v48 = vld [vmem:[#allocation4 + $0x138] sm:$0xff] }
 0x12f   : > { %v6411_v0 = vcombine.high %v656_v59, %v660_v60  ;;  %v6410_v6 = vcombine.low %v656_v59, %v660_v60 }
 0x131   : > { %2047 = vmatpush1.bf16.msra.mxu0 %v6344_v2  ;;  %2129 = vmatpush1.bf16.msra.mxu1 %v6346_v3  ;;  %v667_v2 = vld [vmem:[#allocation4 + $0x7e0] sm:$0xff]  ;;  %v664_v3 = vld [vmem:[#allocation4 + $0x7c8] sm:$0xff] }
 0x132   : > { %2048 = vmatprep.subr.bf16.mxu0 %v6353_v4  ;;  %2130 = vmatprep.subr.bf16.mxu1 %v6355_v5  ;;  %v668_v4 = vld [vmem:[#allocation4 + $0x7e8] sm:$0xff]  ;;  %v6408_v5 = vcombine.low %v655_v56, %v659_v58  ;;  %v6417_v7 = vcombine.high %v663_v1, %v667_v2 }
 0x133   : > { %v6419_v8 = vcombine.high %v664_v3, %v668_v4  ;;  %v6418_v16 = vcombine.low %v664_v3, %v668_v4 }
 0x135   : > { %2049 = vmatpush1.bf16.msra.mxu0 %v6352_v10  ;;  %2131 = vmatpush1.bf16.msra.mxu1 %v6354_v11  ;;  %v421_v10 = vld [vmem:[#allocation4 + $0x30] sm:$0xff]  ;;  %v418_v11 = vld [vmem:[#allocation4 + $0x18] sm:$0xff] }
 0x136   : > { %2050 = vmatprep.subr.bf16.mxu0 %v6361_v13  ;;  %2132 = vmatprep.subr.bf16.mxu1 %v6363_v14  ;;  %v422_v13 = vld [vmem:[#allocation4 + $0x38] sm:$0xff]  ;;  %v6416_v14 = vcombine.low %v663_v1, %v667_v2  ;;  %v6173_v17 = vcombine.high %v417_v9, %v421_v10  ;;  %v6172_v25 = vcombine.low %v417_v9, %v421_v10 }
 0x137   : > { %v6175_v18 = vcombine.high %v418_v11, %v422_v13  ;;  %v6174_v26 = vcombine.low %v418_v11, %v422_v13 }
 0x139   : > { %2051 = vmatpush1.bf16.msra.mxu0 %v6360_v19  ;;  %2133 = vmatpush1.bf16.msra.mxu1 %v6362_v20  ;;  %v425_v19 = vld [vmem:[#allocation4 + $0x50] sm:$0xff] }
 0x13a   : > { %2052 = vmatprep.subr.bf16.mxu0 %v6369_v21  ;;  %2134 = vmatprep.subr.bf16.mxu1 %v6371_v23  ;;  %v429_v20 = vld [vmem:[#allocation4 + $0x70] sm:$0xff]  ;;  %v7855_v21 = vpack.c.bf16 %v409_v15, %v409_v15  ;;  %v426_v23 = vld [vmem:[#allocation4 + $0x58] sm:$0xff] }
 0x13b   : > { %v6181_v27 = vcombine.high %v425_v19, %v429_v20  ;;  %v6180_v33 = vcombine.low %v425_v19, %v429_v20  ;;  %v6182_v34 = vcombine.low %v426_v23, %v430_v24  ;;  %v485_v15 = vld [vmem:[#allocation4 + $0x230] sm:$0xff] }
 0x13d   : > { %2053 = vmatpush1.bf16.msra.mxu0 %v6368_v28  ;;  %2135 = vmatpush1.bf16.msra.mxu1 %v6370_v29  ;;  %v6183_v28 = vcombine.high %v426_v23, %v430_v24  ;;  %v433_v29 = vld [vmem:[#allocation4 + $0x90] sm:$0xff] }
 0x13e   : > { %2054 = vmatprep.subr.bf16.mxu0 %v6377_v30  ;;  %2136 = vmatprep.subr.bf16.mxu1 %v6379_v31  ;;  %v437_v30 = vld [vmem:[#allocation4 + $0xb0] sm:$0xff]  ;;  %v434_v31 = vld [vmem:[#allocation4 + $0x98] sm:$0xff] }
 0x13f   : > { %v6189_v35 = vcombine.high %v433_v29, %v437_v30  ;;  %v6188_v41 = vcombine.low %v433_v29, %v437_v30  ;;  %v6190_v42 = vcombine.low %v434_v31, %v438_v32  ;;  %v489_v24 = vld [vmem:[#allocation4 + $0x250] sm:$0xff] }
 0x141   : > { %2055 = vmatpush1.bf16.msra.mxu0 %v6376_v36  ;;  %2137 = vmatpush1.bf16.msra.mxu1 %v6378_v37  ;;  %v6191_v36 = vcombine.high %v434_v31, %v438_v32  ;;  %v441_v37 = vld [vmem:[#allocation4 + $0xd0] sm:$0xff] }
 0x142   : > { %2056 = vmatprep.subr.bf16.mxu0 %v6385_v38  ;;  %2138 = vmatprep.subr.bf16.mxu1 %v6387_v39  ;;  %v445_v38 = vld [vmem:[#allocation4 + $0xf0] sm:$0xff]  ;;  %v442_v39 = vld [vmem:[#allocation4 + $0xd8] sm:$0xff] }
 0x143   : > { %v6197_v43 = vcombine.high %v441_v37, %v445_v38  ;;  %v6196_v49 = vcombine.low %v441_v37, %v445_v38  ;;  %v6198_v50 = vcombine.low %v442_v39, %v446_v40  ;;  %v497_v32 = vld [vmem:[#allocation4 + $0x290] sm:$0xff] }
 0x145   : > { %2057 = vmatpush1.bf16.msra.mxu0 %v6384_v44  ;;  %2139 = vmatpush1.bf16.msra.mxu1 %v6386_v45  ;;  %v6199_v44 = vcombine.high %v442_v39, %v446_v40  ;;  %v449_v45 = vld [vmem:[#allocation4 + $0x110] sm:$0xff] }
 0x146   : > { %2058 = vmatprep.subr.bf16.mxu0 %v6393_v46  ;;  %2140 = vmatprep.subr.bf16.mxu1 %v6395_v47  ;;  %v453_v46 = vld [vmem:[#allocation4 + $0x130] sm:$0xff]  ;;  %v450_v47 = vld [vmem:[#allocation4 + $0x118] sm:$0xff] }
 0x147   : > { %v6205_v51 = vcombine.high %v449_v45, %v453_v46  ;;  %v6204_v56 = vcombine.low %v449_v45, %v453_v46  ;;  %v6206_v58 = vcombine.low %v450_v47, %v454_v48  ;;  %v505_v40 = vld [vmem:[#allocation4 + $0x2d0] sm:$0xff] }
 0x149   : > { %2059 = vmatpush1.bf16.msra.mxu0 %v6392_v52  ;;  %2141 = vmatpush1.bf16.msra.mxu1 %v6394_v53  ;;  %v457_v52 = vld [vmem:[#allocation4 + $0x150] sm:$0xff] }
 0x14a   : > { %2060 = vmatprep.subr.bf16.mxu0 %v6401_v54  ;;  %2142 = vmatprep.subr.bf16.mxu1 %v6403_v55  ;;  %v461_v53 = vld [vmem:[#allocation4 + $0x170] sm:$0xff]  ;;  %v458_v54 = vld [vmem:[#allocation4 + $0x158] sm:$0xff] }
 0x14b   : > { %v462_v55 = vld [vmem:[#allocation4 + $0x178] sm:$0xff]  ;;  %v6213_v59 = vcombine.high %v457_v52, %v461_v53  ;;  %v6212_v1 = vcombine.low %v457_v52, %v461_v53 }
 0x14c   : > { %v6215_v60 = vcombine.high %v458_v54, %v462_v55  ;;  %v6214_v2 = vcombine.low %v458_v54, %v462_v55  ;;  %v521_v55 = vld [vmem:[#allocation4 + $0x350] sm:$0xff] }
 0x14d   : > { %2061 = vmatpush1.bf16.msra.mxu0 %v6400_v61  ;;  %2143 = vmatpush1.bf16.msra.mxu1 %v6402_v62  ;;  %v465_v61 = vld [vmem:[#allocation4 + $0x190] sm:$0xff] }
 0x14e   : > { %2062 = vmatprep.subr.bf16.mxu0 %v6409_v63  ;;  %2144 = vmatprep.subr.bf16.mxu1 %v6411_v0  ;;  %v469_v62 = vld [vmem:[#allocation4 + $0x1b0] sm:$0xff]  ;;  %v466_v63 = vld [vmem:[#allocation4 + $0x198] sm:$0xff] }
 0x14f   : > { %v470_v0 = vld [vmem:[#allocation4 + $0x1b8] sm:$0xff]  ;;  %v6221_v3 = vcombine.high %v465_v61, %v469_v62  ;;  %v6220_v9 = vcombine.low %v465_v61, %v469_v62 }
 0x150   : > { %v6223_v4 = vcombine.high %v466_v63, %v470_v0  ;;  %v6222_v10 = vcombine.low %v466_v63, %v470_v0  ;;  %v529_v0 = vld [vmem:[#allocation4 + $0x390] sm:$0xff] }
 0x151   : > { %2063 = vmatpush1.bf16.msra.mxu0 %v6408_v5  ;;  %2145 = vmatpush1.bf16.msra.mxu1 %v6410_v6  ;;  %v473_v5 = vld [vmem:[#allocation4 + $0x1d0] sm:$0xff] }
 0x152   : > { %2064 = vmatprep.subr.bf16.mxu0 %v6417_v7  ;;  %2146 = vmatprep.subr.bf16.mxu1 %v6419_v8  ;;  %v477_v6 = vld [vmem:[#allocation4 + $0x1f0] sm:$0xff]  ;;  %v474_v7 = vld [vmem:[#allocation4 + $0x1d8] sm:$0xff] }
 0x153   : > { %v478_v8 = vld [vmem:[#allocation4 + $0x1f8] sm:$0xff]  ;;  %v6229_v11 = vcombine.high %v473_v5, %v477_v6 }
 0x154   : > { %v6231_v13 = vcombine.high %v474_v7, %v478_v8  ;;  %v6230_v19 = vcombine.low %v474_v7, %v478_v8  ;;  %v537_v8 = vld [vmem:[#allocation4 + $0x3d0] sm:$0xff] }
 0x155   : > { %2065 = vmatpush1.bf16.msra.mxu0 %v6416_v14  ;;  %2147 = vmatpush1.bf16.msra.mxu1 %v6418_v16  ;;  %v481_v14 = vld [vmem:[#allocation4 + $0x210] sm:$0xff]  ;;  %v482_v16 = vld [vmem:[#allocation4 + $0x218] sm:$0xff] }
 0x156   : > { %2157 = vmatprep.subr.bf16.mxu0 %v6173_v17  ;;  %2239 = vmatprep.subr.bf16.mxu1 %v6175_v18  ;;  %v486_v17 = vld [vmem:[#allocation4 + $0x238] sm:$0xff]  ;;  %v6228_v18 = vcombine.low %v473_v5, %v477_v6  ;;  %v6237_v20 = vcombine.high %v481_v14, %v485_v15 }
 0x157   : > { %v6239_v23 = vcombine.high %v482_v16, %v486_v17  ;;  %v6238_v29 = vcombine.low %v482_v16, %v486_v17  ;;  %v545_v17 = vld [vmem:[#allocation4 + $0x410] sm:$0xff] }
 0x158   : > { %2067 = vmatmul.mubr.bf16.vlgmr.msra.gmra.mrb[0].mxu0 %v7855_v21  ;;  %2149 = vmatmul.mubr.bf16.vlgmr.msra.gmra.mrb[0].mxu1 %v7855_v21 }
 0x159   : > { %2158 = vmatpush1.bf16.msra.mxu0 %v6172_v25  ;;  %2240 = vmatpush1.bf16.msra.mxu1 %v6174_v26  ;;  %v493_v25 = vld [vmem:[#allocation4 + $0x270] sm:$0xff]  ;;  %v490_v26 = vld [vmem:[#allocation4 + $0x258] sm:$0xff] }
 0x15a   : > { %2159 = vmatprep.subr.bf16.mxu0 %v6181_v27  ;;  %2241 = vmatprep.subr.bf16.mxu1 %v6183_v28  ;;  %v494_v27 = vld [vmem:[#allocation4 + $0x278] sm:$0xff]  ;;  %v6236_v28 = vcombine.low %v481_v14, %v485_v15  ;;  %v6245_v30 = vcombine.high %v489_v24, %v493_v25 }
 0x15b   : > { %2189 = vmatprep.mubr.bf16.mxu0 %v7834_v57  ;;  %2271 = vmatprep.mubr.bf16.mxu1 %v7834_v57  ;;  %v6207_v57 = vcombine.high %v450_v47, %v454_v48  ;;  %v6247_v31 = vcombine.high %v490_v26, %v494_v27  ;;  %v6246_v37 = vcombine.low %v490_v26, %v494_v27  ;;  %v513_v48 = vld [vmem:[#allocation4 + $0x310] sm:$0xff] }
 0x15c   : > { %v553_v27 = vld [vmem:[#allocation4 + $0x450] sm:$0xff] }
 0x15d   : > { %2160 = vmatpush1.bf16.msra.mxu0 %v6180_v33  ;;  %2242 = vmatpush1.bf16.msra.mxu1 %v6182_v34  ;;  %v501_v33 = vld [vmem:[#allocation4 + $0x2b0] sm:$0xff]  ;;  %v498_v34 = vld [vmem:[#allocation4 + $0x298] sm:$0xff] }
 0x15e   : > { %2161 = vmatprep.subr.bf16.mxu0 %v6189_v35  ;;  %2243 = vmatprep.subr.bf16.mxu1 %v6191_v36  ;;  %v502_v35 = vld [vmem:[#allocation4 + $0x2b8] sm:$0xff]  ;;  %v6244_v36 = vcombine.low %v489_v24, %v493_v25  ;;  %v6253_v38 = vcombine.high %v497_v32, %v501_v33 }
 0x15f   : > { %v6255_v39 = vcombine.high %v498_v34, %v502_v35  ;;  %v6254_v45 = vcombine.low %v498_v34, %v502_v35  ;;  %v561_v35 = vld [vmem:[#allocation4 + $0x490] sm:$0xff] }
 0x161   : > { %2162 = vmatpush1.bf16.msra.mxu0 %v6188_v41  ;;  %2244 = vmatpush1.bf16.msra.mxu1 %v6190_v42  ;;  %v509_v41 = vld [vmem:[#allocation4 + $0x2f0] sm:$0xff]  ;;  %v506_v42 = vld [vmem:[#allocation4 + $0x2d8] sm:$0xff] }
 0x162   : > { %2163 = vmatprep.subr.bf16.mxu0 %v6197_v43  ;;  %2245 = vmatprep.subr.bf16.mxu1 %v6199_v44  ;;  %v510_v43 = vld [vmem:[#allocation4 + $0x2f8] sm:$0xff]  ;;  %v6252_v44 = vcombine.low %v497_v32, %v501_v33  ;;  %v6261_v46 = vcombine.high %v505_v40, %v509_v41 }
 0x163   : > { %v6263_v47 = vcombine.high %v506_v42, %v510_v43  ;;  %v6262_v52 = vcombine.low %v506_v42, %v510_v43  ;;  %v569_v43 = vld [vmem:[#allocation4 + $0x4d0] sm:$0xff] }
 0x165   : > { %2164 = vmatpush1.bf16.msra.mxu0 %v6196_v49  ;;  %2246 = vmatpush1.bf16.msra.mxu1 %v6198_v50  ;;  %v517_v49 = vld [vmem:[#allocation4 + $0x330] sm:$0xff]  ;;  %v514_v50 = vld [vmem:[#allocation4 + $0x318] sm:$0xff] }
 0x166   : > { %2165 = vmatprep.subr.bf16.mxu0 %v6205_v51  ;;  %2247 = vmatprep.subr.bf16.mxu1 %v6207_v57  ;;  %v518_v51 = vld [vmem:[#allocation4 + $0x338] sm:$0xff]  ;;  %v6260_v57 = vcombine.low %v505_v40, %v509_v41  ;;  %v6269_v53 = vcombine.high %v513_v48, %v517_v49 }
 0x167   : > { %v6271_v54 = vcombine.high %v514_v50, %v518_v51  ;;  %v6270_v61 = vcombine.low %v514_v50, %v518_v51  ;;  %v577_v50 = vld [vmem:[#allocation4 + $0x510] sm:$0xff] }
 0x168   : > { %v581_v51 = vld [vmem:[#allocation4 + $0x530] sm:$0xff] }
 0x169   : > { %2166 = vmatpush1.bf16.msra.mxu0 %v6204_v56  ;;  %2248 = vmatpush1.bf16.msra.mxu1 %v6206_v58  ;;  %v525_v56 = vld [vmem:[#allocation4 + $0x370] sm:$0xff]  ;;  %v522_v58 = vld [vmem:[#allocation4 + $0x358] sm:$0xff] }
 0x16a   : > { %2167 = vmatprep.subr.bf16.mxu0 %v6213_v59  ;;  %2249 = vmatprep.subr.bf16.mxu1 %v6215_v60  ;;  %v526_v59 = vld [vmem:[#allocation4 + $0x378] sm:$0xff]  ;;  %v6268_v60 = vcombine.low %v513_v48, %v517_v49  ;;  %v6277_v62 = vcombine.high %v521_v55, %v525_v56 }
 0x16b   : > { %v6279_v63 = vcombine.high %v522_v58, %v526_v59  ;;  %v6278_v5 = vcombine.low %v522_v58, %v526_v59  ;;  %v589_v58 = vld [vmem:[#allocation4 + $0x570] sm:$0xff]  ;;  %v586_v59 = vld [vmem:[#allocation4 + $0x558] sm:$0xff] }
 0x16d   : > { %2168 = vmatpush1.bf16.msra.mxu0 %v6212_v1  ;;  %2250 = vmatpush1.bf16.msra.mxu1 %v6214_v2  ;;  %v533_v1 = vld [vmem:[#allocation4 + $0x3b0] sm:$0xff]  ;;  %v530_v2 = vld [vmem:[#allocation4 + $0x398] sm:$0xff] }
 0x16e   : > { %2169 = vmatprep.subr.bf16.mxu0 %v6221_v3  ;;  %2251 = vmatprep.subr.bf16.mxu1 %v6223_v4  ;;  %v534_v3 = vld [vmem:[#allocation4 + $0x3b8] sm:$0xff]  ;;  %v6276_v4 = vcombine.low %v521_v55, %v525_v56  ;;  %v6285_v6 = vcombine.high %v529_v0, %v533_v1  ;;  %v6333_v55 = vcombine.high %v577_v50, %v581_v51  ;;  %v585_v56 = vld [vmem:[#allocation4 + $0x550] sm:$0xff] }
 0x16f   : > { %v6287_v7 = vcombine.high %v530_v2, %v534_v3  ;;  %v6286_v14 = vcombine.low %v530_v2, %v534_v3  ;;  %v597_v2 = vld [vmem:[#allocation4 + $0x5b0] sm:$0xff]  ;;  %v594_v3 = vld [vmem:[#allocation4 + $0x598] sm:$0xff] }
 0x171   : > { %2170 = vmatpush1.bf16.msra.mxu0 %v6220_v9  ;;  %2252 = vmatpush1.bf16.msra.mxu1 %v6222_v10  ;;  %v541_v9 = vld [vmem:[#allocation4 + $0x3f0] sm:$0xff]  ;;  %v538_v10 = vld [vmem:[#allocation4 + $0x3d8] sm:$0xff] }
 0x172   : > { %2171 = vmatprep.subr.bf16.mxu0 %v6229_v11  ;;  %2253 = vmatprep.subr.bf16.mxu1 %v6231_v13  ;;  %v542_v11 = vld [vmem:[#allocation4 + $0x3f8] sm:$0xff]  ;;  %v6284_v13 = vcombine.low %v529_v0, %v533_v1  ;;  %v6293_v15 = vcombine.high %v537_v8, %v541_v9  ;;  %v593_v1 = vld [vmem:[#allocation4 + $0x590] sm:$0xff] }
 0x173   : > { %v6295_v16 = vcombine.high %v538_v10, %v542_v11  ;;  %v6294_v24 = vcombine.low %v538_v10, %v542_v11  ;;  %v605_v10 = vld [vmem:[#allocation4 + $0x5f0] sm:$0xff]  ;;  %v602_v11 = vld [vmem:[#allocation4 + $0x5d8] sm:$0xff] }
 0x175   : > { %2172 = vmatpush1.bf16.msra.mxu0 %v6228_v18  ;;  %2254 = vmatpush1.bf16.msra.mxu1 %v6230_v19  ;;  %v549_v18 = vld [vmem:[#allocation4 + $0x430] sm:$0xff]  ;;  %v546_v19 = vld [vmem:[#allocation4 + $0x418] sm:$0xff] }
 0x176   : > { %2173 = vmatprep.subr.bf16.mxu0 %v6237_v20  ;;  %2255 = vmatprep.subr.bf16.mxu1 %v6239_v23  ;;  %v550_v20 = vld [vmem:[#allocation4 + $0x438] sm:$0xff]  ;;  %v6292_v23 = vcombine.low %v537_v8, %v541_v9  ;;  %v6301_v25 = vcombine.high %v545_v17, %v549_v18  ;;  %v601_v9 = vld [vmem:[#allocation4 + $0x5d0] sm:$0xff] }
 0x177   : > { %v6303_v26 = vcombine.high %v546_v19, %v550_v20  ;;  %v6302_v32 = vcombine.low %v546_v19, %v550_v20  ;;  %v613_v19 = vld [vmem:[#allocation4 + $0x630] sm:$0xff]  ;;  %v610_v20 = vld [vmem:[#allocation4 + $0x618] sm:$0xff] }
 0x179   : > { %2174 = vmatpush1.bf16.msra.mxu0 %v6236_v28  ;;  %2256 = vmatpush1.bf16.msra.mxu1 %v6238_v29  ;;  %v557_v28 = vld [vmem:[#allocation4 + $0x470] sm:$0xff]  ;;  %v554_v29 = vld [vmem:[#allocation4 + $0x458] sm:$0xff] }
 0x17a   : > { %2175 = vmatprep.subr.bf16.mxu0 %v6245_v30  ;;  %2257 = vmatprep.subr.bf16.mxu1 %v6247_v31  ;;  %v558_v30 = vld [vmem:[#allocation4 + $0x478] sm:$0xff]  ;;  %v6300_v31 = vcombine.low %v545_v17, %v549_v18  ;;  %v6309_v33 = vcombine.high %v553_v27, %v557_v28  ;;  %v609_v18 = vld [vmem:[#allocation4 + $0x610] sm:$0xff] }
 0x17b   : > { %v6311_v34 = vcombine.high %v554_v29, %v558_v30  ;;  %v6310_v40 = vcombine.low %v554_v29, %v558_v30  ;;  %v621_v29 = vld [vmem:[#allocation4 + $0x670] sm:$0xff]  ;;  %v618_v30 = vld [vmem:[#allocation4 + $0x658] sm:$0xff] }
 0x17d   : > { %2176 = vmatpush1.bf16.msra.mxu0 %v6244_v36  ;;  %2258 = vmatpush1.bf16.msra.mxu1 %v6246_v37  ;;  %v565_v36 = vld [vmem:[#allocation4 + $0x4b0] sm:$0xff]  ;;  %v562_v37 = vld [vmem:[#allocation4 + $0x498] sm:$0xff] }
 0x17e   : > { %2177 = vmatprep.subr.bf16.mxu0 %v6253_v38  ;;  %2259 = vmatprep.subr.bf16.mxu1 %v6255_v39  ;;  %v566_v38 = vld [vmem:[#allocation4 + $0x4b8] sm:$0xff]  ;;  %v6308_v39 = vcombine.low %v553_v27, %v557_v28  ;;  %v6317_v41 = vcombine.high %v561_v35, %v565_v36  ;;  %v617_v28 = vld [vmem:[#allocation4 + $0x650] sm:$0xff] }
 0x17f   : > { %v6319_v42 = vcombine.high %v562_v37, %v566_v38 }
 0x181   : > { %2178 = vmatpush1.bf16.msra.mxu0 %v6252_v44  ;;  %2260 = vmatpush1.bf16.msra.mxu1 %v6254_v45  ;;  %v573_v44 = vld [vmem:[#allocation4 + $0x4f0] sm:$0xff]  ;;  %v570_v45 = vld [vmem:[#allocation4 + $0x4d8] sm:$0xff] }
 0x182   : > { %2179 = vmatprep.subr.bf16.mxu0 %v6261_v46  ;;  %2261 = vmatprep.subr.bf16.mxu1 %v6263_v47  ;;  %v574_v46 = vld [vmem:[#allocation4 + $0x4f8] sm:$0xff]  ;;  %v6316_v47 = vcombine.low %v561_v35, %v565_v36  ;;  %v6325_v48 = vcombine.high %v569_v43, %v573_v44  ;;  %v625_v36 = vld [vmem:[#allocation4 + $0x690] sm:$0xff] }
 0x183   : > { %v6327_v49 = vcombine.high %v570_v45, %v574_v46 }
 0x185   : > { %2180 = vmatpush1.bf16.msra.mxu0 %v6260_v57  ;;  %2262 = vmatpush1.bf16.msra.mxu1 %v6262_v52  ;;  %v578_v57 = vld [vmem:[#allocation4 + $0x518] sm:$0xff] }
 0x186   : > { %2181 = vmatprep.subr.bf16.mxu0 %v6269_v53  ;;  %2263 = vmatprep.subr.bf16.mxu1 %v6271_v54  ;;  %v582_v52 = vld [vmem:[#allocation4 + $0x538] sm:$0xff]  ;;  %v6324_v53 = vcombine.low %v569_v43, %v573_v44  ;;  %v6326_v54 = vcombine.low %v570_v45, %v574_v46  ;;  %v633_v44 = vld [vmem:[#allocation4 + $0x6d0] sm:$0xff] }
 0x187   : > { %v637_v45 = vld [vmem:[#allocation4 + $0x6f0] sm:$0xff]  ;;  %v634_v46 = vld [vmem:[#allocation4 + $0x6d8] sm:$0xff] }
 0x189   : > { %2182 = vmatpush1.bf16.msra.mxu0 %v6268_v60  ;;  %2264 = vmatpush1.bf16.msra.mxu1 %v6270_v61  ;;  %v590_v60 = vld [vmem:[#allocation4 + $0x578] sm:$0xff]  ;;  %v6332_v61 = vcombine.low %v577_v50, %v581_v51  ;;  %v641_v51 = vld [vmem:[#allocation4 + $0x710] sm:$0xff] }
 0x18a   : > { %2183 = vmatprep.subr.bf16.mxu0 %v6277_v62  ;;  %2265 = vmatprep.subr.bf16.mxu1 %v6279_v63  ;;  %v6334_v62 = vcombine.low %v578_v57, %v582_v52  ;;  %v6341_v63 = vcombine.high %v585_v56, %v589_v58  ;;  %v6343_v0 = vcombine.high %v586_v59, %v590_v60 }
 0x18d   : > { %2184 = vmatpush1.bf16.msra.mxu0 %v6276_v4  ;;  %2266 = vmatpush1.bf16.msra.mxu1 %v6278_v5  ;;  %v598_v4 = vld [vmem:[#allocation4 + $0x5b8] sm:$0xff]  ;;  %v6340_v5 = vcombine.low %v585_v56, %v589_v58  ;;  %v649_v58 = vld [vmem:[#allocation4 + $0x750] sm:$0xff] }
 0x18e   : > { %2185 = vmatprep.subr.bf16.mxu0 %v6285_v6  ;;  %2267 = vmatprep.subr.bf16.mxu1 %v6287_v7  ;;  %v6342_v6 = vcombine.low %v586_v59, %v590_v60  ;;  %v6349_v7 = vcombine.high %v593_v1, %v597_v2  ;;  %v6351_v8 = vcombine.high %v594_v3, %v598_v4  ;;  %v653_v59 = vld [vmem:[#allocation4 + $0x770] sm:$0xff]  ;;  %v650_v60 = vld [vmem:[#allocation4 + $0x758] sm:$0xff] }
 0x191   : > { %2186 = vmatpush1.bf16.msra.mxu0 %v6284_v13  ;;  %2268 = vmatpush1.bf16.msra.mxu1 %v6286_v14  ;;  %v606_v13 = vld [vmem:[#allocation4 + $0x5f8] sm:$0xff]  ;;  %v6348_v14 = vcombine.low %v593_v1, %v597_v2  ;;  %v657_v2 = vld [vmem:[#allocation4 + $0x790] sm:$0xff] }
 0x192   : > { %2187 = vmatprep.subr.bf16.mxu0 %v6293_v15  ;;  %2269 = vmatprep.subr.bf16.mxu1 %v6295_v16  ;;  %v6350_v15 = vcombine.low %v594_v3, %v598_v4  ;;  %v6357_v16 = vcombine.high %v601_v9, %v605_v10  ;;  %v6359_v17 = vcombine.high %v602_v11, %v606_v13  ;;  %v661_v3 = vld [vmem:[#allocation4 + $0x7b0] sm:$0xff]  ;;  %v658_v4 = vld [vmem:[#allocation4 + $0x798] sm:$0xff] }
 0x195   : > { %2188 = vmatpush1.bf16.msra.mxu0 %v6292_v23  ;;  %2270 = vmatpush1.bf16.msra.mxu1 %v6294_v24  ;;  %v614_v23 = vld [vmem:[#allocation4 + $0x638] sm:$0xff]  ;;  %v6356_v24 = vcombine.low %v601_v9, %v605_v10  ;;  %v665_v10 = vld [vmem:[#allocation4 + $0x7d0] sm:$0xff] }
 0x196   : > { %2198 = vmatprep.subr.bf16.mxu0 %v6301_v25  ;;  %2280 = vmatprep.subr.bf16.mxu1 %v6303_v26  ;;  %v6358_v25 = vcombine.low %v602_v11, %v606_v13  ;;  %v6365_v26 = vcombine.high %v609_v18, %v613_v19  ;;  %v6367_v27 = vcombine.high %v610_v20, %v614_v23  ;;  %v669_v11 = vld [vmem:[#allocation4 + $0x7f0] sm:$0xff]  ;;  %v666_v13 = vld [vmem:[#allocation4 + $0x7d8] sm:$0xff] }
 0x198   : > { %2190 = vmatmul.mubr.bf16.vlgmr.msra.gmra.mrb[4].mxu0 %v7841_v12  ;;  %2272 = vmatmul.mubr.bf16.vlgmr.msra.gmra.mrb[4].mxu1 %v7841_v12  ;;  %v6318_v12 = vcombine.low %v562_v37, %v566_v38  ;;  %v629_v37 = vld [vmem:[#allocation4 + $0x6b0] sm:$0xff]  ;;  %v626_v38 = vld [vmem:[#allocation4 + $0x698] sm:$0xff] }
 0x199   : > { %2199 = vmatpush1.bf16.msra.mxu0 %v6300_v31  ;;  %2281 = vmatpush1.bf16.msra.mxu1 %v6302_v32  ;;  %v622_v31 = vld [vmem:[#allocation4 + $0x678] sm:$0xff]  ;;  %v6364_v32 = vcombine.low %v609_v18, %v613_v19  ;;  %v6420_v19 = vcombine.low %v665_v10, %v669_v11 }
 0x19a   : > { %2200 = vmatprep.subr.bf16.mxu0 %v6309_v33  ;;  %2282 = vmatprep.subr.bf16.mxu1 %v6311_v34  ;;  %v6366_v33 = vcombine.low %v610_v20, %v614_v23  ;;  %v6373_v34 = vcombine.high %v617_v28, %v621_v29  ;;  %v6375_v35 = vcombine.high %v618_v30, %v622_v31  ;;  %v673_v23 = vlaneseq }
 0x19b   : > { %2230 = vmatprep.mubr.bf16.mxu0 %v7846_v22  ;;  %2312 = vmatprep.mubr.bf16.mxu1 %v7846_v22  ;;  %v6335_v22 = vcombine.high %v578_v57, %v582_v52  ;;  %v645_v57 = vld [vmem:[#allocation4 + $0x730] sm:$0xff]  ;;  %v642_v52 = vld [vmem:[#allocation4 + $0x718] sm:$0xff] }
 0x19d   : > { %2201 = vmatpush1.bf16.msra.mxu0 %v6308_v39  ;;  %2283 = vmatpush1.bf16.msra.mxu1 %v6310_v40  ;;  %v630_v39 = vld [vmem:[#allocation4 + $0x6b8] sm:$0xff]  ;;  %v6372_v40 = vcombine.low %v617_v28, %v621_v29 }
 0x19e   : > { %2202 = vmatprep.subr.bf16.mxu0 %v6317_v41  ;;  %2284 = vmatprep.subr.bf16.mxu1 %v6319_v42  ;;  %v6374_v41 = vcombine.low %v618_v30, %v622_v31  ;;  %v6381_v42 = vcombine.high %v625_v36, %v629_v37  ;;  %v6383_v43 = vcombine.high %v626_v38, %v630_v39 }
 0x1a1   : > { %2203 = vmatpush1.bf16.msra.mxu0 %v6316_v47  ;;  %2285 = vmatpush1.bf16.msra.mxu1 %v6318_v12  ;;  %v638_v47 = vld [vmem:[#allocation4 + $0x6f8] sm:$0xff]  ;;  %v6380_v12 = vcombine.low %v625_v36, %v629_v37 }
 0x1a2   : > { %2204 = vmatprep.subr.bf16.mxu0 %v6325_v48  ;;  %2286 = vmatprep.subr.bf16.mxu1 %v6327_v49  ;;  %v6382_v48 = vcombine.low %v626_v38, %v630_v39  ;;  %v6389_v49 = vcombine.high %v633_v44, %v637_v45  ;;  %v6391_v50 = vcombine.high %v634_v46, %v638_v47 }
 0x1a5   : > { %2205 = vmatpush1.bf16.msra.mxu0 %v6324_v53  ;;  %2287 = vmatpush1.bf16.msra.mxu1 %v6326_v54  ;;  %v646_v53 = vld [vmem:[#allocation4 + $0x738] sm:$0xff]  ;;  %v6388_v54 = vcombine.low %v633_v44, %v637_v45 }
 0x1a6   : > { %2206 = vmatprep.subr.bf16.mxu0 %v6333_v55  ;;  %2288 = vmatprep.subr.bf16.mxu1 %v6335_v22  ;;  %v6390_v55 = vcombine.low %v634_v46, %v638_v47  ;;  %v6397_v22 = vcombine.high %v641_v51, %v645_v57  ;;  %v6399_v56 = vcombine.high %v642_v52, %v646_v53 }
 0x1a9   : > { %2207 = vmatpush1.bf16.msra.mxu0 %v6332_v61  ;;  %2289 = vmatpush1.bf16.msra.mxu1 %v6334_v62  ;;  %v654_v61 = vld [vmem:[#allocation4 + $0x778] sm:$0xff]  ;;  %v6396_v62 = vcombine.low %v641_v51, %v645_v57 }
 0x1aa   : > { %2208 = vmatprep.subr.bf16.mxu0 %v6341_v63  ;;  %2290 = vmatprep.subr.bf16.mxu1 %v6343_v0  ;;  %v6398_v63 = vcombine.low %v642_v52, %v646_v53  ;;  %v6405_v0 = vcombine.high %v649_v58, %v653_v59  ;;  %v6407_v1 = vcombine.high %v650_v60, %v654_v61 }
 0x1ad   : > { %2209 = vmatpush1.bf16.msra.mxu0 %v6340_v5  ;;  %2291 = vmatpush1.bf16.msra.mxu1 %v6342_v6  ;;  %v662_v5 = vld [vmem:[#allocation4 + $0x7b8] sm:$0xff]  ;;  %v6404_v6 = vcombine.low %v649_v58, %v653_v59 }
 0x1ae   : > { %2210 = vmatprep.subr.bf16.mxu0 %v6349_v7  ;;  %2292 = vmatprep.subr.bf16.mxu1 %v6351_v8  ;;  %v6406_v7 = vcombine.low %v650_v60, %v654_v61  ;;  %v6413_v8 = vcombine.high %v657_v2, %v661_v3  ;;  %v6415_v9 = vcombine.high %v658_v4, %v662_v5 }
 0x1b1   : > { %2211 = vmatpush1.bf16.msra.mxu0 %v6348_v14  ;;  %2293 = vmatpush1.bf16.msra.mxu1 %v6350_v15  ;;  %v670_v14 = vld [vmem:[#allocation4 + $0x7f8] sm:$0xff]  ;;  %v6412_v15 = vcombine.low %v657_v2, %v661_v3 }
 0x1b2   : > { %2212 = vmatprep.subr.bf16.mxu0 %v6357_v16  ;;  %2294 = vmatprep.subr.bf16.mxu1 %v6359_v17  ;;  %v6414_v16 = vcombine.low %v658_v4, %v662_v5  ;;  %v6421_v17 = vcombine.high %v665_v10, %v669_v11  ;;  %v6423_v18 = vcombine.high %v666_v13, %v670_v14 }
 0x1b3   : > { %v6422_v20 = vcombine.low %v666_v13, %v670_v14 }
 0x1b5   : > { %2213 = vmatpush1.bf16.msra.mxu0 %v6356_v24  ;;  %2295 = vmatpush1.bf16.msra.mxu1 %v6358_v25  ;;  %v674_v24 = vshrl.u32 %v673_v23, 7 }
 0x1b6   : > { %2214 = vmatprep.subr.bf16.mxu0 %v6365_v26  ;;  %2296 = vmatprep.subr.bf16.mxu1 %v6367_v27  ;;  %v671_v26 = vld [vmem:[#allocation11] sm:$0xff] }
 0x1b7   : > { %v675_v25 = vsub.s32 0, %v674_v24  ;;  %v683_v27 = vsub.s32 2, %v674_v24  ;;  %v679_v28 = vsub.s32 1, %v674_v24  ;;  %v687_v29 = vsub.s32 3, %v674_v24 }
 0x1b8   : > { %v691_v51 = vsub.s32 4, %v674_v24  ;;  %v699_v57 = vsub.s32 6, %v674_v24  ;;  %v695_v52 = vsub.s32 5, %v674_v24  ;;  %v703_v53 = vsub.s32 7, %v674_v24 }
 0x1b9   : > { %2215 = vmatpush1.bf16.msra.mxu0 %v6364_v32  ;;  %2297 = vmatpush1.bf16.msra.mxu1 %v6366_v33  ;;  %v676_v30 = vrot.slane %v671_v26, %v675_v25  ;;  %v684_v31 = vrot.slane %v671_v26, %v683_v27  ;;  %v680_v32 = vrot.slane %v671_v26, %v679_v28 }
 0x1ba   : > { %2216 = vmatprep.subr.bf16.mxu0 %v6373_v34  ;;  %2298 = vmatprep.subr.bf16.mxu1 %v6375_v35  ;;  %v688_v33 = vrot.slane %v671_v26, %v687_v29 }
 0x1bd   : > { %2217 = vmatpush1.bf16.msra.mxu0 %v6372_v40  ;;  %2299 = vmatpush1.bf16.msra.mxu1 %v6374_v41 }
 0x1be   : > { %2218 = vmatprep.subr.bf16.mxu0 %v6381_v42  ;;  %2300 = vmatprep.subr.bf16.mxu1 %v6383_v43 }
 0x1c1   : > { %2219 = vmatpush1.bf16.msra.mxu0 %v6380_v12  ;;  %2301 = vmatpush1.bf16.msra.mxu1 %v6382_v48 }
 0x1c2   : > { %2220 = vmatprep.subr.bf16.mxu0 %v6389_v49  ;;  %2302 = vmatprep.subr.bf16.mxu1 %v6391_v50  ;;  %v7520_v50 = vmov 0.0  }
 0x1c3   : > { %2365 = vst [vmem:[#allocation3] sm:$0xff] %v7520_v50  ;;  %2366 = vst [vmem:[#allocation3 + $0x8] sm:$0xff] %v7520_v50 }
 0x1c4   : > { %2367 = vst [vmem:[#allocation3 + $0x10] sm:$0xff] %v7520_v50  ;;  %2368 = vst [vmem:[#allocation3 + $0x18] sm:$0xff] %v7520_v50 }
 0x1c5   : > { %2221 = vmatpush1.bf16.msra.mxu0 %v6388_v54  ;;  %2303 = vmatpush1.bf16.msra.mxu1 %v6390_v55  ;;  %v692_v54 = vrot.slane %v671_v26, %v691_v51  ;;  %v700_v55 = vrot.slane %v671_v26, %v699_v57 }
 0x1c6   : > { %2222 = vmatprep.subr.bf16.mxu0 %v6397_v22  ;;  %2304 = vmatprep.subr.bf16.mxu1 %v6399_v56  ;;  %v696_v22 = vrot.slane %v671_v26, %v695_v52  ;;  %v704_v56 = vrot.slane %v671_v26, %v703_v53 }
 0x1c9   : > { %2223 = vmatpush1.bf16.msra.mxu0 %v6396_v62  ;;  %2305 = vmatpush1.bf16.msra.mxu1 %v6398_v63 }
 0x1ca   : > { %2224 = vmatprep.subr.bf16.mxu0 %v6405_v0  ;;  %2306 = vmatprep.subr.bf16.mxu1 %v6407_v1 }
 0x1cd   : > { %2225 = vmatpush1.bf16.msra.mxu0 %v6404_v6  ;;  %2307 = vmatpush1.bf16.msra.mxu1 %v6406_v7 }
 0x1ce   : > { %2226 = vmatprep.subr.bf16.mxu0 %v6413_v8  ;;  %2308 = vmatprep.subr.bf16.mxu1 %v6415_v9 }
 0x1d1   : > { %2227 = vmatpush1.bf16.msra.mxu0 %v6412_v15  ;;  %2309 = vmatpush1.bf16.msra.mxu1 %v6414_v16 }
 0x1d2   : > { %2228 = vmatprep.subr.bf16.mxu0 %v6421_v17  ;;  %2310 = vmatprep.subr.bf16.mxu1 %v6423_v18 }
 0x1d5   : > { %2229 = vmatpush1.bf16.msra.mxu0 %v6420_v19  ;;  %2311 = vmatpush1.bf16.msra.mxu1 %v6422_v20 }
 0x1d8   : > { %2231 = vmatmul.mubr.bf16.vlgmr.msra.gmra.mrb[4].mxu0 %v7855_v21  ;;  %2313 = vmatmul.mubr.bf16.vlgmr.msra.gmra.mrb[4].mxu1 %v7855_v21 }
 0x22b   : > { %v2068_v34 = vpop.f32.mrb[0].mxu0  ;;  %v2150_v36 = vpop.f32.mrb[0].mxu1 }
 0x22c   : > { %v6708_v35 = vadd.f32 %v2068_v34, %v676_v30  ;;  %v2070_v37 = vpop.f32.mrb[1].mxu0  ;;  %v6710_v38 = vadd.f32 %v2150_v36, %v684_v31  ;;  %v2152_v40 = vpop.f32.mrb[1].mxu1 }
 0x22d   : > { %v6709_v39 = vadd.f32 %v2070_v37, %v680_v32  ;;  %v2072_v41 = vpop.f32.mrb[2].mxu0  ;;  %v6711_v42 = vadd.f32 %v2152_v40, %v688_v33  ;;  %v2154_v43 = vpop.f32.mrb[2].mxu1 }
 0x22e   : > { %v2321_v21 = vmax.f32 %v6708_v35, 0.0  ;;  %v2073_v44 = vpop.f32.mrb[3].mxu0  ;;  %v2323_v45 = vmax.f32 %v6710_v38, 0.0  ;;  %v2155_v47 = vpop.f32.mrb[3].mxu1 }
 0x22f   : > { %v2322_v46 = vmax.f32 %v6709_v39, 0.0  ;;  %v2324_v12 = vmax.f32 %v6711_v42, 0.0 }
 0x231   : > { %v6704_v48 = vpack.c.bf16 %v2322_v46, %v2321_v21  ;;  %v6705_v49 = vpack.c.bf16 %v2324_v12, %v2323_v45 }
 0x233   : > { %2361 = vst [vmem:[#allocation2] sm:$0xff] %v6704_v48  ;;  %2362 = vst [vmem:[#allocation2 + $0x8] sm:$0xff] %v6705_v49 }
 0x2ab   : > { %v2232_v58 = vpop.f32.mrb[4].mxu0  ;;  %v2314_v60 = vpop.f32.mrb[4].mxu1 }
 0x2ac   : > { %v6712_v59 = vadd.f32 %v2232_v58, %v692_v54  ;;  %v2234_v61 = vpop.f32.mrb[5].mxu0  ;;  %v6714_v62 = vadd.f32 %v2314_v60, %v700_v55  ;;  %v2316_v0 = vpop.f32.mrb[5].mxu1 }
 0x2ad   : > { %v6713_v63 = vadd.f32 %v2234_v61, %v696_v22  ;;  %v2236_v1 = vpop.f32.mrb[6].mxu0  ;;  %v6715_v3 = vadd.f32 %v2316_v0, %v704_v56  ;;  %v2318_v4 = vpop.f32.mrb[6].mxu1 }
 0x2ae   : > { %v2325_v2 = vmax.f32 %v6712_v59, 0.0  ;;  %v2237_v5 = vpop.f32.mrb[7].mxu0  ;;  %v2327_v6 = vmax.f32 %v6714_v62, 0.0  ;;  %v2319_v8 = vpop.f32.mrb[7].mxu1 }
 0x2af   : > { %v2326_v7 = vmax.f32 %v6713_v63, 0.0  ;;  %v2328_v9 = vmax.f32 %v6715_v3, 0.0 }
 0x2b1   : > { %v6706_v10 = vpack.c.bf16 %v2326_v7, %v2325_v2  ;;  %v6707_v11 = vpack.c.bf16 %v2328_v9, %v2327_v6 }
 0x2b3   : > { %2363 = vst [vmem:[#allocation2 + $0x10] sm:$0xff] %v6706_v10  ;;  %2364 = vst [vmem:[#allocation2 + $0x18] sm:$0xff] %v6707_v11 }
 0x2b4 PF: > { %v2370_v13 = vld [vmem:[%s7807_s11 + $0x8] sm:$0xff]  ;;  %v2372_v14 = vld [vmem:[%s7807_s11 + $0x18] sm:$0xff]  ;;  %v2369_v15 = vld [vmem:[%s7807_s11] sm:$0xff]  ;;  %p6694_p4 = scmp.ne.s32.totalorder %s7583_s28, 1 }
 0x2b5   : > { %v2626_v16 = vunpack.c.l.s8.bf16 %v2370_v13  ;;  %v2634_v17 = vunpack.c.h.s8.bf16 %v2370_v13  ;;  %v2628_v18 = vunpack.c.l.s8.bf16 %v2372_v14  ;;  %v2636_v19 = vunpack.c.h.s8.bf16 %v2372_v14  ;;  %v2371_v20 = vld [vmem:[%s7807_s11 + $0x10] sm:$0xff]  ;;  %v2378_v25 = vld [vmem:[%s7807_s11 + $0x48] sm:$0xff]  ;;  %v2380_v26 = vld [vmem:[%s7807_s11 + $0x58] sm:$0xff]  ;;  %s8657_s27 = sld [smem:[#allocation25_spill]] (!%p6694_p4) }
 0x2b6   : > { %v2625_v23 = vunpack.c.l.s8.bf16 %v2369_v15  ;;  %v2627_v24 = vunpack.c.l.s8.bf16 %v2371_v20  ;;  %v2633_v27 = vunpack.c.h.s8.bf16 %v2369_v15  ;;  %v2635_v28 = vunpack.c.h.s8.bf16 %v2371_v20  ;;  %v2377_v31 = vld [vmem:[%s7807_s11 + $0x40] sm:$0xff]  ;;  %v2379_v32 = vld [vmem:[%s7807_s11 + $0x50] sm:$0xff]  ;;  %v2386_v37 = vld [vmem:[%s7807_s11 + $0x88] sm:$0xff] }
 0x2b7   : > { %3169 = vmatprep.subr.bf16.mxu0 %v2626_v16  ;;  %3333 = vmatprep.subr.bf16.mxu1 %v2628_v18  ;;  %v2642_v29 = vunpack.c.l.s8.bf16 %v2378_v25  ;;  %v2644_v30 = vunpack.c.l.s8.bf16 %v2380_v26  ;;  %v2641_v33 = vunpack.c.l.s8.bf16 %v2377_v31  ;;  %v2643_v34 = vunpack.c.l.s8.bf16 %v2379_v32  ;;  %v2388_v38 = vld [vmem:[%s7807_s11 + $0x98] sm:$0xff]  ;;  %v2385_v42 = vld [vmem:[%s7807_s11 + $0x80] sm:$0xff]  ;;  %v2387_v43 = vld [vmem:[%s7807_s11 + $0x90] sm:$0xff] }
 0x2b8   : > { %3170 = vmatpush1.bf16.msra.mxu0 %v2625_v23  ;;  %3334 = vmatpush1.bf16.msra.mxu1 %v2627_v24  ;;  %v2650_v35 = vunpack.c.h.s8.bf16 %v2378_v25  ;;  %v2652_v36 = vunpack.c.h.s8.bf16 %v2380_v26  ;;  %v2649_v39 = vunpack.c.h.s8.bf16 %v2377_v31  ;;  %v2651_v40 = vunpack.c.h.s8.bf16 %v2379_v32  ;;  %v7879_v44 = vld [vmem:[#allocation2] sm:$0xff]  ;;  %v2394_v49 = vld [vmem:[%s7807_s11 + $0xc8] sm:$0xff]  ;;  %v2396_v50 = vld [vmem:[%s7807_s11 + $0xd8] sm:$0xff] }
 0x2b9   : > { %3171 = vmatprep.subr.bf16.mxu0 %v2634_v17  ;;  %3335 = vmatprep.subr.bf16.mxu1 %v2636_v19  ;;  %v2658_v41 = vunpack.c.l.s8.bf16 %v2386_v37  ;;  %v2660_v21 = vunpack.c.l.s8.bf16 %v2388_v38  ;;  %v2657_v45 = vunpack.c.l.s8.bf16 %v2385_v42  ;;  %v2659_v46 = vunpack.c.l.s8.bf16 %v2387_v43  ;;  %v2393_v54 = vld [vmem:[%s7807_s11 + $0xc0] sm:$0xff]  ;;  %v2395_v55 = vld [vmem:[%s7807_s11 + $0xd0] sm:$0xff]  ;;  %v2402_v60 = vld [vmem:[%s7807_s11 + $0x108] sm:$0xff] }
 0x2ba   : > { %v2666_v47 = vunpack.c.h.s8.bf16 %v2386_v37  ;;  %v2668_v12 = vunpack.c.h.s8.bf16 %v2388_v38  ;;  %v7883_v48 = vcombine.high %v7879_v44, %v7879_v44  ;;  %v2665_v51 = vunpack.c.h.s8.bf16 %v2385_v42  ;;  %v2404_v61 = vld [vmem:[%s7807_s11 + $0x118] sm:$0xff]  ;;  %v2401_v62 = vld [vmem:[%s7807_s11 + $0x100] sm:$0xff]  ;;  %v2403_v63 = vld [vmem:[%s7807_s11 + $0x110] sm:$0xff] }
 0x2bb   : > { %v2667_v57 = vunpack.c.h.s8.bf16 %v2387_v43  ;;  %v2674_v52 = vunpack.c.l.s8.bf16 %v2394_v49  ;;  %v2676_v53 = vunpack.c.l.s8.bf16 %v2396_v50  ;;  %v2673_v22 = vunpack.c.l.s8.bf16 %v2393_v54  ;;  %v2410_v8 = vld [vmem:[%s7807_s11 + $0x148] sm:$0xff]  ;;  %v2412_v9 = vld [vmem:[%s7807_s11 + $0x158] sm:$0xff]  ;;  %v2409_v10 = vld [vmem:[%s7807_s11 + $0x140] sm:$0xff]  ;;  %s8658_s8 = smov (!%p6694_p4), %s8657_s27 }
 0x2bc   : > { %3172 = vmatpush1.bf16.msra.mxu0 %v2633_v27  ;;  %3336 = vmatpush1.bf16.msra.mxu1 %v2635_v28  ;;  %v2675_v56 = vunpack.c.l.s8.bf16 %v2395_v55  ;;  %v2682_v58 = vunpack.c.h.s8.bf16 %v2394_v49  ;;  %v2684_v59 = vunpack.c.h.s8.bf16 %v2396_v50  ;;  %v2681_v0 = vunpack.c.h.s8.bf16 %v2393_v54  ;;  %v2411_v11 = vld [vmem:[%s7807_s11 + $0x150] sm:$0xff]  ;;  %v2418_v23 = vld [vmem:[%s7807_s11 + $0x188] sm:$0xff]  ;;  %v2420_v24 = vld [vmem:[%s7807_s11 + $0x198] sm:$0xff] }
 0x2bd   : > { %3173 = vmatprep.subr.bf16.mxu0 %v2642_v29  ;;  %3337 = vmatprep.subr.bf16.mxu1 %v2644_v30  ;;  %v2683_v1 = vunpack.c.h.s8.bf16 %v2395_v55  ;;  %v2690_v2 = vunpack.c.l.s8.bf16 %v2402_v60  ;;  %v2692_v3 = vunpack.c.l.s8.bf16 %v2404_v61  ;;  %v2689_v4 = vunpack.c.l.s8.bf16 %v2401_v62  ;;  %v2417_v25 = vld [vmem:[%s7807_s11 + $0x180] sm:$0xff]  ;;  %v2419_v26 = vld [vmem:[%s7807_s11 + $0x190] sm:$0xff]  ;;  %v7911_v54 = vld [vmem:[#allocation2 + $0x8] sm:$0xff] }
 0x2be   : > { %3201 = vmatprep.mubr.bf16.mxu0 %v7883_v48  ;;  %3365 = vmatprep.mubr.bf16.mxu1 %v7883_v48  ;;  %v2691_v5 = vunpack.c.l.s8.bf16 %v2403_v63  ;;  %v2698_v6 = vunpack.c.h.s8.bf16 %v2402_v60  ;;  %v2700_v7 = vunpack.c.h.s8.bf16 %v2404_v61  ;;  %v2697_v13 = vunpack.c.h.s8.bf16 %v2401_v62  ;;  %v2425_v37 = vld [vmem:[%s7807_s11 + $0x1c0] sm:$0xff]  ;;  %v2427_v38 = vld [vmem:[%s7807_s11 + $0x1d0] sm:$0xff]  ;;  %v2442_v60 = vld [vmem:[%s7807_s11 + $0x248] sm:$0xff] }
 0x2bf   : > { %v2699_v14 = vunpack.c.h.s8.bf16 %v2403_v63  ;;  %v2706_v15 = vunpack.c.l.s8.bf16 %v2410_v8  ;;  %v2708_v16 = vunpack.c.l.s8.bf16 %v2412_v9  ;;  %v2705_v17 = vunpack.c.l.s8.bf16 %v2409_v10  ;;  %v2433_v49 = vld [vmem:[%s7807_s11 + $0x200] sm:$0xff]  ;;  %v2435_v50 = vld [vmem:[%s7807_s11 + $0x210] sm:$0xff]  ;;  %v2444_v61 = vld [vmem:[%s7807_s11 + $0x258] sm:$0xff] }
 0x2c0   : > { %3174 = vmatpush1.bf16.msra.mxu0 %v2641_v33  ;;  %3338 = vmatpush1.bf16.msra.mxu1 %v2643_v34  ;;  %v2707_v18 = vunpack.c.l.s8.bf16 %v2411_v11  ;;  %v2714_v19 = vunpack.c.h.s8.bf16 %v2410_v8  ;;  %v2716_v20 = vunpack.c.h.s8.bf16 %v2412_v9  ;;  %v2713_v27 = vunpack.c.h.s8.bf16 %v2409_v10  ;;  %v2443_v63 = vld [vmem:[%s7807_s11 + $0x250] sm:$0xff]  ;;  %v2450_v8 = vld [vmem:[%s7807_s11 + $0x288] sm:$0xff]  ;;  %v2452_v9 = vld [vmem:[%s7807_s11 + $0x298] sm:$0xff] }
 0x2c1   : > { %3175 = vmatprep.subr.bf16.mxu0 %v2650_v35  ;;  %3339 = vmatprep.subr.bf16.mxu1 %v2652_v36  ;;  %v2715_v28 = vunpack.c.h.s8.bf16 %v2411_v11  ;;  %v2722_v29 = vunpack.c.l.s8.bf16 %v2418_v23  ;;  %v2724_v30 = vunpack.c.l.s8.bf16 %v2420_v24  ;;  %v2721_v31 = vunpack.c.l.s8.bf16 %v2417_v25  ;;  %v2426_v35 = vld [vmem:[%s7807_s11 + $0x1c8] sm:$0xff]  ;;  %v2428_v36 = vld [vmem:[%s7807_s11 + $0x1d8] sm:$0xff]  ;;  %v2449_v10 = vld [vmem:[%s7807_s11 + $0x280] sm:$0xff] }
 0x2c2   : > { %v2723_v32 = vunpack.c.l.s8.bf16 %v2419_v26  ;;  %v2730_v33 = vunpack.c.h.s8.bf16 %v2418_v23  ;;  %v2732_v34 = vunpack.c.h.s8.bf16 %v2420_v24  ;;  %v2737_v42 = vunpack.c.l.s8.bf16 %v2425_v37  ;;  %v2451_v11 = vld [vmem:[%s7807_s11 + $0x290] sm:$0xff]  ;;  %v2458_v23 = vld [vmem:[%s7807_s11 + $0x2c8] sm:$0xff]  ;;  %v2460_v24 = vld [vmem:[%s7807_s11 + $0x2d8] sm:$0xff] }
 0x2c3   : > { %v2739_v43 = vunpack.c.l.s8.bf16 %v2427_v38  ;;  %v7915_v55 = vcombine.low %v7879_v44, %v7879_v44  ;;  %v7921_v62 = vcombine.high %v7911_v54, %v7911_v54  ;;  %v2441_v44 = vld [vmem:[%s7807_s11 + $0x240] sm:$0xff] }
 0x2c4   : > { %3176 = vmatpush1.bf16.msra.mxu0 %v2649_v39  ;;  %3340 = vmatpush1.bf16.msra.mxu1 %v2651_v40  ;;  %v2729_v39 = vunpack.c.h.s8.bf16 %v2417_v25  ;;  %v2731_v40 = vunpack.c.h.s8.bf16 %v2419_v26  ;;  %v2457_v25 = vld [vmem:[%s7807_s11 + $0x2c0] sm:$0xff]  ;;  %v2459_v26 = vld [vmem:[%s7807_s11 + $0x2d0] sm:$0xff] }
 0x2c5   : > { %3177 = vmatprep.subr.bf16.mxu0 %v2658_v41  ;;  %3341 = vmatprep.subr.bf16.mxu1 %v2660_v21  ;;  %v2738_v41 = vunpack.c.l.s8.bf16 %v2426_v35  ;;  %v2740_v21 = vunpack.c.l.s8.bf16 %v2428_v36 }
 0x2c8   : > { %3178 = vmatpush1.bf16.msra.mxu0 %v2657_v45  ;;  %3342 = vmatpush1.bf16.msra.mxu1 %v2659_v46  ;;  %v2746_v45 = vunpack.c.h.s8.bf16 %v2426_v35  ;;  %v2748_v46 = vunpack.c.h.s8.bf16 %v2428_v36  ;;  %v2466_v35 = vld [vmem:[%s7807_s11 + $0x308] sm:$0xff]  ;;  %v2468_v36 = vld [vmem:[%s7807_s11 + $0x318] sm:$0xff] }
 0x2c9   : > { %3179 = vmatprep.subr.bf16.mxu0 %v2666_v47  ;;  %3343 = vmatprep.subr.bf16.mxu1 %v2668_v12  ;;  %v2434_v47 = vld [vmem:[%s7807_s11 + $0x208] sm:$0xff]  ;;  %v2436_v12 = vld [vmem:[%s7807_s11 + $0x218] sm:$0xff] }
 0x2cc   : > { %3180 = vmatpush1.bf16.msra.mxu0 %v2665_v51  ;;  %3344 = vmatpush1.bf16.msra.mxu1 %v2667_v57  ;;  %v2745_v51 = vunpack.c.h.s8.bf16 %v2425_v37  ;;  %v2747_v57 = vunpack.c.h.s8.bf16 %v2427_v38  ;;  %v2465_v37 = vld [vmem:[%s7807_s11 + $0x300] sm:$0xff]  ;;  %v2467_v38 = vld [vmem:[%s7807_s11 + $0x310] sm:$0xff] }
 0x2cd   : > { %3181 = vmatprep.subr.bf16.mxu0 %v2674_v52  ;;  %3345 = vmatprep.subr.bf16.mxu1 %v2676_v53  ;;  %v2754_v52 = vunpack.c.l.s8.bf16 %v2434_v47  ;;  %v2756_v53 = vunpack.c.l.s8.bf16 %v2436_v12 }
 0x2d0   : > { %3182 = vmatpush1.bf16.msra.mxu0 %v2673_v22  ;;  %3346 = vmatpush1.bf16.msra.mxu1 %v2675_v56  ;;  %v2753_v22 = vunpack.c.l.s8.bf16 %v2433_v49  ;;  %v2755_v56 = vunpack.c.l.s8.bf16 %v2435_v50 }
 0x2d1   : > { %3183 = vmatprep.subr.bf16.mxu0 %v2682_v58  ;;  %3347 = vmatprep.subr.bf16.mxu1 %v2684_v59  ;;  %v2762_v58 = vunpack.c.h.s8.bf16 %v2434_v47  ;;  %v2764_v59 = vunpack.c.h.s8.bf16 %v2436_v12  ;;  %v2474_v47 = vld [vmem:[%s7807_s11 + $0x348] sm:$0xff]  ;;  %v2476_v12 = vld [vmem:[%s7807_s11 + $0x358] sm:$0xff] }
 0x2d4   : > { %3184 = vmatpush1.bf16.msra.mxu0 %v2681_v0  ;;  %3348 = vmatpush1.bf16.msra.mxu1 %v2683_v1  ;;  %v2761_v0 = vunpack.c.h.s8.bf16 %v2433_v49  ;;  %v2763_v1 = vunpack.c.h.s8.bf16 %v2435_v50  ;;  %v2473_v49 = vld [vmem:[%s7807_s11 + $0x340] sm:$0xff]  ;;  %v2475_v50 = vld [vmem:[%s7807_s11 + $0x350] sm:$0xff] }
 0x2d5   : > { %3185 = vmatprep.subr.bf16.mxu0 %v2690_v2  ;;  %3349 = vmatprep.subr.bf16.mxu1 %v2692_v3  ;;  %v2770_v2 = vunpack.c.l.s8.bf16 %v2442_v60  ;;  %v2772_v3 = vunpack.c.l.s8.bf16 %v2444_v61 }
 0x2d8   : > { %3186 = vmatpush1.bf16.msra.mxu0 %v2689_v4  ;;  %3350 = vmatpush1.bf16.msra.mxu1 %v2691_v5  ;;  %v2769_v4 = vunpack.c.l.s8.bf16 %v2441_v44  ;;  %v2771_v5 = vunpack.c.l.s8.bf16 %v2443_v63 }
 0x2d9   : > { %3187 = vmatprep.subr.bf16.mxu0 %v2698_v6  ;;  %3351 = vmatprep.subr.bf16.mxu1 %v2700_v7  ;;  %v2778_v6 = vunpack.c.h.s8.bf16 %v2442_v60  ;;  %v2780_v7 = vunpack.c.h.s8.bf16 %v2444_v61  ;;  %v2482_v60 = vld [vmem:[%s7807_s11 + $0x388] sm:$0xff]  ;;  %v2484_v61 = vld [vmem:[%s7807_s11 + $0x398] sm:$0xff] }
 0x2dc   : > { %3188 = vmatpush1.bf16.msra.mxu0 %v2697_v13  ;;  %3352 = vmatpush1.bf16.msra.mxu1 %v2699_v14  ;;  %v2777_v13 = vunpack.c.h.s8.bf16 %v2441_v44  ;;  %v2779_v14 = vunpack.c.h.s8.bf16 %v2443_v63  ;;  %v2481_v44 = vld [vmem:[%s7807_s11 + $0x380] sm:$0xff]  ;;  %v2483_v63 = vld [vmem:[%s7807_s11 + $0x390] sm:$0xff] }
 0x2dd   : > { %3189 = vmatprep.subr.bf16.mxu0 %v2706_v15  ;;  %3353 = vmatprep.subr.bf16.mxu1 %v2708_v16  ;;  %v2786_v15 = vunpack.c.l.s8.bf16 %v2450_v8  ;;  %v2788_v16 = vunpack.c.l.s8.bf16 %v2452_v9 }
 0x2e0   : > { %3190 = vmatpush1.bf16.msra.mxu0 %v2705_v17  ;;  %3354 = vmatpush1.bf16.msra.mxu1 %v2707_v18  ;;  %v2785_v17 = vunpack.c.l.s8.bf16 %v2449_v10  ;;  %v2787_v18 = vunpack.c.l.s8.bf16 %v2451_v11 }
 0x2e1   : > { %3191 = vmatprep.subr.bf16.mxu0 %v2714_v19  ;;  %3355 = vmatprep.subr.bf16.mxu1 %v2716_v20  ;;  %v2794_v19 = vunpack.c.h.s8.bf16 %v2450_v8  ;;  %v2796_v20 = vunpack.c.h.s8.bf16 %v2452_v9  ;;  %v2490_v8 = vld [vmem:[%s7807_s11 + $0x3c8] sm:$0xff]  ;;  %v2492_v9 = vld [vmem:[%s7807_s11 + $0x3d8] sm:$0xff] }
 0x2e4   : > { %3192 = vmatpush1.bf16.msra.mxu0 %v2713_v27  ;;  %3356 = vmatpush1.bf16.msra.mxu1 %v2715_v28  ;;  %v2793_v27 = vunpack.c.h.s8.bf16 %v2449_v10  ;;  %v2795_v28 = vunpack.c.h.s8.bf16 %v2451_v11  ;;  %v2489_v10 = vld [vmem:[%s7807_s11 + $0x3c0] sm:$0xff]  ;;  %v2491_v11 = vld [vmem:[%s7807_s11 + $0x3d0] sm:$0xff] }
 0x2e5   : > { %3193 = vmatprep.subr.bf16.mxu0 %v2722_v29  ;;  %3357 = vmatprep.subr.bf16.mxu1 %v2724_v30  ;;  %v2802_v29 = vunpack.c.l.s8.bf16 %v2458_v23  ;;  %v2804_v30 = vunpack.c.l.s8.bf16 %v2460_v24 }
 0x2e8   : > { %3194 = vmatpush1.bf16.msra.mxu0 %v2721_v31  ;;  %3358 = vmatpush1.bf16.msra.mxu1 %v2723_v32  ;;  %v2801_v31 = vunpack.c.l.s8.bf16 %v2457_v25  ;;  %v2803_v32 = vunpack.c.l.s8.bf16 %v2459_v26 }
 0x2e9   : > { %3195 = vmatprep.subr.bf16.mxu0 %v2730_v33  ;;  %3359 = vmatprep.subr.bf16.mxu1 %v2732_v34  ;;  %v2810_v33 = vunpack.c.h.s8.bf16 %v2458_v23  ;;  %v2812_v34 = vunpack.c.h.s8.bf16 %v2460_v24  ;;  %v2498_v23 = vld [vmem:[%s7807_s11 + $0x408] sm:$0xff]  ;;  %v2500_v24 = vld [vmem:[%s7807_s11 + $0x418] sm:$0xff] }
 0x2ec   : > { %3196 = vmatpush1.bf16.msra.mxu0 %v2729_v39  ;;  %3360 = vmatpush1.bf16.msra.mxu1 %v2731_v40  ;;  %v2809_v39 = vunpack.c.h.s8.bf16 %v2457_v25  ;;  %v2811_v40 = vunpack.c.h.s8.bf16 %v2459_v26  ;;  %v2497_v25 = vld [vmem:[%s7807_s11 + $0x400] sm:$0xff]  ;;  %v2499_v26 = vld [vmem:[%s7807_s11 + $0x410] sm:$0xff] }
 0x2ed   : > { %3197 = vmatprep.subr.bf16.mxu0 %v2738_v41  ;;  %3361 = vmatprep.subr.bf16.mxu1 %v2740_v21  ;;  %v2818_v41 = vunpack.c.l.s8.bf16 %v2466_v35  ;;  %v2820_v21 = vunpack.c.l.s8.bf16 %v2468_v36 }
 0x2f0   : > { %3198 = vmatpush1.bf16.msra.mxu0 %v2737_v42  ;;  %3362 = vmatpush1.bf16.msra.mxu1 %v2739_v43  ;;  %v2817_v42 = vunpack.c.l.s8.bf16 %v2465_v37  ;;  %v2819_v43 = vunpack.c.l.s8.bf16 %v2467_v38 }
 0x2f1   : > { %3199 = vmatprep.subr.bf16.mxu0 %v2746_v45  ;;  %3363 = vmatprep.subr.bf16.mxu1 %v2748_v46  ;;  %v2826_v45 = vunpack.c.h.s8.bf16 %v2466_v35  ;;  %v2828_v46 = vunpack.c.h.s8.bf16 %v2468_v36  ;;  %v2890_v35 = vunpack.c.h.s8.bf16 %v2498_v23  ;;  %v2892_v36 = vunpack.c.h.s8.bf16 %v2500_v24 }
 0x2f4   : > { %3200 = vmatpush1.bf16.msra.mxu0 %v2745_v51  ;;  %3364 = vmatpush1.bf16.msra.mxu1 %v2747_v57  ;;  %v2825_v51 = vunpack.c.h.s8.bf16 %v2465_v37  ;;  %v2827_v57 = vunpack.c.h.s8.bf16 %v2467_v38  ;;  %v2506_v37 = vld [vmem:[%s7807_s11 + $0x448] sm:$0xff]  ;;  %v2508_v38 = vld [vmem:[%s7807_s11 + $0x458] sm:$0xff] }
 0x2f5   : > { %3210 = vmatprep.subr.bf16.mxu0 %v2754_v52  ;;  %3374 = vmatprep.subr.bf16.mxu1 %v2756_v53  ;;  %v2834_v52 = vunpack.c.l.s8.bf16 %v2474_v47  ;;  %v2836_v53 = vunpack.c.l.s8.bf16 %v2476_v12 }
 0x2f7   : > { %3202 = vmatmul.mubr.bf16.vlgmr.msra.gmra.mrb[0].mxu0 %v7915_v55  ;;  %3366 = vmatmul.mubr.bf16.vlgmr.msra.gmra.mrb[0].mxu1 %v7915_v55 }
 0x2f8   : > { %3211 = vmatpush1.bf16.msra.mxu0 %v2753_v22  ;;  %3375 = vmatpush1.bf16.msra.mxu1 %v2755_v56  ;;  %v2833_v22 = vunpack.c.l.s8.bf16 %v2473_v49  ;;  %v2835_v56 = vunpack.c.l.s8.bf16 %v2475_v50 }
 0x2f9   : > { %3212 = vmatprep.subr.bf16.mxu0 %v2762_v58  ;;  %3376 = vmatprep.subr.bf16.mxu1 %v2764_v59  ;;  %v2842_v58 = vunpack.c.h.s8.bf16 %v2474_v47  ;;  %v2844_v59 = vunpack.c.h.s8.bf16 %v2476_v12  ;;  %v2906_v47 = vunpack.c.h.s8.bf16 %v2506_v37  ;;  %v2908_v12 = vunpack.c.h.s8.bf16 %v2508_v38 }
 0x2fa   : > { %3242 = vmatprep.mubr.bf16.mxu0 %v7921_v62  ;;  %3406 = vmatprep.mubr.bf16.mxu1 %v7921_v62 }
 0x2fc   : > { %3213 = vmatpush1.bf16.msra.mxu0 %v2761_v0  ;;  %3377 = vmatpush1.bf16.msra.mxu1 %v2763_v1  ;;  %v2841_v0 = vunpack.c.h.s8.bf16 %v2473_v49  ;;  %v2843_v1 = vunpack.c.h.s8.bf16 %v2475_v50  ;;  %v2514_v49 = vld [vmem:[%s7807_s11 + $0x488] sm:$0xff]  ;;  %v2516_v50 = vld [vmem:[%s7807_s11 + $0x498] sm:$0xff] }
 0x2fd   : > { %3214 = vmatprep.subr.bf16.mxu0 %v2770_v2  ;;  %3378 = vmatprep.subr.bf16.mxu1 %v2772_v3  ;;  %v2850_v2 = vunpack.c.l.s8.bf16 %v2482_v60  ;;  %v2852_v3 = vunpack.c.l.s8.bf16 %v2484_v61 }
 0x300   : > { %3215 = vmatpush1.bf16.msra.mxu0 %v2769_v4  ;;  %3379 = vmatpush1.bf16.msra.mxu1 %v2771_v5  ;;  %v2849_v4 = vunpack.c.l.s8.bf16 %v2481_v44  ;;  %v2851_v5 = vunpack.c.l.s8.bf16 %v2483_v63 }
 0x301   : > { %3216 = vmatprep.subr.bf16.mxu0 %v2778_v6  ;;  %3380 = vmatprep.subr.bf16.mxu1 %v2780_v7  ;;  %v2858_v6 = vunpack.c.h.s8.bf16 %v2482_v60  ;;  %v2860_v7 = vunpack.c.h.s8.bf16 %v2484_v61  ;;  %v2922_v60 = vunpack.c.h.s8.bf16 %v2514_v49  ;;  %v2924_v61 = vunpack.c.h.s8.bf16 %v2516_v50 }
 0x304   : > { %3217 = vmatpush1.bf16.msra.mxu0 %v2777_v13  ;;  %3381 = vmatpush1.bf16.msra.mxu1 %v2779_v14  ;;  %v2857_v13 = vunpack.c.h.s8.bf16 %v2481_v44  ;;  %v2859_v14 = vunpack.c.h.s8.bf16 %v2483_v63  ;;  %v2522_v44 = vld [vmem:[%s7807_s11 + $0x4c8] sm:$0xff]  ;;  %v2524_v63 = vld [vmem:[%s7807_s11 + $0x4d8] sm:$0xff] }
 0x305   : > { %3218 = vmatprep.subr.bf16.mxu0 %v2786_v15  ;;  %3382 = vmatprep.subr.bf16.mxu1 %v2788_v16  ;;  %v2866_v15 = vunpack.c.l.s8.bf16 %v2490_v8  ;;  %v2868_v16 = vunpack.c.l.s8.bf16 %v2492_v9 }
 0x308   : > { %3219 = vmatpush1.bf16.msra.mxu0 %v2785_v17  ;;  %3383 = vmatpush1.bf16.msra.mxu1 %v2787_v18  ;;  %v2865_v17 = vunpack.c.l.s8.bf16 %v2489_v10  ;;  %v2867_v18 = vunpack.c.l.s8.bf16 %v2491_v11 }
 0x309   : > { %3220 = vmatprep.subr.bf16.mxu0 %v2794_v19  ;;  %3384 = vmatprep.subr.bf16.mxu1 %v2796_v20  ;;  %v2874_v19 = vunpack.c.h.s8.bf16 %v2490_v8  ;;  %v2876_v20 = vunpack.c.h.s8.bf16 %v2492_v9  ;;  %v2938_v8 = vunpack.c.h.s8.bf16 %v2522_v44  ;;  %v2940_v9 = vunpack.c.h.s8.bf16 %v2524_v63 }
 0x30c   : > { %3221 = vmatpush1.bf16.msra.mxu0 %v2793_v27  ;;  %3385 = vmatpush1.bf16.msra.mxu1 %v2795_v28  ;;  %v2873_v27 = vunpack.c.h.s8.bf16 %v2489_v10  ;;  %v2875_v28 = vunpack.c.h.s8.bf16 %v2491_v11  ;;  %v2530_v10 = vld [vmem:[%s7807_s11 + $0x508] sm:$0xff]  ;;  %v2532_v11 = vld [vmem:[%s7807_s11 + $0x518] sm:$0xff] }
 0x30d   : > { %3222 = vmatprep.subr.bf16.mxu0 %v2802_v29  ;;  %3386 = vmatprep.subr.bf16.mxu1 %v2804_v30  ;;  %v2882_v29 = vunpack.c.l.s8.bf16 %v2498_v23  ;;  %v2884_v30 = vunpack.c.l.s8.bf16 %v2500_v24  ;;  %v2954_v23 = vunpack.c.h.s8.bf16 %v2530_v10  ;;  %v2956_v24 = vunpack.c.h.s8.bf16 %v2532_v11 }
 0x310   : > { %3223 = vmatpush1.bf16.msra.mxu0 %v2801_v31  ;;  %3387 = vmatpush1.bf16.msra.mxu1 %v2803_v32  ;;  %v7959_v31 = vcombine.low %v7911_v54, %v7911_v54  ;;  %v7961_v32 = vld [vmem:[#allocation2 + $0x10] sm:$0xff]  ;;  %v2889_v54 = vunpack.c.h.s8.bf16 %v2497_v25 }
 0x311   : > { %3224 = vmatprep.subr.bf16.mxu0 %v2810_v33  ;;  %3388 = vmatprep.subr.bf16.mxu1 %v2812_v34  ;;  %v2881_v33 = vunpack.c.l.s8.bf16 %v2497_v25  ;;  %v2883_v34 = vunpack.c.l.s8.bf16 %v2499_v26  ;;  %v2538_v25 = vld [vmem:[%s7807_s11 + $0x548] sm:$0xff] }
 0x314   : > { %3225 = vmatpush1.bf16.msra.mxu0 %v2809_v39  ;;  %3389 = vmatpush1.bf16.msra.mxu1 %v2811_v40  ;;  %v7967_v39 = vcombine.high %v7961_v32, %v7961_v32  ;;  %v2891_v40 = vunpack.c.h.s8.bf16 %v2499_v26  ;;  %v2540_v26 = vld [vmem:[%s7807_s11 + $0x558] sm:$0xff] }
 0x315   : > { %3226 = vmatprep.subr.bf16.mxu0 %v2818_v41  ;;  %3390 = vmatprep.subr.bf16.mxu1 %v2820_v21  ;;  %v2898_v41 = vunpack.c.l.s8.bf16 %v2506_v37  ;;  %v2900_v21 = vunpack.c.l.s8.bf16 %v2508_v38  ;;  %v2970_v37 = vunpack.c.h.s8.bf16 %v2538_v25  ;;  %v2972_v38 = vunpack.c.h.s8.bf16 %v2540_v26 }
 0x318   : > { %3227 = vmatpush1.bf16.msra.mxu0 %v2817_v42  ;;  %3391 = vmatpush1.bf16.msra.mxu1 %v2819_v43  ;;  %v2505_v42 = vld [vmem:[%s7807_s11 + $0x440] sm:$0xff]  ;;  %v2507_v43 = vld [vmem:[%s7807_s11 + $0x450] sm:$0xff] }
 0x319   : > { %3228 = vmatprep.subr.bf16.mxu0 %v2826_v45  ;;  %3392 = vmatprep.subr.bf16.mxu1 %v2828_v46  ;;  %v2897_v45 = vunpack.c.l.s8.bf16 %v2505_v42  ;;  %v2899_v46 = vunpack.c.l.s8.bf16 %v2507_v43 }
 0x31c   : > { %3229 = vmatpush1.bf16.msra.mxu0 %v2825_v51  ;;  %3393 = vmatpush1.bf16.msra.mxu1 %v2827_v57  ;;  %v2905_v51 = vunpack.c.h.s8.bf16 %v2505_v42  ;;  %v2907_v57 = vunpack.c.h.s8.bf16 %v2507_v43 }
 0x31d   : > { %3230 = vmatprep.subr.bf16.mxu0 %v2834_v52  ;;  %3394 = vmatprep.subr.bf16.mxu1 %v2836_v53  ;;  %v2914_v52 = vunpack.c.l.s8.bf16 %v2514_v49  ;;  %v2916_v53 = vunpack.c.l.s8.bf16 %v2516_v50 }
 0x320   : > { %3231 = vmatpush1.bf16.msra.mxu0 %v2833_v22  ;;  %3395 = vmatpush1.bf16.msra.mxu1 %v2835_v56  ;;  %v2513_v22 = vld [vmem:[%s7807_s11 + $0x480] sm:$0xff]  ;;  %v2515_v56 = vld [vmem:[%s7807_s11 + $0x490] sm:$0xff] }
 0x321   : > { %3232 = vmatprep.subr.bf16.mxu0 %v2842_v58  ;;  %3396 = vmatprep.subr.bf16.mxu1 %v2844_v59  ;;  %v2913_v58 = vunpack.c.l.s8.bf16 %v2513_v22  ;;  %v2915_v59 = vunpack.c.l.s8.bf16 %v2515_v56 }
 0x324   : > { %3233 = vmatpush1.bf16.msra.mxu0 %v2841_v0  ;;  %3397 = vmatpush1.bf16.msra.mxu1 %v2843_v1  ;;  %v2921_v0 = vunpack.c.h.s8.bf16 %v2513_v22  ;;  %v2923_v1 = vunpack.c.h.s8.bf16 %v2515_v56 }
 0x325   : > { %3234 = vmatprep.subr.bf16.mxu0 %v2850_v2  ;;  %3398 = vmatprep.subr.bf16.mxu1 %v2852_v3  ;;  %v2930_v2 = vunpack.c.l.s8.bf16 %v2522_v44  ;;  %v2932_v3 = vunpack.c.l.s8.bf16 %v2524_v63 }
 0x328   : > { %3235 = vmatpush1.bf16.msra.mxu0 %v2849_v4  ;;  %3399 = vmatpush1.bf16.msra.mxu1 %v2851_v5  ;;  %v2521_v4 = vld [vmem:[%s7807_s11 + $0x4c0] sm:$0xff]  ;;  %v2523_v5 = vld [vmem:[%s7807_s11 + $0x4d0] sm:$0xff] }
 0x329   : > { %3236 = vmatprep.subr.bf16.mxu0 %v2858_v6  ;;  %3400 = vmatprep.subr.bf16.mxu1 %v2860_v7  ;;  %v2929_v6 = vunpack.c.l.s8.bf16 %v2521_v4  ;;  %v2931_v7 = vunpack.c.l.s8.bf16 %v2523_v5 }
 0x32c   : > { %3237 = vmatpush1.bf16.msra.mxu0 %v2857_v13  ;;  %3401 = vmatpush1.bf16.msra.mxu1 %v2859_v14  ;;  %v2937_v13 = vunpack.c.h.s8.bf16 %v2521_v4  ;;  %v2939_v14 = vunpack.c.h.s8.bf16 %v2523_v5 }
 0x32d   : > { %3238 = vmatprep.subr.bf16.mxu0 %v2866_v15  ;;  %3402 = vmatprep.subr.bf16.mxu1 %v2868_v16  ;;  %v2946_v15 = vunpack.c.l.s8.bf16 %v2530_v10  ;;  %v2948_v16 = vunpack.c.l.s8.bf16 %v2532_v11 }
 0x330   : > { %3239 = vmatpush1.bf16.msra.mxu0 %v2865_v17  ;;  %3403 = vmatpush1.bf16.msra.mxu1 %v2867_v18  ;;  %v2529_v17 = vld [vmem:[%s7807_s11 + $0x500] sm:$0xff]  ;;  %v2531_v18 = vld [vmem:[%s7807_s11 + $0x510] sm:$0xff] }
 0x331   : > { %3240 = vmatprep.subr.bf16.mxu0 %v2874_v19  ;;  %3404 = vmatprep.subr.bf16.mxu1 %v2876_v20  ;;  %v2945_v19 = vunpack.c.l.s8.bf16 %v2529_v17  ;;  %v2947_v20 = vunpack.c.l.s8.bf16 %v2531_v18 }
 0x334   : > { %3241 = vmatpush1.bf16.msra.mxu0 %v2873_v27  ;;  %3405 = vmatpush1.bf16.msra.mxu1 %v2875_v28  ;;  %v2953_v27 = vunpack.c.h.s8.bf16 %v2529_v17  ;;  %v2955_v28 = vunpack.c.h.s8.bf16 %v2531_v18 }
 0x335   : > { %3251 = vmatprep.subr.bf16.mxu0 %v2882_v29  ;;  %3415 = vmatprep.subr.bf16.mxu1 %v2884_v30  ;;  %v2962_v29 = vunpack.c.l.s8.bf16 %v2538_v25  ;;  %v2964_v30 = vunpack.c.l.s8.bf16 %v2540_v26 }
 0x337   : > { %3243 = vmatmul.mubr.bf16.vlgmr.msra.gmra.mrb[0].mxu0 %v7959_v31  ;;  %3407 = vmatmul.mubr.bf16.vlgmr.msra.gmra.mrb[0].mxu1 %v7959_v31 }
 0x338   : > { %3252 = vmatpush1.bf16.msra.mxu0 %v2881_v33  ;;  %3416 = vmatpush1.bf16.msra.mxu1 %v2883_v34  ;;  %v2537_v33 = vld [vmem:[%s7807_s11 + $0x540] sm:$0xff]  ;;  %v2539_v34 = vld [vmem:[%s7807_s11 + $0x550] sm:$0xff] }
 0x339   : > { %3253 = vmatprep.subr.bf16.mxu0 %v2890_v35  ;;  %3417 = vmatprep.subr.bf16.mxu1 %v2892_v36  ;;  %v2961_v35 = vunpack.c.l.s8.bf16 %v2537_v33  ;;  %v2963_v36 = vunpack.c.l.s8.bf16 %v2539_v34 }
 0x33a   : > { %3283 = vmatprep.mubr.bf16.mxu0 %v7967_v39  ;;  %3447 = vmatprep.mubr.bf16.mxu1 %v7967_v39 }
 0x33c   : > { %3254 = vmatpush1.bf16.msra.mxu0 %v2889_v54  ;;  %3418 = vmatpush1.bf16.msra.mxu1 %v2891_v40  ;;  %v2546_v54 = vld [vmem:[%s7807_s11 + $0x588] sm:$0xff]  ;;  %v2548_v40 = vld [vmem:[%s7807_s11 + $0x598] sm:$0xff] }
 0x33d   : > { %3255 = vmatprep.subr.bf16.mxu0 %v2898_v41  ;;  %3419 = vmatprep.subr.bf16.mxu1 %v2900_v21  ;;  %v2969_v41 = vunpack.c.h.s8.bf16 %v2537_v33  ;;  %v2971_v21 = vunpack.c.h.s8.bf16 %v2539_v34  ;;  %v2978_v42 = vunpack.c.l.s8.bf16 %v2546_v54  ;;  %v2980_v43 = vunpack.c.l.s8.bf16 %v2548_v40 }
 0x33e   : > { %v2986_v49 = vunpack.c.h.s8.bf16 %v2546_v54  ;;  %v2988_v50 = vunpack.c.h.s8.bf16 %v2548_v40 }
 0x340   : > { %3256 = vmatpush1.bf16.msra.mxu0 %v2897_v45  ;;  %3420 = vmatpush1.bf16.msra.mxu1 %v2899_v46  ;;  %v2545_v45 = vld [vmem:[%s7807_s11 + $0x580] sm:$0xff]  ;;  %v2547_v46 = vld [vmem:[%s7807_s11 + $0x590] sm:$0xff] }
 0x341   : > { %3257 = vmatprep.subr.bf16.mxu0 %v2906_v47  ;;  %3421 = vmatprep.subr.bf16.mxu1 %v2908_v12  ;;  %v2977_v47 = vunpack.c.l.s8.bf16 %v2545_v45  ;;  %v2979_v12 = vunpack.c.l.s8.bf16 %v2547_v46 }
 0x344   : > { %3258 = vmatpush1.bf16.msra.mxu0 %v2905_v51  ;;  %3422 = vmatpush1.bf16.msra.mxu1 %v2907_v57  ;;  %v2554_v51 = vld [vmem:[%s7807_s11 + $0x5c8] sm:$0xff]  ;;  %v2556_v57 = vld [vmem:[%s7807_s11 + $0x5d8] sm:$0xff] }
 0x345   : > { %3259 = vmatprep.subr.bf16.mxu0 %v2914_v52  ;;  %3423 = vmatprep.subr.bf16.mxu1 %v2916_v53  ;;  %v2985_v52 = vunpack.c.h.s8.bf16 %v2545_v45  ;;  %v2987_v53 = vunpack.c.h.s8.bf16 %v2547_v46  ;;  %v2994_v22 = vunpack.c.l.s8.bf16 %v2554_v51  ;;  %v2996_v56 = vunpack.c.l.s8.bf16 %v2556_v57 }
 0x346   : > { %v3002_v44 = vunpack.c.h.s8.bf16 %v2554_v51  ;;  %v3004_v63 = vunpack.c.h.s8.bf16 %v2556_v57 }
 0x348   : > { %3260 = vmatpush1.bf16.msra.mxu0 %v2913_v58  ;;  %3424 = vmatpush1.bf16.msra.mxu1 %v2915_v59  ;;  %v2553_v58 = vld [vmem:[%s7807_s11 + $0x5c0] sm:$0xff]  ;;  %v2555_v59 = vld [vmem:[%s7807_s11 + $0x5d0] sm:$0xff] }
 0x349   : > { %3261 = vmatprep.subr.bf16.mxu0 %v2922_v60  ;;  %3425 = vmatprep.subr.bf16.mxu1 %v2924_v61  ;;  %v2993_v60 = vunpack.c.l.s8.bf16 %v2553_v58  ;;  %v2995_v61 = vunpack.c.l.s8.bf16 %v2555_v59 }
 0x34c   : > { %3262 = vmatpush1.bf16.msra.mxu0 %v2921_v0  ;;  %3426 = vmatpush1.bf16.msra.mxu1 %v2923_v1  ;;  %v2562_v0 = vld [vmem:[%s7807_s11 + $0x608] sm:$0xff]  ;;  %v2564_v1 = vld [vmem:[%s7807_s11 + $0x618] sm:$0xff] }
 0x34d   : > { %3263 = vmatprep.subr.bf16.mxu0 %v2930_v2  ;;  %3427 = vmatprep.subr.bf16.mxu1 %v2932_v3  ;;  %v3001_v2 = vunpack.c.h.s8.bf16 %v2553_v58  ;;  %v3003_v3 = vunpack.c.h.s8.bf16 %v2555_v59  ;;  %v3010_v4 = vunpack.c.l.s8.bf16 %v2562_v0  ;;  %v3012_v5 = vunpack.c.l.s8.bf16 %v2564_v1 }
 0x350   : > { %3264 = vmatpush1.bf16.msra.mxu0 %v2929_v6  ;;  %3428 = vmatpush1.bf16.msra.mxu1 %v2931_v7  ;;  %v2561_v6 = vld [vmem:[%s7807_s11 + $0x600] sm:$0xff]  ;;  %v2563_v7 = vld [vmem:[%s7807_s11 + $0x610] sm:$0xff] }
 0x351   : > { %3265 = vmatprep.subr.bf16.mxu0 %v2938_v8  ;;  %3429 = vmatprep.subr.bf16.mxu1 %v2940_v9  ;;  %v8005_v8 = vcombine.low %v7961_v32, %v7961_v32  ;;  %v8007_v9 = vld [vmem:[#allocation2 + $0x18] sm:$0xff]  ;;  %v3009_v10 = vunpack.c.l.s8.bf16 %v2561_v6  ;;  %v3011_v11 = vunpack.c.l.s8.bf16 %v2563_v7  ;;  %v3017_v32 = vunpack.c.h.s8.bf16 %v2561_v6 }
 0x352   : > { %v8013_v17 = vcombine.high %v8007_v9, %v8007_v9  ;;  %v3019_v18 = vunpack.c.h.s8.bf16 %v2563_v7 }
 0x354   : > { %3266 = vmatpush1.bf16.msra.mxu0 %v2937_v13  ;;  %3430 = vmatpush1.bf16.msra.mxu1 %v2939_v14  ;;  %v3018_v13 = vunpack.c.h.s8.bf16 %v2562_v0  ;;  %v3020_v14 = vunpack.c.h.s8.bf16 %v2564_v1 }
 0x355   : > { %3267 = vmatprep.subr.bf16.mxu0 %v2946_v15  ;;  %3431 = vmatprep.subr.bf16.mxu1 %v2948_v16  ;;  %v2570_v15 = vld [vmem:[%s7807_s11 + $0x648] sm:$0xff]  ;;  %v2572_v16 = vld [vmem:[%s7807_s11 + $0x658] sm:$0xff] }
 0x358   : > { %3268 = vmatpush1.bf16.msra.mxu0 %v2945_v19  ;;  %3432 = vmatpush1.bf16.msra.mxu1 %v2947_v20  ;;  %v3026_v19 = vunpack.c.l.s8.bf16 %v2570_v15  ;;  %v3028_v20 = vunpack.c.l.s8.bf16 %v2572_v16 }
 0x359   : > { %3269 = vmatprep.subr.bf16.mxu0 %v2954_v23  ;;  %3433 = vmatprep.subr.bf16.mxu1 %v2956_v24  ;;  %v2569_v23 = vld [vmem:[%s7807_s11 + $0x640] sm:$0xff]  ;;  %v2571_v24 = vld [vmem:[%s7807_s11 + $0x650] sm:$0xff] }
 0x35a   : > { %v3025_v25 = vunpack.c.l.s8.bf16 %v2569_v23  ;;  %v3027_v26 = vunpack.c.l.s8.bf16 %v2571_v24  ;;  %v3033_v33 = vunpack.c.h.s8.bf16 %v2569_v23  ;;  %v3035_v34 = vunpack.c.h.s8.bf16 %v2571_v24 }
 0x35c   : > { %3270 = vmatpush1.bf16.msra.mxu0 %v2953_v27  ;;  %3434 = vmatpush1.bf16.msra.mxu1 %v2955_v28  ;;  %v3034_v27 = vunpack.c.h.s8.bf16 %v2570_v15  ;;  %v3036_v28 = vunpack.c.h.s8.bf16 %v2572_v16 }
 0x35d   : > { %3271 = vmatprep.subr.bf16.mxu0 %v2962_v29  ;;  %3435 = vmatprep.subr.bf16.mxu1 %v2964_v30  ;;  %v2578_v29 = vld [vmem:[%s7807_s11 + $0x688] sm:$0xff]  ;;  %v2580_v30 = vld [vmem:[%s7807_s11 + $0x698] sm:$0xff] }
 0x360   : > { %3272 = vmatpush1.bf16.msra.mxu0 %v2961_v35  ;;  %3436 = vmatpush1.bf16.msra.mxu1 %v2963_v36  ;;  %v3042_v35 = vunpack.c.l.s8.bf16 %v2578_v29  ;;  %v3044_v36 = vunpack.c.l.s8.bf16 %v2580_v30 }
 0x361   : > { %3273 = vmatprep.subr.bf16.mxu0 %v2970_v37  ;;  %3437 = vmatprep.subr.bf16.mxu1 %v2972_v38  ;;  %v2577_v37 = vld [vmem:[%s7807_s11 + $0x680] sm:$0xff]  ;;  %v2579_v38 = vld [vmem:[%s7807_s11 + $0x690] sm:$0xff] }
 0x362   : > { %v3041_v54 = vunpack.c.l.s8.bf16 %v2577_v37  ;;  %v3043_v40 = vunpack.c.l.s8.bf16 %v2579_v38  ;;  %v3049_v45 = vunpack.c.h.s8.bf16 %v2577_v37  ;;  %v3051_v46 = vunpack.c.h.s8.bf16 %v2579_v38 }
 0x364   : > { %3274 = vmatpush1.bf16.msra.mxu0 %v2969_v41  ;;  %3438 = vmatpush1.bf16.msra.mxu1 %v2971_v21  ;;  %v3050_v41 = vunpack.c.h.s8.bf16 %v2578_v29  ;;  %v3052_v21 = vunpack.c.h.s8.bf16 %v2580_v30 }
 0x365   : > { %3275 = vmatprep.subr.bf16.mxu0 %v2978_v42  ;;  %3439 = vmatprep.subr.bf16.mxu1 %v2980_v43  ;;  %v2586_v42 = vld [vmem:[%s7807_s11 + $0x6c8] sm:$0xff]  ;;  %v2588_v43 = vld [vmem:[%s7807_s11 + $0x6d8] sm:$0xff] }
 0x368   : > { %3276 = vmatpush1.bf16.msra.mxu0 %v2977_v47  ;;  %3440 = vmatpush1.bf16.msra.mxu1 %v2979_v12  ;;  %v3058_v47 = vunpack.c.l.s8.bf16 %v2586_v42  ;;  %v3060_v12 = vunpack.c.l.s8.bf16 %v2588_v43 }
 0x369   : > { %3277 = vmatprep.subr.bf16.mxu0 %v2986_v49  ;;  %3441 = vmatprep.subr.bf16.mxu1 %v2988_v50  ;;  %v2585_v49 = vld [vmem:[%s7807_s11 + $0x6c0] sm:$0xff]  ;;  %v2587_v50 = vld [vmem:[%s7807_s11 + $0x6d0] sm:$0xff] }
 0x36a   : > { %v3057_v51 = vunpack.c.l.s8.bf16 %v2585_v49  ;;  %v3059_v57 = vunpack.c.l.s8.bf16 %v2587_v50  ;;  %v3065_v58 = vunpack.c.h.s8.bf16 %v2585_v49  ;;  %v3067_v59 = vunpack.c.h.s8.bf16 %v2587_v50 }
 0x36c   : > { %3278 = vmatpush1.bf16.msra.mxu0 %v2985_v52  ;;  %3442 = vmatpush1.bf16.msra.mxu1 %v2987_v53  ;;  %v3066_v52 = vunpack.c.h.s8.bf16 %v2586_v42  ;;  %v3068_v53 = vunpack.c.h.s8.bf16 %v2588_v43 }
 0x36d   : > { %3279 = vmatprep.subr.bf16.mxu0 %v2994_v22  ;;  %3443 = vmatprep.subr.bf16.mxu1 %v2996_v56  ;;  %v2594_v22 = vld [vmem:[%s7807_s11 + $0x708] sm:$0xff]  ;;  %v2596_v56 = vld [vmem:[%s7807_s11 + $0x718] sm:$0xff] }
 0x370   : > { %3280 = vmatpush1.bf16.msra.mxu0 %v2993_v60  ;;  %3444 = vmatpush1.bf16.msra.mxu1 %v2995_v61  ;;  %v3074_v60 = vunpack.c.l.s8.bf16 %v2594_v22  ;;  %v3076_v61 = vunpack.c.l.s8.bf16 %v2596_v56 }
 0x371   : > { %3281 = vmatprep.subr.bf16.mxu0 %v3002_v44  ;;  %3445 = vmatprep.subr.bf16.mxu1 %v3004_v63  ;;  %v2593_v44 = vld [vmem:[%s7807_s11 + $0x700] sm:$0xff]  ;;  %v2595_v63 = vld [vmem:[%s7807_s11 + $0x710] sm:$0xff] }
 0x372   : > { %v3073_v0 = vunpack.c.l.s8.bf16 %v2593_v44  ;;  %v3075_v1 = vunpack.c.l.s8.bf16 %v2595_v63  ;;  %v3081_v6 = vunpack.c.h.s8.bf16 %v2593_v44  ;;  %v3083_v7 = vunpack.c.h.s8.bf16 %v2595_v63  ;;  %v2384_v44 = vld [vmem:[%s7807_s11 + $0x78] sm:$0xff] }
 0x374   : > { %3282 = vmatpush1.bf16.msra.mxu0 %v3001_v2  ;;  %3446 = vmatpush1.bf16.msra.mxu1 %v3003_v3  ;;  %v3082_v2 = vunpack.c.h.s8.bf16 %v2594_v22  ;;  %v3084_v3 = vunpack.c.h.s8.bf16 %v2596_v56  ;;  %v8051_v22 = vcombine.low %v8007_v9, %v8007_v9 }
 0x375   : > { %3292 = vmatprep.subr.bf16.mxu0 %v3010_v4  ;;  %3456 = vmatprep.subr.bf16.mxu1 %v3012_v5  ;;  %v2602_v4 = vld [vmem:[%s7807_s11 + $0x748] sm:$0xff]  ;;  %v2604_v5 = vld [vmem:[%s7807_s11 + $0x758] sm:$0xff] }
 0x377   : > { %3284 = vmatmul.mubr.bf16.vlgmr.msra.gmra.mrb[0].mxu0 %v8005_v8  ;;  %3448 = vmatmul.mubr.bf16.vlgmr.msra.gmra.mrb[0].mxu1 %v8005_v8 }
 0x378   : > { %3293 = vmatpush1.bf16.msra.mxu0 %v3009_v10  ;;  %3457 = vmatpush1.bf16.msra.mxu1 %v3011_v11  ;;  %v3090_v10 = vunpack.c.l.s8.bf16 %v2602_v4  ;;  %v3092_v11 = vunpack.c.l.s8.bf16 %v2604_v5 }
 0x379   : > { %3294 = vmatprep.subr.bf16.mxu0 %v3018_v13  ;;  %3458 = vmatprep.subr.bf16.mxu1 %v3020_v14  ;;  %v2601_v13 = vld [vmem:[%s7807_s11 + $0x740] sm:$0xff]  ;;  %v2603_v14 = vld [vmem:[%s7807_s11 + $0x750] sm:$0xff] }
 0x37a   : > { %3324 = vmatprep.mubr.bf16.mxu0 %v8013_v17  ;;  %3488 = vmatprep.mubr.bf16.mxu1 %v8013_v17  ;;  %v3089_v15 = vunpack.c.l.s8.bf16 %v2601_v13  ;;  %v3091_v16 = vunpack.c.l.s8.bf16 %v2603_v14  ;;  %v3097_v23 = vunpack.c.h.s8.bf16 %v2601_v13  ;;  %v3099_v24 = vunpack.c.h.s8.bf16 %v2603_v14 }
 0x37c   : > { %3295 = vmatpush1.bf16.msra.mxu0 %v3017_v32  ;;  %3459 = vmatpush1.bf16.msra.mxu1 %v3019_v18  ;;  %v3098_v32 = vunpack.c.h.s8.bf16 %v2602_v4  ;;  %v3100_v18 = vunpack.c.h.s8.bf16 %v2604_v5 }
 0x37d   : > { %3296 = vmatprep.subr.bf16.mxu0 %v3026_v19  ;;  %3460 = vmatprep.subr.bf16.mxu1 %v3028_v20  ;;  %v2610_v19 = vld [vmem:[%s7807_s11 + $0x788] sm:$0xff]  ;;  %v2612_v20 = vld [vmem:[%s7807_s11 + $0x798] sm:$0xff] }
 0x380   : > { %3297 = vmatpush1.bf16.msra.mxu0 %v3025_v25  ;;  %3461 = vmatpush1.bf16.msra.mxu1 %v3027_v26  ;;  %v3106_v25 = vunpack.c.l.s8.bf16 %v2610_v19  ;;  %v3108_v26 = vunpack.c.l.s8.bf16 %v2612_v20 }
 0x381   : > { %3298 = vmatprep.subr.bf16.mxu0 %v3034_v27  ;;  %3462 = vmatprep.subr.bf16.mxu1 %v3036_v28  ;;  %v2609_v27 = vld [vmem:[%s7807_s11 + $0x780] sm:$0xff]  ;;  %v2611_v28 = vld [vmem:[%s7807_s11 + $0x790] sm:$0xff] }
 0x382   : > { %v3105_v29 = vunpack.c.l.s8.bf16 %v2609_v27  ;;  %v3107_v30 = vunpack.c.l.s8.bf16 %v2611_v28  ;;  %v3113_v37 = vunpack.c.h.s8.bf16 %v2609_v27  ;;  %v3115_v38 = vunpack.c.h.s8.bf16 %v2611_v28 }
 0x384   : > { %3299 = vmatpush1.bf16.msra.mxu0 %v3033_v33  ;;  %3463 = vmatpush1.bf16.msra.mxu1 %v3035_v34  ;;  %v3114_v33 = vunpack.c.h.s8.bf16 %v2610_v19  ;;  %v3116_v34 = vunpack.c.h.s8.bf16 %v2612_v20 }
 0x385   : > { %3300 = vmatprep.subr.bf16.mxu0 %v3042_v35  ;;  %3464 = vmatprep.subr.bf16.mxu1 %v3044_v36  ;;  %v2618_v35 = vld [vmem:[%s7807_s11 + $0x7c8] sm:$0xff]  ;;  %v2620_v36 = vld [vmem:[%s7807_s11 + $0x7d8] sm:$0xff] }
 0x388   : > { %3301 = vmatpush1.bf16.msra.mxu0 %v3041_v54  ;;  %3465 = vmatpush1.bf16.msra.mxu1 %v3043_v40  ;;  %v3122_v54 = vunpack.c.l.s8.bf16 %v2618_v35  ;;  %v3124_v40 = vunpack.c.l.s8.bf16 %v2620_v36 }
 0x389   : > { %3302 = vmatprep.subr.bf16.mxu0 %v3050_v41  ;;  %3466 = vmatprep.subr.bf16.mxu1 %v3052_v21  ;;  %v2617_v41 = vld [vmem:[%s7807_s11 + $0x7c0] sm:$0xff]  ;;  %v2619_v21 = vld [vmem:[%s7807_s11 + $0x7d0] sm:$0xff] }
 0x38a   : > { %v3121_v42 = vunpack.c.l.s8.bf16 %v2617_v41  ;;  %v3123_v43 = vunpack.c.l.s8.bf16 %v2619_v21  ;;  %v3129_v49 = vunpack.c.h.s8.bf16 %v2617_v41  ;;  %v3131_v50 = vunpack.c.h.s8.bf16 %v2619_v21 }
 0x38c   : > { %3303 = vmatpush1.bf16.msra.mxu0 %v3049_v45  ;;  %3467 = vmatpush1.bf16.msra.mxu1 %v3051_v46  ;;  %v3130_v45 = vunpack.c.h.s8.bf16 %v2618_v35  ;;  %v3132_v46 = vunpack.c.h.s8.bf16 %v2620_v36 }
 0x38d   : > { %3304 = vmatprep.subr.bf16.mxu0 %v3058_v47  ;;  %3468 = vmatprep.subr.bf16.mxu1 %v3060_v12  ;;  %v2374_v47 = vld [vmem:[%s7807_s11 + $0x28] sm:$0xff]  ;;  %v2376_v12 = vld [vmem:[%s7807_s11 + $0x38] sm:$0xff] }
 0x390   : > { %3305 = vmatpush1.bf16.msra.mxu0 %v3057_v51  ;;  %3469 = vmatpush1.bf16.msra.mxu1 %v3059_v57  ;;  %v2630_v51 = vunpack.c.l.s8.bf16 %v2374_v47  ;;  %v2632_v57 = vunpack.c.l.s8.bf16 %v2376_v12 }
 0x391   : > { %3306 = vmatprep.subr.bf16.mxu0 %v3066_v52  ;;  %3470 = vmatprep.subr.bf16.mxu1 %v3068_v53  ;;  %v2373_v52 = vld [vmem:[%s7807_s11 + $0x20] sm:$0xff]  ;;  %v2375_v53 = vld [vmem:[%s7807_s11 + $0x30] sm:$0xff] }
 0x392   : > { %v2629_v56 = vunpack.c.l.s8.bf16 %v2373_v52  ;;  %v2637_v9 = vunpack.c.h.s8.bf16 %v2373_v52  ;;  %v2639_v63 = vunpack.c.h.s8.bf16 %v2375_v53 }
 0x394   : > { %3307 = vmatpush1.bf16.msra.mxu0 %v3065_v58  ;;  %3471 = vmatpush1.bf16.msra.mxu1 %v3067_v59  ;;  %v2631_v58 = vunpack.c.l.s8.bf16 %v2375_v53  ;;  %v2638_v59 = vunpack.c.h.s8.bf16 %v2374_v47 }
 0x395   : > { %3308 = vmatprep.subr.bf16.mxu0 %v3074_v60  ;;  %3472 = vmatprep.subr.bf16.mxu1 %v3076_v61  ;;  %v2640_v60 = vunpack.c.h.s8.bf16 %v2376_v12  ;;  %v2382_v61 = vld [vmem:[%s7807_s11 + $0x68] sm:$0xff] }
 0x398   : > { %3309 = vmatpush1.bf16.msra.mxu0 %v3073_v0  ;;  %3473 = vmatpush1.bf16.msra.mxu1 %v3075_v1  ;;  %v2646_v0 = vunpack.c.l.s8.bf16 %v2382_v61  ;;  %v2648_v1 = vunpack.c.l.s8.bf16 %v2384_v44 }
 0x399   : > { %3310 = vmatprep.subr.bf16.mxu0 %v3082_v2  ;;  %3474 = vmatprep.subr.bf16.mxu1 %v3084_v3  ;;  %v2381_v2 = vld [vmem:[%s7807_s11 + $0x60] sm:$0xff]  ;;  %v2383_v3 = vld [vmem:[%s7807_s11 + $0x70] sm:$0xff] }
 0x39a   : > { %v2645_v4 = vunpack.c.l.s8.bf16 %v2381_v2  ;;  %v2647_v5 = vunpack.c.l.s8.bf16 %v2383_v3  ;;  %v2653_v13 = vunpack.c.h.s8.bf16 %v2381_v2  ;;  %v2655_v14 = vunpack.c.h.s8.bf16 %v2383_v3 }
 0x39c   : > { %3311 = vmatpush1.bf16.msra.mxu0 %v3081_v6  ;;  %3475 = vmatpush1.bf16.msra.mxu1 %v3083_v7  ;;  %v2654_v6 = vunpack.c.h.s8.bf16 %v2382_v61  ;;  %v2656_v7 = vunpack.c.h.s8.bf16 %v2384_v44 }
 0x39d   : > { %3312 = vmatprep.subr.bf16.mxu0 %v3090_v10  ;;  %3476 = vmatprep.subr.bf16.mxu1 %v3092_v11  ;;  %v2390_v10 = vld [vmem:[%s7807_s11 + $0xa8] sm:$0xff]  ;;  %v2392_v11 = vld [vmem:[%s7807_s11 + $0xb8] sm:$0xff] }
 0x39e   : > { %v2670_v20 = vunpack.c.h.s8.bf16 %v2390_v10 }
 0x3a0   : > { %3313 = vmatpush1.bf16.msra.mxu0 %v3089_v15  ;;  %3477 = vmatpush1.bf16.msra.mxu1 %v3091_v16  ;;  %v2664_v15 = vunpack.c.l.s8.bf16 %v2392_v11  ;;  %v2389_v16 = vld [vmem:[%s7807_s11 + $0xa0] sm:$0xff] }
 0x3a1   : > { %3314 = vmatprep.subr.bf16.mxu0 %v3098_v32  ;;  %3478 = vmatprep.subr.bf16.mxu1 %v3100_v18  ;;  %v2391_v32 = vld [vmem:[%s7807_s11 + $0xb0] sm:$0xff]  ;;  %v2661_v18 = vunpack.c.l.s8.bf16 %v2389_v16 }
 0x3a2   : > { %v2663_v19 = vunpack.c.l.s8.bf16 %v2391_v32  ;;  %v2671_v27 = vunpack.c.h.s8.bf16 %v2391_v32 }
 0x3a4   : > { %3315 = vmatpush1.bf16.msra.mxu0 %v3097_v23  ;;  %3479 = vmatpush1.bf16.msra.mxu1 %v3099_v24  ;;  %v2672_v23 = vunpack.c.h.s8.bf16 %v2392_v11  ;;  %v2398_v24 = vld [vmem:[%s7807_s11 + $0xe8] sm:$0xff] }
 0x3a5   : > { %3316 = vmatprep.subr.bf16.mxu0 %v3106_v25  ;;  %3480 = vmatprep.subr.bf16.mxu1 %v3108_v26  ;;  %v2400_v25 = vld [vmem:[%s7807_s11 + $0xf8] sm:$0xff]  ;;  %v2669_v26 = vunpack.c.h.s8.bf16 %v2389_v16  ;;  %v2678_v28 = vunpack.c.l.s8.bf16 %v2398_v24  ;;  %v2686_v36 = vunpack.c.h.s8.bf16 %v2398_v24 }
 0x3a8   : > { %3317 = vmatpush1.bf16.msra.mxu0 %v3105_v29  ;;  %3481 = vmatpush1.bf16.msra.mxu1 %v3107_v30  ;;  %v2680_v29 = vunpack.c.l.s8.bf16 %v2400_v25  ;;  %v2397_v30 = vld [vmem:[%s7807_s11 + $0xe0] sm:$0xff] }
 0x3a9   : > { %3318 = vmatprep.subr.bf16.mxu0 %v3114_v33  ;;  %3482 = vmatprep.subr.bf16.mxu1 %v3116_v34  ;;  %v2399_v33 = vld [vmem:[%s7807_s11 + $0xf0] sm:$0xff]  ;;  %v2677_v34 = vunpack.c.l.s8.bf16 %v2397_v30 }
 0x3aa   : > { %v2679_v35 = vunpack.c.l.s8.bf16 %v2399_v33  ;;  %v2687_v41 = vunpack.c.h.s8.bf16 %v2399_v33 }
 0x3ac   : > { %3319 = vmatpush1.bf16.msra.mxu0 %v3113_v37  ;;  %3483 = vmatpush1.bf16.msra.mxu1 %v3115_v38  ;;  %v2688_v37 = vunpack.c.h.s8.bf16 %v2400_v25  ;;  %v2406_v38 = vld [vmem:[%s7807_s11 + $0x128] sm:$0xff] }
 0x3ad   : > { %3320 = vmatprep.subr.bf16.mxu0 %v3122_v54  ;;  %3484 = vmatprep.subr.bf16.mxu1 %v3124_v40  ;;  %v2408_v54 = vld [vmem:[%s7807_s11 + $0x138] sm:$0xff]  ;;  %v2685_v40 = vunpack.c.h.s8.bf16 %v2397_v30  ;;  %v2694_v21 = vunpack.c.l.s8.bf16 %v2406_v38  ;;  %v2702_v12 = vunpack.c.h.s8.bf16 %v2406_v38 }
 0x3b0   : > { %3321 = vmatpush1.bf16.msra.mxu0 %v3121_v42  ;;  %3485 = vmatpush1.bf16.msra.mxu1 %v3123_v43  ;;  %v2696_v42 = vunpack.c.l.s8.bf16 %v2408_v54  ;;  %v2405_v43 = vld [vmem:[%s7807_s11 + $0x120] sm:$0xff] }
 0x3b1   : > { %3322 = vmatprep.subr.bf16.mxu0 %v3130_v45  ;;  %3486 = vmatprep.subr.bf16.mxu1 %v3132_v46  ;;  %v2407_v45 = vld [vmem:[%s7807_s11 + $0x130] sm:$0xff]  ;;  %v2693_v46 = vunpack.c.l.s8.bf16 %v2405_v43 }
 0x3b2   : > { %v2695_v47 = vunpack.c.l.s8.bf16 %v2407_v45  ;;  %v2703_v52 = vunpack.c.h.s8.bf16 %v2407_v45 }
 0x3b4   : > { %3323 = vmatpush1.bf16.msra.mxu0 %v3129_v49  ;;  %3487 = vmatpush1.bf16.msra.mxu1 %v3131_v50  ;;  %v2704_v49 = vunpack.c.h.s8.bf16 %v2408_v54  ;;  %v2414_v50 = vld [vmem:[%s7807_s11 + $0x168] sm:$0xff] }
 0x3b5   : > { %3497 = vmatprep.subr.bf16.mxu0 %v2630_v51  ;;  %3661 = vmatprep.subr.bf16.mxu1 %v2632_v57  ;;  %v2416_v51 = vld [vmem:[%s7807_s11 + $0x178] sm:$0xff]  ;;  %v2701_v57 = vunpack.c.h.s8.bf16 %v2405_v43  ;;  %v2710_v53 = vunpack.c.l.s8.bf16 %v2414_v50  ;;  %v2718_v44 = vunpack.c.h.s8.bf16 %v2414_v50 }
 0x3b7   : > { %3325 = vmatmul.mubr.bf16.vlgmr.msra.gmra.mrb[0].mxu0 %v8051_v22  ;;  %3489 = vmatmul.mubr.bf16.vlgmr.msra.gmra.mrb[0].mxu1 %v8051_v22 }
 0x3b8   : > { %3498 = vmatpush1.bf16.msra.mxu0 %v2629_v56  ;;  %3662 = vmatpush1.bf16.msra.mxu1 %v2631_v58  ;;  %v2712_v56 = vunpack.c.l.s8.bf16 %v2416_v51  ;;  %v2413_v58 = vld [vmem:[%s7807_s11 + $0x160] sm:$0xff] }
 0x3b9   : > { %3499 = vmatprep.subr.bf16.mxu0 %v2638_v59  ;;  %3663 = vmatprep.subr.bf16.mxu1 %v2640_v60  ;;  %v2415_v59 = vld [vmem:[%s7807_s11 + $0x170] sm:$0xff]  ;;  %v2709_v60 = vunpack.c.l.s8.bf16 %v2413_v58 }
 0x3ba   : > { %3529 = vmatprep.mubr.bf16.mxu0 %v7883_v48  ;;  %3693 = vmatprep.mubr.bf16.mxu1 %v7883_v48  ;;  %v2662_v48 = vunpack.c.l.s8.bf16 %v2390_v10  ;;  %v2711_v61 = vunpack.c.l.s8.bf16 %v2415_v59  ;;  %v2719_v2 = vunpack.c.h.s8.bf16 %v2415_v59  ;;  %v2453_v59 = vld [vmem:[%s7807_s11 + $0x2a0] sm:$0xff] }
 0x3bc   : > { %3500 = vmatpush1.bf16.msra.mxu0 %v2637_v9  ;;  %3664 = vmatpush1.bf16.msra.mxu1 %v2639_v63  ;;  %v2720_v9 = vunpack.c.h.s8.bf16 %v2416_v51  ;;  %v2422_v63 = vld [vmem:[%s7807_s11 + $0x1a8] sm:$0xff] }
 0x3bd   : > { %3501 = vmatprep.subr.bf16.mxu0 %v2646_v0  ;;  %3665 = vmatprep.subr.bf16.mxu1 %v2648_v1  ;;  %v2424_v0 = vld [vmem:[%s7807_s11 + $0x1b8] sm:$0xff]  ;;  %v2717_v1 = vunpack.c.h.s8.bf16 %v2413_v58  ;;  %v2726_v3 = vunpack.c.l.s8.bf16 %v2422_v63  ;;  %v2734_v11 = vunpack.c.h.s8.bf16 %v2422_v63 }
 0x3c0   : > { %3502 = vmatpush1.bf16.msra.mxu0 %v2645_v4  ;;  %3666 = vmatpush1.bf16.msra.mxu1 %v2647_v5  ;;  %v2728_v4 = vunpack.c.l.s8.bf16 %v2424_v0  ;;  %v2421_v5 = vld [vmem:[%s7807_s11 + $0x1a0] sm:$0xff] }
 0x3c1   : > { %3503 = vmatprep.subr.bf16.mxu0 %v2654_v6  ;;  %3667 = vmatprep.subr.bf16.mxu1 %v2656_v7  ;;  %v2423_v6 = vld [vmem:[%s7807_s11 + $0x1b0] sm:$0xff]  ;;  %v2725_v7 = vunpack.c.l.s8.bf16 %v2421_v5 }
 0x3c2   : > { %v2727_v10 = vunpack.c.l.s8.bf16 %v2423_v6  ;;  %v2735_v16 = vunpack.c.h.s8.bf16 %v2423_v6  ;;  %v2461_v6 = vld [vmem:[%s7807_s11 + $0x2e0] sm:$0xff] }
 0x3c4   : > { %3504 = vmatpush1.bf16.msra.mxu0 %v2653_v13  ;;  %3668 = vmatpush1.bf16.msra.mxu1 %v2655_v14  ;;  %v2736_v13 = vunpack.c.h.s8.bf16 %v2424_v0  ;;  %v2430_v14 = vld [vmem:[%s7807_s11 + $0x1e8] sm:$0xff] }
 0x3c5   : > { %3505 = vmatprep.subr.bf16.mxu0 %v2662_v48  ;;  %3669 = vmatprep.subr.bf16.mxu1 %v2664_v15  ;;  %v2432_v48 = vld [vmem:[%s7807_s11 + $0x1f8] sm:$0xff]  ;;  %v2733_v15 = vunpack.c.h.s8.bf16 %v2421_v5  ;;  %v2742_v32 = vunpack.c.l.s8.bf16 %v2430_v14  ;;  %v2750_v25 = vunpack.c.h.s8.bf16 %v2430_v14  ;;  %v2462_v0 = vld [vmem:[%s7807_s11 + $0x2e8] sm:$0xff] }
 0x3c8   : > { %3506 = vmatpush1.bf16.msra.mxu0 %v2661_v18  ;;  %3670 = vmatpush1.bf16.msra.mxu1 %v2663_v19  ;;  %v2744_v18 = vunpack.c.l.s8.bf16 %v2432_v48  ;;  %v2429_v19 = vld [vmem:[%s7807_s11 + $0x1e0] sm:$0xff] }
 0x3c9   : > { %3507 = vmatprep.subr.bf16.mxu0 %v2670_v20  ;;  %3671 = vmatprep.subr.bf16.mxu1 %v2672_v23  ;;  %v2431_v20 = vld [vmem:[%s7807_s11 + $0x1f0] sm:$0xff]  ;;  %v2741_v23 = vunpack.c.l.s8.bf16 %v2429_v19 }
 0x3ca   : > { %v2743_v24 = vunpack.c.l.s8.bf16 %v2431_v20  ;;  %v2751_v30 = vunpack.c.h.s8.bf16 %v2431_v20  ;;  %v2469_v20 = vld [vmem:[%s7807_s11 + $0x320] sm:$0xff] }
 0x3cc   : > { %3508 = vmatpush1.bf16.msra.mxu0 %v2669_v26  ;;  %3672 = vmatpush1.bf16.msra.mxu1 %v2671_v27  ;;  %v2752_v26 = vunpack.c.h.s8.bf16 %v2432_v48  ;;  %v2438_v27 = vld [vmem:[%s7807_s11 + $0x228] sm:$0xff] }
 0x3cd   : > { %3509 = vmatprep.subr.bf16.mxu0 %v2678_v28  ;;  %3673 = vmatprep.subr.bf16.mxu1 %v2680_v29  ;;  %v2440_v28 = vld [vmem:[%s7807_s11 + $0x238] sm:$0xff]  ;;  %v2749_v29 = vunpack.c.h.s8.bf16 %v2429_v19  ;;  %v2758_v33 = vunpack.c.l.s8.bf16 %v2438_v27  ;;  %v2766_v54 = vunpack.c.h.s8.bf16 %v2438_v27  ;;  %v2470_v48 = vld [vmem:[%s7807_s11 + $0x328] sm:$0xff] }
 0x3d0   : > { %3510 = vmatpush1.bf16.msra.mxu0 %v2677_v34  ;;  %3674 = vmatpush1.bf16.msra.mxu1 %v2679_v35  ;;  %v2760_v34 = vunpack.c.l.s8.bf16 %v2440_v28  ;;  %v2437_v35 = vld [vmem:[%s7807_s11 + $0x220] sm:$0xff] }
 0x3d1   : > { %3511 = vmatprep.subr.bf16.mxu0 %v2686_v36  ;;  %3675 = vmatprep.subr.bf16.mxu1 %v2688_v37  ;;  %v2439_v36 = vld [vmem:[%s7807_s11 + $0x230] sm:$0xff]  ;;  %v2757_v37 = vunpack.c.l.s8.bf16 %v2437_v35 }
 0x3d2   : > { %v2759_v38 = vunpack.c.l.s8.bf16 %v2439_v36  ;;  %v2767_v43 = vunpack.c.h.s8.bf16 %v2439_v36  ;;  %v2477_v36 = vld [vmem:[%s7807_s11 + $0x360] sm:$0xff] }
 0x3d4   : > { %3512 = vmatpush1.bf16.msra.mxu0 %v2685_v40  ;;  %3676 = vmatpush1.bf16.msra.mxu1 %v2687_v41  ;;  %v2768_v40 = vunpack.c.h.s8.bf16 %v2440_v28  ;;  %v2446_v41 = vld [vmem:[%s7807_s11 + $0x268] sm:$0xff] }
 0x3d5   : > { %3513 = vmatprep.subr.bf16.mxu0 %v2694_v21  ;;  %3677 = vmatprep.subr.bf16.mxu1 %v2696_v42  ;;  %v2448_v21 = vld [vmem:[%s7807_s11 + $0x278] sm:$0xff]  ;;  %v2765_v42 = vunpack.c.h.s8.bf16 %v2437_v35  ;;  %v2774_v45 = vunpack.c.l.s8.bf16 %v2446_v41  ;;  %v2782_v50 = vunpack.c.h.s8.bf16 %v2446_v41  ;;  %v2478_v28 = vld [vmem:[%s7807_s11 + $0x368] sm:$0xff] }
 0x3d6   : > { %v2784_v51 = vunpack.c.h.s8.bf16 %v2448_v21 }
 0x3d8   : > { %3514 = vmatpush1.bf16.msra.mxu0 %v2693_v46  ;;  %3678 = vmatpush1.bf16.msra.mxu1 %v2695_v47  ;;  %v2776_v46 = vunpack.c.l.s8.bf16 %v2448_v21  ;;  %v2445_v47 = vld [vmem:[%s7807_s11 + $0x260] sm:$0xff]  ;;  %v2486_v21 = vld [vmem:[%s7807_s11 + $0x3a8] sm:$0xff] }
 0x3d9   : > { %3515 = vmatprep.subr.bf16.mxu0 %v2702_v12  ;;  %3679 = vmatprep.subr.bf16.mxu1 %v2704_v49  ;;  %v2447_v12 = vld [vmem:[%s7807_s11 + $0x270] sm:$0xff]  ;;  %v2773_v49 = vunpack.c.l.s8.bf16 %v2445_v47 }
 0x3dc   : > { %3516 = vmatpush1.bf16.msra.mxu0 %v2701_v57  ;;  %3680 = vmatpush1.bf16.msra.mxu1 %v2703_v52  ;;  %v2454_v57 = vld [vmem:[%s7807_s11 + $0x2a8] sm:$0xff]  ;;  %v2456_v52 = vld [vmem:[%s7807_s11 + $0x2b8] sm:$0xff] }
 0x3dd   : > { %3517 = vmatprep.subr.bf16.mxu0 %v2710_v53  ;;  %3681 = vmatprep.subr.bf16.mxu1 %v2712_v56  ;;  %v2781_v53 = vunpack.c.h.s8.bf16 %v2445_v47  ;;  %v2783_v56 = vunpack.c.h.s8.bf16 %v2447_v12  ;;  %v2792_v58 = vunpack.c.l.s8.bf16 %v2456_v52  ;;  %v2800_v63 = vunpack.c.h.s8.bf16 %v2456_v52  ;;  %v2494_v52 = vld [vmem:[%s7807_s11 + $0x3e8] sm:$0xff] }
 0x3e0   : > { %3518 = vmatpush1.bf16.msra.mxu0 %v2709_v60  ;;  %3682 = vmatpush1.bf16.msra.mxu1 %v2711_v61  ;;  %v2455_v60 = vld [vmem:[%s7807_s11 + $0x2b0] sm:$0xff]  ;;  %v2789_v61 = vunpack.c.l.s8.bf16 %v2453_v59 }
 0x3e1   : > { %3519 = vmatprep.subr.bf16.mxu0 %v2718_v44  ;;  %3683 = vmatprep.subr.bf16.mxu1 %v2720_v9  ;;  %v2791_v44 = vunpack.c.l.s8.bf16 %v2455_v60  ;;  %v2798_v9 = vunpack.c.h.s8.bf16 %v2454_v57 }
 0x3e4   : > { %3520 = vmatpush1.bf16.msra.mxu0 %v2717_v1  ;;  %3684 = vmatpush1.bf16.msra.mxu1 %v2719_v2  ;;  %v2464_v1 = vld [vmem:[%s7807_s11 + $0x2f8] sm:$0xff]  ;;  %v2797_v2 = vunpack.c.h.s8.bf16 %v2453_v59 }
 0x3e5   : > { %3521 = vmatprep.subr.bf16.mxu0 %v2726_v3  ;;  %3685 = vmatprep.subr.bf16.mxu1 %v2728_v4  ;;  %v2799_v3 = vunpack.c.h.s8.bf16 %v2455_v60  ;;  %v2806_v4 = vunpack.c.l.s8.bf16 %v2462_v0  ;;  %v2808_v5 = vunpack.c.l.s8.bf16 %v2464_v1  ;;  %v2816_v14 = vunpack.c.h.s8.bf16 %v2464_v1  ;;  %v2493_v60 = vld [vmem:[%s7807_s11 + $0x3e0] sm:$0xff]  ;;  %v2502_v1 = vld [vmem:[%s7807_s11 + $0x428] sm:$0xff] }
 0x3e8   : > { %3522 = vmatpush1.bf16.msra.mxu0 %v2725_v7  ;;  %3686 = vmatpush1.bf16.msra.mxu1 %v2727_v10  ;;  %v2463_v7 = vld [vmem:[%s7807_s11 + $0x2f0] sm:$0xff]  ;;  %v2805_v10 = vunpack.c.l.s8.bf16 %v2461_v6 }
 0x3e9   : > { %3523 = vmatprep.subr.bf16.mxu0 %v2734_v11  ;;  %3687 = vmatprep.subr.bf16.mxu1 %v2736_v13  ;;  %v2807_v11 = vunpack.c.l.s8.bf16 %v2463_v7  ;;  %v2814_v13 = vunpack.c.h.s8.bf16 %v2462_v0 }
 0x3ec   : > { %3524 = vmatpush1.bf16.msra.mxu0 %v2733_v15  ;;  %3688 = vmatpush1.bf16.msra.mxu1 %v2735_v16  ;;  %v2472_v15 = vld [vmem:[%s7807_s11 + $0x338] sm:$0xff]  ;;  %v2813_v16 = vunpack.c.h.s8.bf16 %v2461_v6 }
 0x3ed   : > { %3525 = vmatprep.subr.bf16.mxu0 %v2742_v32  ;;  %3689 = vmatprep.subr.bf16.mxu1 %v2744_v18  ;;  %v2815_v32 = vunpack.c.h.s8.bf16 %v2463_v7  ;;  %v2822_v18 = vunpack.c.l.s8.bf16 %v2470_v48  ;;  %v2824_v19 = vunpack.c.l.s8.bf16 %v2472_v15  ;;  %v2832_v27 = vunpack.c.h.s8.bf16 %v2472_v15  ;;  %v2501_v7 = vld [vmem:[%s7807_s11 + $0x420] sm:$0xff]  ;;  %v2510_v15 = vld [vmem:[%s7807_s11 + $0x468] sm:$0xff] }
 0x3f0   : > { %3526 = vmatpush1.bf16.msra.mxu0 %v2741_v23  ;;  %3690 = vmatpush1.bf16.msra.mxu1 %v2743_v24  ;;  %v2471_v23 = vld [vmem:[%s7807_s11 + $0x330] sm:$0xff]  ;;  %v2821_v24 = vunpack.c.l.s8.bf16 %v2469_v20 }
 0x3f1   : > { %3527 = vmatprep.subr.bf16.mxu0 %v2750_v25  ;;  %3691 = vmatprep.subr.bf16.mxu1 %v2752_v26  ;;  %v2823_v25 = vunpack.c.l.s8.bf16 %v2471_v23  ;;  %v2830_v26 = vunpack.c.h.s8.bf16 %v2470_v48 }
 0x3f4   : > { %3528 = vmatpush1.bf16.msra.mxu0 %v2749_v29  ;;  %3692 = vmatpush1.bf16.msra.mxu1 %v2751_v30  ;;  %v2480_v29 = vld [vmem:[%s7807_s11 + $0x378] sm:$0xff]  ;;  %v2829_v30 = vunpack.c.h.s8.bf16 %v2469_v20 }
 0x3f5   : > { %3538 = vmatprep.subr.bf16.mxu0 %v2758_v33  ;;  %3702 = vmatprep.subr.bf16.mxu1 %v2760_v34  ;;  %v2831_v33 = vunpack.c.h.s8.bf16 %v2471_v23  ;;  %v2838_v34 = vunpack.c.l.s8.bf16 %v2478_v28  ;;  %v2840_v35 = vunpack.c.l.s8.bf16 %v2480_v29  ;;  %v2848_v41 = vunpack.c.h.s8.bf16 %v2480_v29  ;;  %v2509_v23 = vld [vmem:[%s7807_s11 + $0x460] sm:$0xff]  ;;  %v2520_v29 = vld [vmem:[%s7807_s11 + $0x4b8] sm:$0xff] }
 0x3f7   : > { %3530 = vmatmul.mubr.bf16.vlgmr.msra.gmra.mrb[4].mxu0 %v7915_v55  ;;  %3694 = vmatmul.mubr.bf16.vlgmr.msra.gmra.mrb[4].mxu1 %v7915_v55  ;;  %v2775_v55 = vunpack.c.l.s8.bf16 %v2447_v12  ;;  %v2485_v12 = vld [vmem:[%s7807_s11 + $0x3a0] sm:$0xff] }
 0x3f8   : > { %3539 = vmatpush1.bf16.msra.mxu0 %v2757_v37  ;;  %3703 = vmatpush1.bf16.msra.mxu1 %v2759_v38  ;;  %v2479_v37 = vld [vmem:[%s7807_s11 + $0x370] sm:$0xff]  ;;  %v2837_v38 = vunpack.c.l.s8.bf16 %v2477_v36 }
 0x3f9   : > { %3540 = vmatprep.subr.bf16.mxu0 %v2766_v54  ;;  %3704 = vmatprep.subr.bf16.mxu1 %v2768_v40  ;;  %v2839_v54 = vunpack.c.l.s8.bf16 %v2479_v37  ;;  %v2846_v40 = vunpack.c.h.s8.bf16 %v2478_v28  ;;  %v2518_v28 = vld [vmem:[%s7807_s11 + $0x4a8] sm:$0xff] }
 0x3fa   : > { %3570 = vmatprep.mubr.bf16.mxu0 %v7921_v62  ;;  %3734 = vmatprep.mubr.bf16.mxu1 %v7921_v62  ;;  %v2790_v62 = vunpack.c.l.s8.bf16 %v2454_v57 }
 0x3fc   : > { %3541 = vmatpush1.bf16.msra.mxu0 %v2765_v42  ;;  %3705 = vmatpush1.bf16.msra.mxu1 %v2767_v43  ;;  %v2488_v42 = vld [vmem:[%s7807_s11 + $0x3b8] sm:$0xff]  ;;  %v2845_v43 = vunpack.c.h.s8.bf16 %v2477_v36  ;;  %v2519_v36 = vld [vmem:[%s7807_s11 + $0x4b0] sm:$0xff] }
 0x3fd   : > { %3542 = vmatprep.subr.bf16.mxu0 %v2774_v45  ;;  %3706 = vmatprep.subr.bf16.mxu1 %v2776_v46  ;;  %v2847_v45 = vunpack.c.h.s8.bf16 %v2479_v37  ;;  %v2854_v46 = vunpack.c.l.s8.bf16 %v2486_v21  ;;  %v2856_v47 = vunpack.c.l.s8.bf16 %v2488_v42  ;;  %v2864_v57 = vunpack.c.h.s8.bf16 %v2488_v42 }
 0x400   : > { %3543 = vmatpush1.bf16.msra.mxu0 %v2773_v49  ;;  %3707 = vmatpush1.bf16.msra.mxu1 %v2775_v55  ;;  %v2487_v49 = vld [vmem:[%s7807_s11 + $0x3b0] sm:$0xff]  ;;  %v2853_v55 = vunpack.c.l.s8.bf16 %v2485_v12 }
 0x401   : > { %3544 = vmatprep.subr.bf16.mxu0 %v2782_v50  ;;  %3708 = vmatprep.subr.bf16.mxu1 %v2784_v51  ;;  %v2855_v50 = vunpack.c.l.s8.bf16 %v2487_v49  ;;  %v2862_v51 = vunpack.c.h.s8.bf16 %v2486_v21  ;;  %v2528_v21 = vld [vmem:[%s7807_s11 + $0x4f8] sm:$0xff] }
 0x404   : > { %3545 = vmatpush1.bf16.msra.mxu0 %v2781_v53  ;;  %3709 = vmatpush1.bf16.msra.mxu1 %v2783_v56  ;;  %v2496_v53 = vld [vmem:[%s7807_s11 + $0x3f8] sm:$0xff]  ;;  %v2861_v56 = vunpack.c.h.s8.bf16 %v2485_v12  ;;  %v2527_v12 = vld [vmem:[%s7807_s11 + $0x4f0] sm:$0xff] }
 0x405   : > { %3546 = vmatprep.subr.bf16.mxu0 %v2790_v62  ;;  %3710 = vmatprep.subr.bf16.mxu1 %v2792_v58  ;;  %v2863_v62 = vunpack.c.h.s8.bf16 %v2487_v49  ;;  %v2870_v58 = vunpack.c.l.s8.bf16 %v2494_v52  ;;  %v2872_v59 = vunpack.c.l.s8.bf16 %v2496_v53  ;;  %v2880_v0 = vunpack.c.h.s8.bf16 %v2496_v53 }
 0x408   : > { %3547 = vmatpush1.bf16.msra.mxu0 %v2789_v61  ;;  %3711 = vmatpush1.bf16.msra.mxu1 %v2791_v44  ;;  %v2495_v61 = vld [vmem:[%s7807_s11 + $0x3f0] sm:$0xff]  ;;  %v2869_v44 = vunpack.c.l.s8.bf16 %v2493_v60 }
 0x409   : > { %3548 = vmatprep.subr.bf16.mxu0 %v2798_v9  ;;  %3712 = vmatprep.subr.bf16.mxu1 %v2800_v63  ;;  %v2871_v9 = vunpack.c.l.s8.bf16 %v2495_v61  ;;  %v2878_v63 = vunpack.c.h.s8.bf16 %v2494_v52  ;;  %v2536_v52 = vld [vmem:[%s7807_s11 + $0x538] sm:$0xff] }
 0x40c   : > { %3549 = vmatpush1.bf16.msra.mxu0 %v2797_v2  ;;  %3713 = vmatpush1.bf16.msra.mxu1 %v2799_v3  ;;  %v2504_v2 = vld [vmem:[%s7807_s11 + $0x438] sm:$0xff]  ;;  %v2877_v3 = vunpack.c.h.s8.bf16 %v2493_v60  ;;  %v2535_v60 = vld [vmem:[%s7807_s11 + $0x530] sm:$0xff] }
 0x40d   : > { %3550 = vmatprep.subr.bf16.mxu0 %v2806_v4  ;;  %3714 = vmatprep.subr.bf16.mxu1 %v2808_v5  ;;  %v2879_v4 = vunpack.c.h.s8.bf16 %v2495_v61  ;;  %v2886_v5 = vunpack.c.l.s8.bf16 %v2502_v1  ;;  %v2888_v6 = vunpack.c.l.s8.bf16 %v2504_v2  ;;  %v2896_v48 = vunpack.c.h.s8.bf16 %v2504_v2 }
 0x410   : > { %3551 = vmatpush1.bf16.msra.mxu0 %v2805_v10  ;;  %3715 = vmatpush1.bf16.msra.mxu1 %v2807_v11  ;;  %v2503_v10 = vld [vmem:[%s7807_s11 + $0x430] sm:$0xff]  ;;  %v2885_v11 = vunpack.c.l.s8.bf16 %v2501_v7 }
 0x411   : > { %3552 = vmatprep.subr.bf16.mxu0 %v2814_v13  ;;  %3716 = vmatprep.subr.bf16.mxu1 %v2816_v14  ;;  %v2887_v13 = vunpack.c.l.s8.bf16 %v2503_v10  ;;  %v2894_v14 = vunpack.c.h.s8.bf16 %v2502_v1  ;;  %v2544_v1 = vld [vmem:[%s7807_s11 + $0x578] sm:$0xff] }
 0x414   : > { %3553 = vmatpush1.bf16.msra.mxu0 %v2813_v16  ;;  %3717 = vmatpush1.bf16.msra.mxu1 %v2815_v32  ;;  %v2512_v16 = vld [vmem:[%s7807_s11 + $0x478] sm:$0xff]  ;;  %v2893_v32 = vunpack.c.h.s8.bf16 %v2501_v7  ;;  %v2543_v7 = vld [vmem:[%s7807_s11 + $0x570] sm:$0xff] }
 0x415   : > { %3554 = vmatprep.subr.bf16.mxu0 %v2822_v18  ;;  %3718 = vmatprep.subr.bf16.mxu1 %v2824_v19  ;;  %v2895_v18 = vunpack.c.h.s8.bf16 %v2503_v10  ;;  %v2902_v19 = vunpack.c.l.s8.bf16 %v2510_v15  ;;  %v2904_v20 = vunpack.c.l.s8.bf16 %v2512_v16 }
 0x418   : > { %3555 = vmatpush1.bf16.msra.mxu0 %v2821_v24  ;;  %3719 = vmatpush1.bf16.msra.mxu1 %v2823_v25  ;;  %v2511_v24 = vld [vmem:[%s7807_s11 + $0x470] sm:$0xff]  ;;  %v2901_v25 = vunpack.c.l.s8.bf16 %v2509_v23 }
 0x419   : > { %3556 = vmatprep.subr.bf16.mxu0 %v2830_v26  ;;  %3720 = vmatprep.subr.bf16.mxu1 %v2832_v27  ;;  %v2910_v26 = vunpack.c.h.s8.bf16 %v2510_v15  ;;  %v2912_v27 = vunpack.c.h.s8.bf16 %v2512_v16  ;;  %v2552_v15 = vld [vmem:[%s7807_s11 + $0x5b8] sm:$0xff] }
 0x41c   : > { %3557 = vmatpush1.bf16.msra.mxu0 %v2829_v30  ;;  %3721 = vmatpush1.bf16.msra.mxu1 %v2831_v33  ;;  %v2909_v30 = vunpack.c.h.s8.bf16 %v2509_v23  ;;  %v2911_v33 = vunpack.c.h.s8.bf16 %v2511_v24  ;;  %v2551_v23 = vld [vmem:[%s7807_s11 + $0x5b0] sm:$0xff] }
 0x41d   : > { %3558 = vmatprep.subr.bf16.mxu0 %v2838_v34  ;;  %3722 = vmatprep.subr.bf16.mxu1 %v2840_v35  ;;  %v2920_v34 = vunpack.c.l.s8.bf16 %v2520_v29  ;;  %v2517_v35 = vld [vmem:[%s7807_s11 + $0x4a0] sm:$0xff] }
 0x41e   : > { %v2917_v37 = vunpack.c.l.s8.bf16 %v2517_v35  ;;  %v2925_v42 = vunpack.c.h.s8.bf16 %v2517_v35  ;;  %v2559_v35 = vld [vmem:[%s7807_s11 + $0x5f0] sm:$0xff] }
 0x420   : > { %3559 = vmatpush1.bf16.msra.mxu0 %v2837_v38  ;;  %3723 = vmatpush1.bf16.msra.mxu1 %v2839_v54  ;;  %v2919_v38 = vunpack.c.l.s8.bf16 %v2519_v36  ;;  %v2926_v54 = vunpack.c.h.s8.bf16 %v2518_v28 }
 0x421   : > { %3560 = vmatprep.subr.bf16.mxu0 %v2846_v40  ;;  %3724 = vmatprep.subr.bf16.mxu1 %v2848_v41  ;;  %v2928_v40 = vunpack.c.h.s8.bf16 %v2520_v29  ;;  %v2526_v41 = vld [vmem:[%s7807_s11 + $0x4e8] sm:$0xff] }
 0x424   : > { %3561 = vmatpush1.bf16.msra.mxu0 %v2845_v43  ;;  %3725 = vmatpush1.bf16.msra.mxu1 %v2847_v45  ;;  %v2927_v43 = vunpack.c.h.s8.bf16 %v2519_v36  ;;  %v2934_v45 = vunpack.c.l.s8.bf16 %v2526_v41 }
 0x425   : > { %3562 = vmatprep.subr.bf16.mxu0 %v2854_v46  ;;  %3726 = vmatprep.subr.bf16.mxu1 %v2856_v47  ;;  %v2936_v46 = vunpack.c.l.s8.bf16 %v2528_v21  ;;  %v2525_v47 = vld [vmem:[%s7807_s11 + $0x4e0] sm:$0xff] }
 0x426   : > { %v2933_v49 = vunpack.c.l.s8.bf16 %v2525_v47  ;;  %v2941_v53 = vunpack.c.h.s8.bf16 %v2525_v47  ;;  %v2567_v47 = vld [vmem:[%s7807_s11 + $0x630] sm:$0xff] }
 0x428   : > { %3563 = vmatpush1.bf16.msra.mxu0 %v2853_v55  ;;  %3727 = vmatpush1.bf16.msra.mxu1 %v2855_v50  ;;  %v2935_v55 = vunpack.c.l.s8.bf16 %v2527_v12  ;;  %v2942_v50 = vunpack.c.h.s8.bf16 %v2526_v41  ;;  %v2568_v41 = vld [vmem:[%s7807_s11 + $0x638] sm:$0xff] }
 0x429   : > { %3564 = vmatprep.subr.bf16.mxu0 %v2862_v51  ;;  %3728 = vmatprep.subr.bf16.mxu1 %v2864_v57  ;;  %v2944_v51 = vunpack.c.h.s8.bf16 %v2528_v21  ;;  %v2534_v57 = vld [vmem:[%s7807_s11 + $0x528] sm:$0xff] }
 0x42c   : > { %3565 = vmatpush1.bf16.msra.mxu0 %v2861_v56  ;;  %3729 = vmatpush1.bf16.msra.mxu1 %v2863_v62  ;;  %v2943_v56 = vunpack.c.h.s8.bf16 %v2527_v12  ;;  %v2950_v62 = vunpack.c.l.s8.bf16 %v2534_v57 }
 0x42d   : > { %3566 = vmatprep.subr.bf16.mxu0 %v2870_v58  ;;  %3730 = vmatprep.subr.bf16.mxu1 %v2872_v59  ;;  %v2952_v58 = vunpack.c.l.s8.bf16 %v2536_v52  ;;  %v2533_v59 = vld [vmem:[%s7807_s11 + $0x520] sm:$0xff] }
 0x42e   : > { %v2949_v61 = vunpack.c.l.s8.bf16 %v2533_v59  ;;  %v2957_v2 = vunpack.c.h.s8.bf16 %v2533_v59  ;;  %v2575_v59 = vld [vmem:[%s7807_s11 + $0x670] sm:$0xff] }
 0x430   : > { %3567 = vmatpush1.bf16.msra.mxu0 %v2869_v44  ;;  %3731 = vmatpush1.bf16.msra.mxu1 %v2871_v9  ;;  %v2951_v44 = vunpack.c.l.s8.bf16 %v2535_v60  ;;  %v2958_v9 = vunpack.c.h.s8.bf16 %v2534_v57  ;;  %v2576_v57 = vld [vmem:[%s7807_s11 + $0x678] sm:$0xff] }
 0x431   : > { %3568 = vmatprep.subr.bf16.mxu0 %v2878_v63  ;;  %3732 = vmatprep.subr.bf16.mxu1 %v2880_v0  ;;  %v2960_v63 = vunpack.c.h.s8.bf16 %v2536_v52  ;;  %v2542_v0 = vld [vmem:[%s7807_s11 + $0x568] sm:$0xff] }
 0x434   : > { %3569 = vmatpush1.bf16.msra.mxu0 %v2877_v3  ;;  %3733 = vmatpush1.bf16.msra.mxu1 %v2879_v4  ;;  %v2959_v3 = vunpack.c.h.s8.bf16 %v2535_v60  ;;  %v2966_v4 = vunpack.c.l.s8.bf16 %v2542_v0 }
 0x435   : > { %3579 = vmatprep.subr.bf16.mxu0 %v2886_v5  ;;  %3743 = vmatprep.subr.bf16.mxu1 %v2888_v6  ;;  %v2968_v5 = vunpack.c.l.s8.bf16 %v2544_v1  ;;  %v2541_v6 = vld [vmem:[%s7807_s11 + $0x560] sm:$0xff] }
 0x436   : > { %v2965_v10 = vunpack.c.l.s8.bf16 %v2541_v6  ;;  %v2973_v16 = vunpack.c.h.s8.bf16 %v2541_v6 }
 0x437   : > { %3571 = vmatmul.mubr.bf16.vlgmr.msra.gmra.mrb[4].mxu0 %v7959_v31  ;;  %3735 = vmatmul.mubr.bf16.vlgmr.msra.gmra.mrb[4].mxu1 %v7959_v31  ;;  %v2903_v31 = vunpack.c.l.s8.bf16 %v2511_v24 }
 0x438   : > { %3580 = vmatpush1.bf16.msra.mxu0 %v2885_v11  ;;  %3744 = vmatpush1.bf16.msra.mxu1 %v2887_v13  ;;  %v2967_v11 = vunpack.c.l.s8.bf16 %v2543_v7  ;;  %v2974_v13 = vunpack.c.h.s8.bf16 %v2542_v0 }
 0x439   : > { %3581 = vmatprep.subr.bf16.mxu0 %v2894_v14  ;;  %3745 = vmatprep.subr.bf16.mxu1 %v2896_v48  ;;  %v2976_v14 = vunpack.c.h.s8.bf16 %v2544_v1  ;;  %v2550_v48 = vld [vmem:[%s7807_s11 + $0x5a8] sm:$0xff]  ;;  %v3039_v1 = vunpack.c.h.s8.bf16 %v2575_v59 }
 0x43a   : > { %3611 = vmatprep.mubr.bf16.mxu0 %v7967_v39  ;;  %3775 = vmatprep.mubr.bf16.mxu1 %v7967_v39  ;;  %v2918_v39 = vunpack.c.l.s8.bf16 %v2518_v28  ;;  %v2560_v28 = vld [vmem:[%s7807_s11 + $0x5f8] sm:$0xff] }
 0x43c   : > { %3582 = vmatpush1.bf16.msra.mxu0 %v2893_v32  ;;  %3746 = vmatpush1.bf16.msra.mxu1 %v2895_v18  ;;  %v2975_v32 = vunpack.c.h.s8.bf16 %v2543_v7  ;;  %v2982_v18 = vunpack.c.l.s8.bf16 %v2550_v48 }
 0x43d   : > { %3583 = vmatprep.subr.bf16.mxu0 %v2902_v19  ;;  %3747 = vmatprep.subr.bf16.mxu1 %v2904_v20  ;;  %v2984_v19 = vunpack.c.l.s8.bf16 %v2552_v15  ;;  %v2549_v20 = vld [vmem:[%s7807_s11 + $0x5a0] sm:$0xff] }
 0x43e   : > { %v2981_v24 = vunpack.c.l.s8.bf16 %v2549_v20  ;;  %v2989_v29 = vunpack.c.h.s8.bf16 %v2549_v20 }
 0x440   : > { %3584 = vmatpush1.bf16.msra.mxu0 %v2901_v25  ;;  %3748 = vmatpush1.bf16.msra.mxu1 %v2903_v31  ;;  %v2983_v25 = vunpack.c.l.s8.bf16 %v2551_v23  ;;  %v2990_v31 = vunpack.c.h.s8.bf16 %v2550_v48 }
 0x441   : > { %3585 = vmatprep.subr.bf16.mxu0 %v2910_v26  ;;  %3749 = vmatprep.subr.bf16.mxu1 %v2912_v27  ;;  %v2992_v26 = vunpack.c.h.s8.bf16 %v2552_v15  ;;  %v2558_v27 = vld [vmem:[%s7807_s11 + $0x5e8] sm:$0xff] }
 0x444   : > { %3586 = vmatpush1.bf16.msra.mxu0 %v2909_v30  ;;  %3750 = vmatpush1.bf16.msra.mxu1 %v2911_v33  ;;  %v2991_v30 = vunpack.c.h.s8.bf16 %v2551_v23  ;;  %v2998_v33 = vunpack.c.l.s8.bf16 %v2558_v27 }
 0x445   : > { %3587 = vmatprep.subr.bf16.mxu0 %v2918_v39  ;;  %3751 = vmatprep.subr.bf16.mxu1 %v2920_v34  ;;  %v3000_v39 = vunpack.c.l.s8.bf16 %v2560_v28  ;;  %v2557_v34 = vld [vmem:[%s7807_s11 + $0x5e0] sm:$0xff] }
 0x446   : > { %v2997_v36 = vunpack.c.l.s8.bf16 %v2557_v34  ;;  %v3005_v21 = vunpack.c.h.s8.bf16 %v2557_v34  ;;  %v2600_v34 = vld [vmem:[%s7807_s11 + $0x738] sm:$0xff] }
 0x448   : > { %3588 = vmatpush1.bf16.msra.mxu0 %v2917_v37  ;;  %3752 = vmatpush1.bf16.msra.mxu1 %v2919_v38  ;;  %v2999_v37 = vunpack.c.l.s8.bf16 %v2559_v35  ;;  %v3006_v38 = vunpack.c.h.s8.bf16 %v2558_v27 }
 0x449   : > { %3589 = vmatprep.subr.bf16.mxu0 %v2926_v54  ;;  %3753 = vmatprep.subr.bf16.mxu1 %v2928_v40  ;;  %v3008_v54 = vunpack.c.h.s8.bf16 %v2560_v28  ;;  %v2566_v40 = vld [vmem:[%s7807_s11 + $0x628] sm:$0xff] }
 0x44c   : > { %3590 = vmatpush1.bf16.msra.mxu0 %v2925_v42  ;;  %3754 = vmatpush1.bf16.msra.mxu1 %v2927_v43  ;;  %v3007_v42 = vunpack.c.h.s8.bf16 %v2559_v35  ;;  %v3014_v43 = vunpack.c.l.s8.bf16 %v2566_v40 }
 0x44d   : > { %3591 = vmatprep.subr.bf16.mxu0 %v2934_v45  ;;  %3755 = vmatprep.subr.bf16.mxu1 %v2936_v46  ;;  %v3016_v45 = vunpack.c.l.s8.bf16 %v2568_v41  ;;  %v2565_v46 = vld [vmem:[%s7807_s11 + $0x620] sm:$0xff] }
 0x44e   : > { %v3013_v12 = vunpack.c.l.s8.bf16 %v2565_v46  ;;  %v3021_v52 = vunpack.c.h.s8.bf16 %v2565_v46  ;;  %v2608_v46 = vld [vmem:[%s7807_s11 + $0x778] sm:$0xff] }
 0x450   : > { %3592 = vmatpush1.bf16.msra.mxu0 %v2933_v49  ;;  %3756 = vmatpush1.bf16.msra.mxu1 %v2935_v55  ;;  %v3015_v49 = vunpack.c.l.s8.bf16 %v2567_v47  ;;  %v3022_v55 = vunpack.c.h.s8.bf16 %v2566_v40  ;;  %v2599_v40 = vld [vmem:[%s7807_s11 + $0x730] sm:$0xff] }
 0x451   : > { %3593 = vmatprep.subr.bf16.mxu0 %v2942_v50  ;;  %3757 = vmatprep.subr.bf16.mxu1 %v2944_v51  ;;  %v3024_v50 = vunpack.c.h.s8.bf16 %v2568_v41  ;;  %v2574_v51 = vld [vmem:[%s7807_s11 + $0x668] sm:$0xff] }
 0x454   : > { %3594 = vmatpush1.bf16.msra.mxu0 %v2941_v53  ;;  %3758 = vmatpush1.bf16.msra.mxu1 %v2943_v56  ;;  %v3023_v53 = vunpack.c.h.s8.bf16 %v2567_v47  ;;  %v3030_v56 = vunpack.c.l.s8.bf16 %v2574_v51 }
 0x455   : > { %3595 = vmatprep.subr.bf16.mxu0 %v2950_v62  ;;  %3759 = vmatprep.subr.bf16.mxu1 %v2952_v58  ;;  %v3032_v62 = vunpack.c.l.s8.bf16 %v2576_v57  ;;  %v2573_v58 = vld [vmem:[%s7807_s11 + $0x660] sm:$0xff] }
 0x456   : > { %v3029_v60 = vunpack.c.l.s8.bf16 %v2573_v58  ;;  %v3037_v0 = vunpack.c.h.s8.bf16 %v2573_v58 }
 0x458   : > { %3596 = vmatpush1.bf16.msra.mxu0 %v2949_v61  ;;  %3760 = vmatpush1.bf16.msra.mxu1 %v2951_v44  ;;  %v3038_v61 = vunpack.c.h.s8.bf16 %v2574_v51  ;;  %v3040_v44 = vunpack.c.h.s8.bf16 %v2576_v57  ;;  %v2607_v51 = vld [vmem:[%s7807_s11 + $0x770] sm:$0xff]  ;;  %v3830_v57 = vlaneseq }
 0x459   : > { %3597 = vmatprep.subr.bf16.mxu0 %v2958_v9  ;;  %3761 = vmatprep.subr.bf16.mxu1 %v2960_v63  ;;  %v2582_v9 = vld [vmem:[%s7807_s11 + $0x6a8] sm:$0xff]  ;;  %v2584_v63 = vld [vmem:[%s7807_s11 + $0x6b8] sm:$0xff] }
 0x45a   : > { %v3054_v7 = vunpack.c.h.s8.bf16 %v2582_v9  ;;  %v8193_v58 = vshrl.u32 %v3830_v57, 7  ;;  %v6896_v57 = vld [vmem:[%s7813_s17 + $0x244] ss:$16 sps:$4 sm:$0xff]  }
 0x45c   : > { %3598 = vmatpush1.bf16.msra.mxu0 %v2957_v2  ;;  %3762 = vmatpush1.bf16.msra.mxu1 %v2959_v3  ;;  %v3048_v2 = vunpack.c.l.s8.bf16 %v2584_v63  ;;  %v2581_v3 = vld [vmem:[%s7807_s11 + $0x6a0] sm:$0xff] }
 0x45d   : > { %3599 = vmatprep.subr.bf16.mxu0 %v2966_v4  ;;  %3763 = vmatprep.subr.bf16.mxu1 %v2968_v5  ;;  %v2583_v4 = vld [vmem:[%s7807_s11 + $0x6b0] sm:$0xff]  ;;  %v3045_v5 = vunpack.c.l.s8.bf16 %v2581_v3 }
 0x45e   : > { %v3047_v6 = vunpack.c.l.s8.bf16 %v2583_v4  ;;  %v3055_v48 = vunpack.c.h.s8.bf16 %v2583_v4  ;;  %v8205_v4 = vsub.s32 1, %v8193_v58 }
 0x460   : > { %3600 = vmatpush1.bf16.msra.mxu0 %v2965_v10  ;;  %3764 = vmatpush1.bf16.msra.mxu1 %v2967_v11  ;;  %v3056_v10 = vunpack.c.h.s8.bf16 %v2584_v63  ;;  %v2590_v11 = vld [vmem:[%s7807_s11 + $0x6e8] sm:$0xff] }
 0x461   : > { %3601 = vmatprep.subr.bf16.mxu0 %v2974_v13  ;;  %3765 = vmatprep.subr.bf16.mxu1 %v2976_v14  ;;  %v2592_v13 = vld [vmem:[%s7807_s11 + $0x6f8] sm:$0xff]  ;;  %v3053_v14 = vunpack.c.h.s8.bf16 %v2581_v3  ;;  %v3062_v15 = vunpack.c.l.s8.bf16 %v2590_v11 }
 0x462   : > { %v3878_v3 = vld [vmem:[%s7815_s29] ss:$8 sm:$0xf] }
 0x464   : > { %3602 = vmatpush1.bf16.msra.mxu0 %v2973_v16  ;;  %3766 = vmatpush1.bf16.msra.mxu1 %v2975_v32  ;;  %v3064_v16 = vunpack.c.l.s8.bf16 %v2592_v13  ;;  %v2589_v32 = vld [vmem:[%s7807_s11 + $0x6e0] sm:$0xff] }
 0x465   : > { %3603 = vmatprep.subr.bf16.mxu0 %v2982_v18  ;;  %3767 = vmatprep.subr.bf16.mxu1 %v2984_v19  ;;  %v2591_v18 = vld [vmem:[%s7807_s11 + $0x6f0] sm:$0xff]  ;;  %v3069_v35 = vunpack.c.h.s8.bf16 %v2589_v32 }
 0x466   : > { %v3063_v27 = vunpack.c.l.s8.bf16 %v2591_v18 }
 0x468   : > { %3604 = vmatpush1.bf16.msra.mxu0 %v2981_v24  ;;  %3768 = vmatpush1.bf16.msra.mxu1 %v2983_v25 }
 0x469   : > { %3605 = vmatprep.subr.bf16.mxu0 %v2990_v31  ;;  %3769 = vmatprep.subr.bf16.mxu1 %v2992_v26  ;;  %v3061_v26 = vunpack.c.l.s8.bf16 %v2589_v32 }
 0x46c   : > { %3606 = vmatpush1.bf16.msra.mxu0 %v2989_v29  ;;  %3770 = vmatpush1.bf16.msra.mxu1 %v2991_v30  ;;  %v3070_v30 = vunpack.c.h.s8.bf16 %v2590_v11 }
 0x46d   : > { %3607 = vmatprep.subr.bf16.mxu0 %v2998_v33  ;;  %3771 = vmatprep.subr.bf16.mxu1 %v3000_v39  ;;  %v3072_v33 = vunpack.c.h.s8.bf16 %v2592_v13  ;;  %v2598_v39 = vld [vmem:[%s7807_s11 + $0x728] sm:$0xff] }
 0x470   : > { %3608 = vmatpush1.bf16.msra.mxu0 %v2997_v36  ;;  %3772 = vmatpush1.bf16.msra.mxu1 %v2999_v37  ;;  %v3071_v36 = vunpack.c.h.s8.bf16 %v2591_v18  ;;  %v3078_v37 = vunpack.c.l.s8.bf16 %v2598_v39 }
 0x471   : > { %3609 = vmatprep.subr.bf16.mxu0 %v3006_v38  ;;  %3773 = vmatprep.subr.bf16.mxu1 %v3008_v54  ;;  %v3080_v38 = vunpack.c.l.s8.bf16 %v2600_v34  ;;  %v2597_v54 = vld [vmem:[%s7807_s11 + $0x720] sm:$0xff] }
 0x472   : > { %v3077_v41 = vunpack.c.l.s8.bf16 %v2597_v54  ;;  %v3085_v47 = vunpack.c.h.s8.bf16 %v2597_v54 }
 0x474   : > { %3610 = vmatpush1.bf16.msra.mxu0 %v3005_v21  ;;  %3774 = vmatpush1.bf16.msra.mxu1 %v3007_v42  ;;  %v3079_v21 = vunpack.c.l.s8.bf16 %v2599_v40  ;;  %v3086_v42 = vunpack.c.h.s8.bf16 %v2598_v39 }
 0x475   : > { %3620 = vmatprep.subr.bf16.mxu0 %v3014_v43  ;;  %3784 = vmatprep.subr.bf16.mxu1 %v3016_v45  ;;  %v3088_v43 = vunpack.c.h.s8.bf16 %v2600_v34  ;;  %v2606_v45 = vld [vmem:[%s7807_s11 + $0x768] sm:$0xff] }
 0x477   : > { %3612 = vmatmul.mubr.bf16.vlgmr.msra.gmra.mrb[4].mxu0 %v8005_v8  ;;  %3776 = vmatmul.mubr.bf16.vlgmr.msra.gmra.mrb[4].mxu1 %v8005_v8  ;;  %v3031_v8 = vunpack.c.l.s8.bf16 %v2575_v59  ;;  %v2614_v59 = vld [vmem:[%s7807_s11 + $0x7a8] sm:$0xff] }
 0x478   : > { %3621 = vmatpush1.bf16.msra.mxu0 %v3013_v12  ;;  %3785 = vmatpush1.bf16.msra.mxu1 %v3015_v49  ;;  %v3087_v12 = vunpack.c.h.s8.bf16 %v2599_v40  ;;  %v3094_v49 = vunpack.c.l.s8.bf16 %v2606_v45  ;;  %v3110_v63 = vunpack.c.l.s8.bf16 %v2614_v59  ;;  %v3118_v11 = vunpack.c.h.s8.bf16 %v2614_v59  ;;  %v6881_v40 = vld [vmem:[%s7813_s17 + $0x4] ss:$16 sps:$4 sm:$0xff]   ;;  %v6900_v59 = vld [vmem:[%s7813_s17 + $0x260] ss:$16 sps:$4 sm:$0xff]  }
 0x479   : > { %3622 = vmatprep.subr.bf16.mxu0 %v3022_v55  ;;  %3786 = vmatprep.subr.bf16.mxu1 %v3024_v50  ;;  %v3096_v55 = vunpack.c.l.s8.bf16 %v2608_v46  ;;  %v2605_v50 = vld [vmem:[%s7807_s11 + $0x760] sm:$0xff] }
 0x47a   : > { %3652 = vmatprep.mubr.bf16.mxu0 %v8013_v17  ;;  %3816 = vmatprep.mubr.bf16.mxu1 %v8013_v17  ;;  %v3046_v17 = vunpack.c.l.s8.bf16 %v2582_v9  ;;  %v3103_v9 = vunpack.c.h.s8.bf16 %v2607_v51 }
 0x47c   : > { %3623 = vmatpush1.bf16.msra.mxu0 %v3021_v52  ;;  %3787 = vmatpush1.bf16.msra.mxu1 %v3023_v53  ;;  %v3093_v52 = vunpack.c.l.s8.bf16 %v2605_v50  ;;  %v3095_v53 = vunpack.c.l.s8.bf16 %v2607_v51  ;;  %v6893_v51 = vld [vmem:[%s7813_s17 + $0x44] ss:$16 sps:$4 sm:$0xff]  }
 0x47d   : > { %3624 = vmatprep.subr.bf16.mxu0 %v3030_v56  ;;  %3788 = vmatprep.subr.bf16.mxu1 %v3032_v62  ;;  %v3102_v56 = vunpack.c.h.s8.bf16 %v2606_v45  ;;  %v3104_v62 = vunpack.c.h.s8.bf16 %v2608_v46  ;;  %v6882_v45 = vld [vmem:[%s7813_s17 + $0x200] ss:$16 sps:$4 sm:$0xff]  }
 0x480   : > { %3625 = vmatpush1.bf16.msra.mxu0 %v3029_v60  ;;  %3789 = vmatpush1.bf16.msra.mxu1 %v3031_v8  ;;  %v2616_v60 = vld [vmem:[%s7807_s11 + $0x7b8] sm:$0xff] }
 0x481   : > { %3626 = vmatprep.subr.bf16.mxu0 %v3038_v61  ;;  %3790 = vmatprep.subr.bf16.mxu1 %v3040_v44  ;;  %v6436_v8 = vld [vmem:[%s7815_s29 + $0x1] ss:$8 sm:$0xf]  ;;  %v3101_v44 = vunpack.c.h.s8.bf16 %v2605_v50  ;;  %v3120_v13 = vunpack.c.h.s8.bf16 %v2616_v60 }
 0x482   : > { %v6437_v61 = vld [vmem:[%s7815_s29 + $0x1] ss:$8 sm:$0xf0] }
 0x483   : > { %v6888_v50 = vld [vmem:[%s7813_s17 + $0x220] ss:$16 sps:$4 sm:$0xff]  }
 0x484   : > { %3627 = vmatpush1.bf16.msra.mxu0 %v3037_v0  ;;  %3791 = vmatpush1.bf16.msra.mxu1 %v3039_v1  ;;  %v3112_v0 = vunpack.c.l.s8.bf16 %v2616_v60  ;;  %v2613_v1 = vld [vmem:[%s7807_s11 + $0x7a0] sm:$0xff] }
 0x485   : > { %3628 = vmatprep.subr.bf16.mxu0 %v3046_v17  ;;  %3792 = vmatprep.subr.bf16.mxu1 %v3048_v2  ;;  %v2615_v17 = vld [vmem:[%s7807_s11 + $0x7b0] sm:$0xff]  ;;  %v8201_v2 = vor.u32 %v6437_v61, %v6436_v8  ;;  %v3117_v18 = vunpack.c.h.s8.bf16 %v2613_v1 }
 0x486   : > { %v6905_v60 = vld [vmem:[%s7813_s17 + $0x84] ss:$16 sps:$4 sm:$0xff]   ;;  %v6903_v61 = vld [vmem:[%s7813_s17 + $0x80] ss:$16 sps:$4 sm:$0xff]  }
 0x487   : > { %v6908_v8 = vld [vmem:[%s7813_s17 + $0x284] ss:$16 sps:$4 sm:$0xff]  }
 0x488   : > { %3629 = vmatpush1.bf16.msra.mxu0 %v3045_v5  ;;  %3793 = vmatpush1.bf16.msra.mxu1 %v3047_v6  ;;  %v3879_v5 = vld [vmem:[%s7815_s29] ss:$8 sm:$0xf0]  ;;  %v8209_v6 = vsub.s32 3, %v8193_v58 }
 0x489   : > { %3630 = vmatprep.subr.bf16.mxu0 %v3054_v7  ;;  %3794 = vmatprep.subr.bf16.mxu1 %v3056_v10  ;;  %v3109_v7 = vunpack.c.l.s8.bf16 %v2613_v1  ;;  %v3111_v10 = vunpack.c.l.s8.bf16 %v2615_v17  ;;  %v6912_v1 = vld [vmem:[%s7813_s17 + $0x2a0] ss:$16 sps:$4 sm:$0xff]  }
 0x48a   : > { %v8177_v19 = vpop.f32.mrb[0].mxu0  ;;  %v8179_v20 = vpop.f32.mrb[0].mxu1  ;;  %v3845_v32 = vrot.slane %v8201_v2, %v8209_v6 }
 0x48b   : > { %v8181_v23 = vpop.f32.mrb[1].mxu0  ;;  %v8183_v24 = vpop.f32.mrb[1].mxu1 }
 0x48c   : > { %v3330_v25 = vpop.f32.mrb[2].mxu0  ;;  %v3494_v31 = vpop.f32.mrb[2].mxu1  ;;  %3631 = vmatpush1.bf16.msra.mxu0 %v3053_v14  ;;  %3795 = vmatpush1.bf16.msra.mxu1 %v3055_v48  ;;  %v8211_v14 = vor.u32 %v3879_v5, %v3878_v3  ;;  %v3837_v48 = vrot.slane %v8201_v2, %v8205_v4  ;;  %v6920_v3 = vld [vmem:[%s7813_s17 + $0x2c4] ss:$16 sps:$4 sm:$0xff]   ;;  %v6915_v5 = vld [vmem:[%s7813_s17 + $0xc0] ss:$16 sps:$4 sm:$0xff]  }
 0x48d   : > { %v3331_v28 = vpop.f32.mrb[3].mxu0  ;;  %v3495_v29 = vpop.f32.mrb[3].mxu1  ;;  %3632 = vmatprep.subr.bf16.mxu0 %v3062_v15  ;;  %3796 = vmatprep.subr.bf16.mxu1 %v3064_v16  ;;  %v2622_v15 = vld [vmem:[%s7807_s11 + $0x7e8] sm:$0xff]  ;;  %v2624_v16 = vld [vmem:[%s7807_s11 + $0x7f8] sm:$0xff]  ;;  %v3119_v25 = vunpack.c.h.s8.bf16 %v2615_v17  ;;  %v6917_v17 = vld [vmem:[%s7813_s17 + $0xc4] ss:$16 sps:$4 sm:$0xff]  }
 0x48e   : > { %v3126_v31 = vunpack.c.l.s8.bf16 %v2622_v15  ;;  %v2623_v28 = vld [vmem:[%s7807_s11 + $0x7f0] sm:$0xff]  ;;  %v3871_v29 = vmul.f32 %v3837_v48, %v8181_v23  ;;  %v3897_v39 = vrot.slane %v8211_v14, %v8209_v6 }
 0x48f   : > { %v3135_v54 = vunpack.c.h.s8.bf16 %v2623_v28  ;;  %v6924_v48 = vld [vmem:[%s7813_s17 + $0x2e0] ss:$16 sps:$4 sm:$0xff]  }
 0x490   : > { %3633 = vmatpush1.bf16.msra.mxu0 %v3061_v26  ;;  %3797 = vmatpush1.bf16.msra.mxu1 %v3063_v27  ;;  %v3128_v26 = vunpack.c.l.s8.bf16 %v2624_v16  ;;  %v2621_v27 = vld [vmem:[%s7807_s11 + $0x7e0] sm:$0xff] }
 0x491   : > { %3634 = vmatprep.subr.bf16.mxu0 %v3070_v30  ;;  %3798 = vmatprep.subr.bf16.mxu1 %v3072_v33  ;;  %v3889_v30 = vrot.slane %v8211_v14, %v8205_v4  ;;  %v3873_v33 = vmul.f32 %v3845_v32, %v8183_v24  ;;  %v3125_v34 = vunpack.c.l.s8.bf16 %v2621_v27  ;;  %v3133_v24 = vunpack.c.h.s8.bf16 %v2621_v27  ;;  %v6927_v32 = vld [vmem:[%s7813_s17 + $0x100] ss:$16 sps:$4 sm:$0xff]  }
 0x492   : > { %v6936_v27 = vld [vmem:[%s7813_s17 + $0x320] ss:$16 sps:$4 sm:$0xff]  }
 0x493   : > { %v3923_v23 = vadd.f32 %v3889_v30, %v3871_v29  ;;  %v6944_v29 = vld [vmem:[%s7813_s17 + $0x344] ss:$16 sps:$4 sm:$0xff]   ;;  %v6939_v30 = vld [vmem:[%s7813_s17 + $0x140] ss:$16 sps:$4 sm:$0xff]  }
 0x494   : > { %3635 = vmatpush1.bf16.msra.mxu0 %v3069_v35  ;;  %3799 = vmatpush1.bf16.msra.mxu1 %v3071_v36  ;;  %v3127_v35 = vunpack.c.l.s8.bf16 %v2623_v28  ;;  %v3134_v36 = vunpack.c.h.s8.bf16 %v2622_v15  ;;  %v6929_v15 = vld [vmem:[%s7813_s17 + $0x104] ss:$16 sps:$4 sm:$0xff]  }
 0x495   : > { %3636 = vmatprep.subr.bf16.mxu0 %v3078_v37  ;;  %3800 = vmatprep.subr.bf16.mxu1 %v3080_v38  ;;  %v3136_v37 = vunpack.c.h.s8.bf16 %v2624_v16  ;;  %v3925_v38 = vadd.f32 %v3897_v39, %v3873_v33  ;;  %v6932_v16 = vld [vmem:[%s7813_s17 + $0x304] ss:$16 sps:$4 sm:$0xff]   ;;  %v6942_v33 = vld [vmem:[%s7813_s17 + $0x340] ss:$16 sps:$4 sm:$0xff]  }
 0x496   : > { %v6941_v28 = vld [vmem:[%s7813_s17 + $0x144] ss:$16 sps:$4 sm:$0xff]  }
 0x497   : > { %v6947_v39 = vld [vmem:[%s7813_s17 + $0x164] ss:$16 sps:$4 sm:$0xff]  }
 0x498   : > { %3637 = vmatpush1.bf16.msra.mxu0 %v3077_v41  ;;  %3801 = vmatpush1.bf16.msra.mxu1 %v3079_v21  ;;  %v6884_v41 = vld [vmem:[%s7813_s17 + $0x204] ss:$16 sps:$4 sm:$0xff]   ;;  %v3931_v21 = vmax.f32 %v3923_v23, 0.0 }
 0x499   : > { %3638 = vmatprep.subr.bf16.mxu0 %v3086_v42  ;;  %3802 = vmatprep.subr.bf16.mxu1 %v3088_v43  ;;  %v3933_v42 = vmax.f32 %v3925_v38, 0.0  ;;  %v6879_v43 = vld [vmem:[%s7813_s17] ss:$16 sps:$4 sm:$0xff]   ;;  %v6953_v23 = vld [vmem:[%s7813_s17 + $0x184] ss:$16 sps:$4 sm:$0xff]   ;;  %v8288_v38 = vsub.s32 2, %v8193_v58 }
 0x49a   : > { %v8231_v46 = vpack.c.bf16 %v3931_v21, %v3931_v21  ;;  %v6959_v21 = vld [vmem:[%s7813_s17 + $0x1a4] ss:$16 sps:$4 sm:$0xff]  }
 0x49c   : > { %3639 = vmatpush1.bf16.msra.mxu0 %v3085_v47  ;;  %3803 = vmatpush1.bf16.msra.mxu1 %v3087_v12  ;;  %v6887_v47 = vld [vmem:[%s7813_s17 + $0x24] ss:$16 sps:$4 sm:$0xff]  }
 0x49d   : > { %3640 = vmatprep.subr.bf16.mxu0 %v3094_v49  ;;  %3804 = vmatprep.subr.bf16.mxu1 %v3096_v55  ;;  %v6890_v12 = vld [vmem:[%s7813_s17 + $0x224] ss:$16 sps:$4 sm:$0xff]   ;;  %v8235_v49 = vpack.c.bf16 %v3933_v42, %v3933_v42  ;;  %v6885_v55 = vld [vmem:[%s7813_s17 + $0x20] ss:$16 sps:$4 sm:$0xff]   ;;  %v3841_v42 = vrot.slane %v8201_v2, %v8288_v38 }
 0x4a0   : > { %3641 = vmatpush1.bf16.msra.mxu0 %v3093_v52  ;;  %3805 = vmatpush1.bf16.msra.mxu1 %v3095_v53  ;;  %v6894_v52 = vld [vmem:[%s7813_s17 + $0x240] ss:$16 sps:$4 sm:$0xff]   ;;  %v6899_v53 = vld [vmem:[%s7813_s17 + $0x64] ss:$16 sps:$4 sm:$0xff]  }
 0x4a1   : > { %3642 = vmatprep.subr.bf16.mxu0 %v3102_v56  ;;  %3806 = vmatprep.subr.bf16.mxu1 %v3104_v62  ;;  %v6902_v56 = vld [vmem:[%s7813_s17 + $0x264] ss:$16 sps:$4 sm:$0xff]   ;;  %v6897_v62 = vld [vmem:[%s7813_s17 + $0x60] ss:$16 sps:$4 sm:$0xff]  }
 0x4a4   : > { %3643 = vmatpush1.bf16.msra.mxu0 %v3101_v44  ;;  %3807 = vmatpush1.bf16.msra.mxu1 %v3103_v9  ;;  %v6906_v44 = vld [vmem:[%s7813_s17 + $0x280] ss:$16 sps:$4 sm:$0xff]   ;;  %v6911_v9 = vld [vmem:[%s7813_s17 + $0xa4] ss:$16 sps:$4 sm:$0xff]  }
 0x4a5   : > { %3644 = vmatprep.subr.bf16.mxu0 %v3110_v63  ;;  %3808 = vmatprep.subr.bf16.mxu1 %v3112_v0  ;;  %v6914_v63 = vld [vmem:[%s7813_s17 + $0x2a4] ss:$16 sps:$4 sm:$0xff]   ;;  %v6909_v0 = vld [vmem:[%s7813_s17 + $0xa0] ss:$16 sps:$4 sm:$0xff]  }
 0x4a8   : > { %3645 = vmatpush1.bf16.msra.mxu0 %v3109_v7  ;;  %3809 = vmatpush1.bf16.msra.mxu1 %v3111_v10  ;;  %v6918_v7 = vld [vmem:[%s7813_s17 + $0x2c0] ss:$16 sps:$4 sm:$0xff]   ;;  %v6923_v10 = vld [vmem:[%s7813_s17 + $0xe4] ss:$16 sps:$4 sm:$0xff]  }
 0x4a9   : > { %3646 = vmatprep.subr.bf16.mxu0 %v3118_v11  ;;  %3810 = vmatprep.subr.bf16.mxu1 %v3120_v13  ;;  %v6926_v11 = vld [vmem:[%s7813_s17 + $0x2e4] ss:$16 sps:$4 sm:$0xff]   ;;  %v6921_v13 = vld [vmem:[%s7813_s17 + $0xe0] ss:$16 sps:$4 sm:$0xff]  }
 0x4ac   : > { %3647 = vmatpush1.bf16.msra.mxu0 %v3117_v18  ;;  %3811 = vmatpush1.bf16.msra.mxu1 %v3119_v25  ;;  %v6930_v18 = vld [vmem:[%s7813_s17 + $0x300] ss:$16 sps:$4 sm:$0xff]   ;;  %v6935_v25 = vld [vmem:[%s7813_s17 + $0x124] ss:$16 sps:$4 sm:$0xff]  }
 0x4ad   : > { %3648 = vmatprep.subr.bf16.mxu0 %v3126_v31  ;;  %3812 = vmatprep.subr.bf16.mxu1 %v3128_v26  ;;  %v6938_v31 = vld [vmem:[%s7813_s17 + $0x324] ss:$16 sps:$4 sm:$0xff]   ;;  %v6933_v26 = vld [vmem:[%s7813_s17 + $0x120] ss:$16 sps:$4 sm:$0xff]  }
 0x4b0   : > { %3649 = vmatpush1.bf16.msra.mxu0 %v3125_v34  ;;  %3813 = vmatpush1.bf16.msra.mxu1 %v3127_v35  ;;  %v6950_v34 = vld [vmem:[%s7813_s17 + $0x364] ss:$16 sps:$4 sm:$0xff]   ;;  %v6945_v35 = vld [vmem:[%s7813_s17 + $0x160] ss:$16 sps:$4 sm:$0xff]  }
 0x4b1   : > { %3650 = vmatprep.subr.bf16.mxu0 %v3134_v36  ;;  %3814 = vmatprep.subr.bf16.mxu1 %v3136_v37  ;;  %v8283_v36 = vsub.s32 0, %v8193_v58  ;;  %v6948_v37 = vld [vmem:[%s7813_s17 + $0x360] ss:$16 sps:$4 sm:$0xff]  }
 0x4b4   : > { %3651 = vmatpush1.bf16.msra.mxu0 %v3133_v24  ;;  %3815 = vmatpush1.bf16.msra.mxu1 %v3135_v54  ;;  %v6956_v24 = vld [vmem:[%s7813_s17 + $0x384] ss:$16 sps:$4 sm:$0xff]   ;;  %v6951_v54 = vld [vmem:[%s7813_s17 + $0x180] ss:$16 sps:$4 sm:$0xff]  }
 0x4b5   : > { %5486 = vmatprep.subr.bf16.mxu0 %v6881_v40  ;;  %5527 = vmatprep.subr.bf16.mxu1 %v6884_v41  ;;  %v3833_v40 = vrot.slane %v8201_v2, %v8283_v36  ;;  %v6954_v41 = vld [vmem:[%s7813_s17 + $0x380] ss:$16 sps:$4 sm:$0xff]  }
 0x4b7   : > { %3653 = vmatmul.mubr.bf16.vlgmr.msra.gmra.mrb[4].mxu0 %v8051_v22  ;;  %3817 = vmatmul.mubr.bf16.vlgmr.msra.gmra.mrb[4].mxu1 %v8051_v22  ;;  %v6891_v22 = vld [vmem:[%s7813_s17 + $0x40] ss:$16 sps:$4 sm:$0xff]  }
 0x4b8   : > { %5487 = vmatpush1.bf16.msra.mxu0 %v6879_v43  ;;  %5518 = vmatprep.mubr.bf16.mxu0 %v8231_v46  ;;  %v6962_v43 = vld [vmem:[%s7813_s17 + $0x3a4] ss:$16 sps:$4 sm:$0xff]  }
 0x4b9   : > { %5528 = vmatpush1.bf16.msra.mxu1 %v6882_v45  ;;  %5559 = vmatprep.mubr.bf16.mxu1 %v8235_v49  ;;  %v6957_v45 = vld [vmem:[%s7813_s17 + $0x1a0] ss:$16 sps:$4 sm:$0xff]  }
 0x4ba   : > { %5488 = vmatprep.subr.bf16.mxu0 %v6887_v47  ;;  %5529 = vmatprep.subr.bf16.mxu1 %v6890_v12  ;;  %v3870_v47 = vmul.f32 %v3833_v40, %v8177_v19  ;;  %v3885_v12 = vrot.slane %v8211_v14, %v8283_v36  ;;  %v6963_v19 = vld [vmem:[%s7813_s17 + $0x1c0] ss:$16 sps:$4 sm:$0xff]  }
 0x4bb   : > { %v7017_v40 = vld [vmem:[%s7813_s17 + $0x4e0] ss:$16 sps:$4 sm:$0xff]  }
 0x4bc   : > { %5489 = vmatpush1.bf16.msra.mxu0 %v6885_v55  ;;  %v6960_v55 = vld [vmem:[%s7813_s17 + $0x3a0] ss:$16 sps:$4 sm:$0xff]  }
 0x4bd   : > { %5530 = vmatpush1.bf16.msra.mxu1 %v6888_v50  ;;  %5490 = vmatprep.subr.bf16.mxu0 %v6893_v51  ;;  %v6965_v50 = vld [vmem:[%s7813_s17 + $0x1c4] ss:$16 sps:$4 sm:$0xff]   ;;  %v3872_v51 = vmul.f32 %v3841_v42, %v8179_v20  ;;  %v6969_v20 = vld [vmem:[%s7813_s17 + $0x1e0] ss:$16 sps:$4 sm:$0xff]  }
 0x4be   : > { %5531 = vmatprep.subr.bf16.mxu1 %v6896_v57  ;;  %v3893_v57 = vrot.slane %v8211_v14, %v8288_v38  ;;  %v7028_v42 = vld [vmem:[%s7813_s17 + $0x704] ss:$16 sps:$4 sm:$0xff]  }
 0x4c0   : > { %5491 = vmatpush1.bf16.msra.mxu0 %v6891_v22  ;;  %v6968_v22 = vld [vmem:[%s7813_s17 + $0x3c4] ss:$16 sps:$4 sm:$0xff]  }
 0x4c1   : > { %5532 = vmatpush1.bf16.msra.mxu1 %v6894_v52  ;;  %5492 = vmatprep.subr.bf16.mxu0 %v6899_v53  ;;  %v3922_v52 = vadd.f32 %v3885_v12, %v3870_v47  ;;  %v6966_v53 = vld [vmem:[%s7813_s17 + $0x3c0] ss:$16 sps:$4 sm:$0xff]   ;;  %v7031_v47 = vld [vmem:[%s7813_s17 + $0x524] ss:$16 sps:$4 sm:$0xff]  }
 0x4c2   : > { %5533 = vmatprep.subr.bf16.mxu1 %v6902_v56  ;;  %v6971_v56 = vld [vmem:[%s7813_s17 + $0x1e4] ss:$16 sps:$4 sm:$0xff]  }
 0x4c3   : > { %v7034_v12 = vld [vmem:[%s7813_s17 + $0x724] ss:$16 sps:$4 sm:$0xff]  }
 0x4c4   : > { %5493 = vmatpush1.bf16.msra.mxu0 %v6897_v62  ;;  %v3924_v62 = vadd.f32 %v3893_v57, %v3872_v51  ;;  %v7037_v51 = vld [vmem:[%s7813_s17 + $0x544] ss:$16 sps:$4 sm:$0xff]  }
 0x4c5   : > { %5534 = vmatpush1.bf16.msra.mxu1 %v6900_v59  ;;  %5494 = vmatprep.subr.bf16.mxu0 %v6905_v60  ;;  %v6974_v59 = vld [vmem:[%s7813_s17 + $0x3e4] ss:$16 sps:$4 sm:$0xff]   ;;  %v3930_v60 = vmax.f32 %v3922_v52, 0.0 }
 0x4c6   : > { %5535 = vmatprep.subr.bf16.mxu1 %v6908_v8  ;;  %v6972_v8 = vld [vmem:[%s7813_s17 + $0x3e0] ss:$16 sps:$4 sm:$0xff]   ;;  %v7040_v57 = vld [vmem:[%s7813_s17 + $0x744] ss:$16 sps:$4 sm:$0xff]  }
 0x4c7   : > { %v7043_v52 = vld [vmem:[%s7813_s17 + $0x564] ss:$16 sps:$4 sm:$0xff]  }
 0x4c8   : > { %5495 = vmatpush1.bf16.msra.mxu0 %v6903_v61  ;;  %v6977_v61 = vld [vmem:[%s7813_s17 + $0x404] ss:$16 sps:$4 sm:$0xff]  }
 0x4c9   : > { %5536 = vmatpush1.bf16.msra.mxu1 %v6906_v44  ;;  %5496 = vmatprep.subr.bf16.mxu0 %v6911_v9  ;;  %v3932_v44 = vmax.f32 %v3924_v62, 0.0  ;;  %v6980_v9 = vld [vmem:[%s7813_s17 + $0x604] ss:$16 sps:$4 sm:$0xff]   ;;  %v7044_v62 = vld [vmem:[%s7813_s17 + $0x760] ss:$16 sps:$4 sm:$0xff]  }
 0x4ca   : > { %5537 = vmatprep.subr.bf16.mxu1 %v6914_v63  ;;  %v6975_v63 = vld [vmem:[%s7813_s17 + $0x400] ss:$16 sps:$4 sm:$0xff]  }
 0x4cc   : > { %5497 = vmatpush1.bf16.msra.mxu0 %v6909_v0  ;;  %v8318_v0 = vpack.c.bf16 %v3930_v60, %v3930_v60  ;;  %v7047_v60 = vld [vmem:[%s7813_s17 + $0x580] ss:$16 sps:$4 sm:$0xff]  }
 0x4cd   : > { %5538 = vmatpush1.bf16.msra.mxu1 %v6912_v1  ;;  %5498 = vmatprep.subr.bf16.mxu0 %v6917_v17  ;;  %v6978_v1 = vld [vmem:[%s7813_s17 + $0x600] ss:$16 sps:$4 sm:$0xff]   ;;  %v6983_v17 = vld [vmem:[%s7813_s17 + $0x424] ss:$16 sps:$4 sm:$0xff]  }
 0x4ce   : > { %5539 = vmatprep.subr.bf16.mxu1 %v6920_v3  ;;  %v8322_v3 = vpack.c.bf16 %v3932_v44, %v3932_v44  ;;  %v7058_v44 = vld [vmem:[%s7813_s17 + $0x7a4] ss:$16 sps:$4 sm:$0xff]  }
 0x4d0   : > { %5499 = vmatpush1.bf16.msra.mxu0 %v6915_v5  ;;  %v6986_v5 = vld [vmem:[%s7813_s17 + $0x624] ss:$16 sps:$4 sm:$0xff]  }
 0x4d1   : > { %5540 = vmatpush1.bf16.msra.mxu1 %v6918_v7  ;;  %5500 = vmatprep.subr.bf16.mxu0 %v6923_v10  ;;  %v6981_v7 = vld [vmem:[%s7813_s17 + $0x420] ss:$16 sps:$4 sm:$0xff]  }
 0x4d2   : > { %5541 = vmatprep.subr.bf16.mxu1 %v6926_v11  ;;  %v6984_v10 = vld [vmem:[%s7813_s17 + $0x620] ss:$16 sps:$4 sm:$0xff]   ;;  %v6989_v11 = vld [vmem:[%s7813_s17 + $0x444] ss:$16 sps:$4 sm:$0xff]  }
 0x4d4   : > { %5501 = vmatpush1.bf16.msra.mxu0 %v6921_v13  ;;  %v6992_v13 = vld [vmem:[%s7813_s17 + $0x644] ss:$16 sps:$4 sm:$0xff]  }
 0x4d5   : > { %5542 = vmatpush1.bf16.msra.mxu1 %v6924_v48  ;;  %5502 = vmatprep.subr.bf16.mxu0 %v6929_v15  ;;  %v6987_v48 = vld [vmem:[%s7813_s17 + $0x440] ss:$16 sps:$4 sm:$0xff]  }
 0x4d6   : > { %5543 = vmatprep.subr.bf16.mxu1 %v6932_v16  ;;  %v6990_v15 = vld [vmem:[%s7813_s17 + $0x640] ss:$16 sps:$4 sm:$0xff]   ;;  %v6995_v16 = vld [vmem:[%s7813_s17 + $0x464] ss:$16 sps:$4 sm:$0xff]  }
 0x4d8   : > { %5503 = vmatpush1.bf16.msra.mxu0 %v6927_v32  ;;  %v6998_v32 = vld [vmem:[%s7813_s17 + $0x664] ss:$16 sps:$4 sm:$0xff]  }
 0x4d9   : > { %5544 = vmatpush1.bf16.msra.mxu1 %v6930_v18  ;;  %5504 = vmatprep.subr.bf16.mxu0 %v6935_v25  ;;  %v6993_v18 = vld [vmem:[%s7813_s17 + $0x460] ss:$16 sps:$4 sm:$0xff]  }
 0x4da   : > { %5545 = vmatprep.subr.bf16.mxu1 %v6938_v31  ;;  %v6996_v25 = vld [vmem:[%s7813_s17 + $0x660] ss:$16 sps:$4 sm:$0xff]   ;;  %v7001_v31 = vld [vmem:[%s7813_s17 + $0x484] ss:$16 sps:$4 sm:$0xff]  }
 0x4dc   : > { %5505 = vmatpush1.bf16.msra.mxu0 %v6933_v26  ;;  %v7004_v26 = vld [vmem:[%s7813_s17 + $0x684] ss:$16 sps:$4 sm:$0xff]  }
 0x4dd   : > { %5546 = vmatpush1.bf16.msra.mxu1 %v6936_v27  ;;  %5506 = vmatprep.subr.bf16.mxu0 %v6941_v28  ;;  %v6999_v27 = vld [vmem:[%s7813_s17 + $0x480] ss:$16 sps:$4 sm:$0xff]  }
 0x4de   : > { %5547 = vmatprep.subr.bf16.mxu1 %v6944_v29  ;;  %v7002_v28 = vld [vmem:[%s7813_s17 + $0x680] ss:$16 sps:$4 sm:$0xff]   ;;  %v7007_v29 = vld [vmem:[%s7813_s17 + $0x4a4] ss:$16 sps:$4 sm:$0xff]  }
 0x4e0   : > { %5507 = vmatpush1.bf16.msra.mxu0 %v6939_v30  ;;  %v7010_v30 = vld [vmem:[%s7813_s17 + $0x6a4] ss:$16 sps:$4 sm:$0xff]  }
 0x4e1   : > { %5548 = vmatpush1.bf16.msra.mxu1 %v6942_v33  ;;  %5508 = vmatprep.subr.bf16.mxu0 %v6947_v39  ;;  %v7005_v33 = vld [vmem:[%s7813_s17 + $0x4a0] ss:$16 sps:$4 sm:$0xff]  }
 0x4e2   : > { %5549 = vmatprep.subr.bf16.mxu1 %v6950_v34  ;;  %v7008_v39 = vld [vmem:[%s7813_s17 + $0x6a0] ss:$16 sps:$4 sm:$0xff]   ;;  %v7013_v34 = vld [vmem:[%s7813_s17 + $0x4c4] ss:$16 sps:$4 sm:$0xff]  }
 0x4e4   : > { %5509 = vmatpush1.bf16.msra.mxu0 %v6945_v35  ;;  %v7016_v35 = vld [vmem:[%s7813_s17 + $0x6c4] ss:$16 sps:$4 sm:$0xff]  }
 0x4e5   : > { %5550 = vmatpush1.bf16.msra.mxu1 %v6948_v37  ;;  %5510 = vmatprep.subr.bf16.mxu0 %v6953_v23  ;;  %v7011_v37 = vld [vmem:[%s7813_s17 + $0x4c0] ss:$16 sps:$4 sm:$0xff]  }
 0x4e6   : > { %5551 = vmatprep.subr.bf16.mxu1 %v6956_v24  ;;  %v7014_v23 = vld [vmem:[%s7813_s17 + $0x6c0] ss:$16 sps:$4 sm:$0xff]   ;;  %v7019_v24 = vld [vmem:[%s7813_s17 + $0x4e4] ss:$16 sps:$4 sm:$0xff]  }
 0x4e8   : > { %5511 = vmatpush1.bf16.msra.mxu0 %v6951_v54  ;;  %v7022_v54 = vld [vmem:[%s7813_s17 + $0x6e4] ss:$16 sps:$4 sm:$0xff]  }
 0x4e9   : > { %5552 = vmatpush1.bf16.msra.mxu1 %v6954_v41  ;;  %5512 = vmatprep.subr.bf16.mxu0 %v6959_v21  ;;  %v7020_v41 = vld [vmem:[%s7813_s17 + $0x6e0] ss:$16 sps:$4 sm:$0xff]   ;;  %v7025_v21 = vld [vmem:[%s7813_s17 + $0x504] ss:$16 sps:$4 sm:$0xff]  }
 0x4ea   : > { %5553 = vmatprep.subr.bf16.mxu1 %v6962_v43  ;;  %v7023_v43 = vld [vmem:[%s7813_s17 + $0x500] ss:$16 sps:$4 sm:$0xff]  }
 0x4ec   : > { %5513 = vmatpush1.bf16.msra.mxu0 %v6957_v45  ;;  %v7026_v45 = vld [vmem:[%s7813_s17 + $0x700] ss:$16 sps:$4 sm:$0xff]  }
 0x4ed   : > { %5554 = vmatpush1.bf16.msra.mxu1 %v6960_v55  ;;  %5514 = vmatprep.subr.bf16.mxu0 %v6965_v50  ;;  %v7029_v55 = vld [vmem:[%s7813_s17 + $0x520] ss:$16 sps:$4 sm:$0xff]  }
 0x4ee   : > { %5555 = vmatprep.subr.bf16.mxu1 %v6968_v22  ;;  %v7032_v50 = vld [vmem:[%s7813_s17 + $0x720] ss:$16 sps:$4 sm:$0xff]  }
 0x4ef   : > { %v7035_v22 = vld [vmem:[%s7813_s17 + $0x540] ss:$16 sps:$4 sm:$0xff]  }
 0x4f0   : > { %5515 = vmatpush1.bf16.msra.mxu0 %v6963_v19  ;;  %v7038_v19 = vld [vmem:[%s7813_s17 + $0x740] ss:$16 sps:$4 sm:$0xff]  }
 0x4f1   : > { %5556 = vmatpush1.bf16.msra.mxu1 %v6966_v53  ;;  %5516 = vmatprep.subr.bf16.mxu0 %v6971_v56  ;;  %v7046_v53 = vld [vmem:[%s7813_s17 + $0x764] ss:$16 sps:$4 sm:$0xff]   ;;  %v7041_v56 = vld [vmem:[%s7813_s17 + $0x560] ss:$16 sps:$4 sm:$0xff]  }
 0x4f2   : > { %5557 = vmatprep.subr.bf16.mxu1 %v6974_v59  ;;  %v7049_v59 = vld [vmem:[%s7813_s17 + $0x584] ss:$16 sps:$4 sm:$0xff]  }
 0x4f4   : > { %5517 = vmatpush1.bf16.msra.mxu0 %v6969_v20  ;;  %v7052_v20 = vld [vmem:[%s7813_s17 + $0x784] ss:$16 sps:$4 sm:$0xff]  }
 0x4f5   : > { %5558 = vmatpush1.bf16.msra.mxu1 %v6972_v8  ;;  %5568 = vmatprep.subr.bf16.mxu0 %v6977_v61  ;;  %v7050_v8 = vld [vmem:[%s7813_s17 + $0x780] ss:$16 sps:$4 sm:$0xff]   ;;  %v7055_v61 = vld [vmem:[%s7813_s17 + $0x5a4] ss:$16 sps:$4 sm:$0xff]  }
 0x4f6   : > { %5609 = vmatprep.subr.bf16.mxu1 %v6980_v9  ;;  %v7053_v9 = vld [vmem:[%s7813_s17 + $0x5a0] ss:$16 sps:$4 sm:$0xff]  }
 0x4f7   : > { %5519 = vmatmul.mubr.bf16.vlgmr.msra.gmra.mrb[8].mxu0 %v8318_v0 }
 0x4f8   : > { %5560 = vmatmul.mubr.bf16.vlgmr.msra.gmra.mrb[8].mxu1 %v8322_v3  ;;  %5569 = vmatpush1.bf16.msra.mxu0 %v6975_v63  ;;  %v7056_v63 = vld [vmem:[%s7813_s17 + $0x7a0] ss:$16 sps:$4 sm:$0xff]  }
 0x4f9   : > { %5610 = vmatpush1.bf16.msra.mxu1 %v6978_v1  ;;  %5570 = vmatprep.subr.bf16.mxu0 %v6983_v17  ;;  %v7061_v1 = vld [vmem:[%s7813_s17 + $0x5c4] ss:$16 sps:$4 sm:$0xff]  }
 0x4fa   : > { %5611 = vmatprep.subr.bf16.mxu1 %v6986_v5  ;;  %v7064_v17 = vld [vmem:[%s7813_s17 + $0x7c4] ss:$16 sps:$4 sm:$0xff]   ;;  %v7059_v5 = vld [vmem:[%s7813_s17 + $0x5c0] ss:$16 sps:$4 sm:$0xff]  }
 0x4fc   : > { %5571 = vmatpush1.bf16.msra.mxu0 %v6981_v7  ;;  %v7062_v7 = vld [vmem:[%s7813_s17 + $0x7c0] ss:$16 sps:$4 sm:$0xff]  }
 0x4fd   : > { %5612 = vmatpush1.bf16.msra.mxu1 %v6984_v10  ;;  %5572 = vmatprep.subr.bf16.mxu0 %v6989_v11  ;;  %v7067_v10 = vld [vmem:[%s7813_s17 + $0x5e4] ss:$16 sps:$4 sm:$0xff]  }
 0x4fe   : > { %5613 = vmatprep.subr.bf16.mxu1 %v6992_v13  ;;  %v7070_v11 = vld [vmem:[%s7813_s17 + $0x7e4] ss:$16 sps:$4 sm:$0xff]   ;;  %v7065_v13 = vld [vmem:[%s7813_s17 + $0x5e0] ss:$16 sps:$4 sm:$0xff]  }
 0x500   : > { %5573 = vmatpush1.bf16.msra.mxu0 %v6987_v48  ;;  %v7068_v48 = vld [vmem:[%s7813_s17 + $0x7e0] ss:$16 sps:$4 sm:$0xff]  }
 0x501   : > { %5614 = vmatpush1.bf16.msra.mxu1 %v6990_v15  ;;  %5574 = vmatprep.subr.bf16.mxu0 %v6995_v16  ;;  %v7073_v15 = vld [vmem:[%s7813_s17 + $0xc] ss:$16 sps:$4 sm:$0xff]  }
 0x502   : > { %5615 = vmatprep.subr.bf16.mxu1 %v6998_v32  ;;  %v7076_v16 = vld [vmem:[%s7813_s17 + $0x20c] ss:$16 sps:$4 sm:$0xff]   ;;  %v3848_v32 = vsub.s32 4, %v8193_v58 }
 0x504   : > { %5575 = vmatpush1.bf16.msra.mxu0 %v6993_v18  ;;  %v3856_v18 = vsub.s32 6, %v8193_v58 }
 0x505   : > { %5616 = vmatpush1.bf16.msra.mxu1 %v6996_v25  ;;  %5576 = vmatprep.subr.bf16.mxu0 %v7001_v31  ;;  %v3852_v25 = vsub.s32 5, %v8193_v58  ;;  %v3860_v31 = vsub.s32 7, %v8193_v58 }
 0x506   : > { %5617 = vmatprep.subr.bf16.mxu1 %v7004_v26  ;;  %v3849_v26 = vrot.slane %v8201_v2, %v3848_v32 }
 0x508   : > { %5577 = vmatpush1.bf16.msra.mxu0 %v6999_v27  ;;  %v3857_v27 = vrot.slane %v8201_v2, %v3856_v18 }
 0x509   : > { %5618 = vmatpush1.bf16.msra.mxu1 %v7002_v28  ;;  %5578 = vmatprep.subr.bf16.mxu0 %v7007_v29  ;;  %v3853_v28 = vrot.slane %v8201_v2, %v3852_v25  ;;  %v3861_v29 = vrot.slane %v8201_v2, %v3860_v31 }
 0x50a   : > { %5619 = vmatprep.subr.bf16.mxu1 %v7010_v30  ;;  %v3901_v30 = vrot.slane %v8211_v14, %v3848_v32  ;;  %v7109_v32 = vld [vmem:[%s7813_s17 + $0xcc] ss:$16 sps:$4 sm:$0xff]  }
 0x50c   : > { %5579 = vmatpush1.bf16.msra.mxu0 %v7005_v33  ;;  %v3909_v33 = vrot.slane %v8211_v14, %v3856_v18  ;;  %v7112_v18 = vld [vmem:[%s7813_s17 + $0x2cc] ss:$16 sps:$4 sm:$0xff]  }
 0x50d   : > { %5620 = vmatpush1.bf16.msra.mxu1 %v7008_v39  ;;  %5580 = vmatprep.subr.bf16.mxu0 %v7013_v34 }
 0x50e   : > { %5621 = vmatprep.subr.bf16.mxu1 %v7016_v35  ;;  %v3905_v35 = vrot.slane %v8211_v14, %v3852_v25  ;;  %v7107_v25 = vld [vmem:[%s7813_s17 + $0xc8] ss:$16 sps:$4 sm:$0xff]  }
 0x510   : > { %5581 = vmatpush1.bf16.msra.mxu0 %v7011_v37  ;;  %v3913_v37 = vrot.slane %v8211_v14, %v3860_v31  ;;  %v7110_v31 = vld [vmem:[%s7813_s17 + $0x2c8] ss:$16 sps:$4 sm:$0xff]  }
 0x511   : > { %5622 = vmatpush1.bf16.msra.mxu1 %v7014_v23  ;;  %5582 = vmatprep.subr.bf16.mxu0 %v7019_v24 }
 0x512   : > { %5623 = vmatprep.subr.bf16.mxu1 %v7022_v54 }
 0x514   : > { %5583 = vmatpush1.bf16.msra.mxu0 %v7017_v40 }
 0x515   : > { %5624 = vmatpush1.bf16.msra.mxu1 %v7020_v41  ;;  %5584 = vmatprep.subr.bf16.mxu0 %v7025_v21 }
 0x516   : > { %5625 = vmatprep.subr.bf16.mxu1 %v7028_v42 }
 0x518   : > { %5585 = vmatpush1.bf16.msra.mxu0 %v7023_v43 }
 0x519   : > { %5626 = vmatpush1.bf16.msra.mxu1 %v7026_v45  ;;  %5586 = vmatprep.subr.bf16.mxu0 %v7031_v47 }
 0x51a   : > { %5627 = vmatprep.subr.bf16.mxu1 %v7034_v12 }
 0x51c   : > { %5587 = vmatpush1.bf16.msra.mxu0 %v7029_v55 }
 0x51d   : > { %5628 = vmatpush1.bf16.msra.mxu1 %v7032_v50  ;;  %5588 = vmatprep.subr.bf16.mxu0 %v7037_v51 }
 0x51e   : > { %5629 = vmatprep.subr.bf16.mxu1 %v7040_v57 }
 0x520   : > { %5589 = vmatpush1.bf16.msra.mxu0 %v7035_v22 }
 0x521   : > { %5630 = vmatpush1.bf16.msra.mxu1 %v7038_v19  ;;  %5590 = vmatprep.subr.bf16.mxu0 %v7043_v52  ;;  %v7071_v52 = vld [vmem:[%s7813_s17 + $0x8] ss:$16 sps:$4 sm:$0xff]  }
 0x522   : > { %5631 = vmatprep.subr.bf16.mxu1 %v7046_v53  ;;  %v7074_v53 = vld [vmem:[%s7813_s17 + $0x208] ss:$16 sps:$4 sm:$0xff]  }
 0x524   : > { %5591 = vmatpush1.bf16.msra.mxu0 %v7041_v56 }
 0x525   : > { %5632 = vmatpush1.bf16.msra.mxu1 %v7044_v62  ;;  %5592 = vmatprep.subr.bf16.mxu0 %v7049_v59  ;;  %v7079_v59 = vld [vmem:[%s7813_s17 + $0x2c] ss:$16 sps:$4 sm:$0xff]  }
 0x526   : > { %5633 = vmatprep.subr.bf16.mxu1 %v7052_v20  ;;  %v7082_v20 = vld [vmem:[%s7813_s17 + $0x22c] ss:$16 sps:$4 sm:$0xff]  }
 0x528   : > { %5593 = vmatpush1.bf16.msra.mxu0 %v7047_v60  ;;  %v7077_v60 = vld [vmem:[%s7813_s17 + $0x28] ss:$16 sps:$4 sm:$0xff]  }
 0x529   : > { %5634 = vmatpush1.bf16.msra.mxu1 %v7050_v8  ;;  %5594 = vmatprep.subr.bf16.mxu0 %v7055_v61  ;;  %v7080_v8 = vld [vmem:[%s7813_s17 + $0x228] ss:$16 sps:$4 sm:$0xff]   ;;  %v7085_v61 = vld [vmem:[%s7813_s17 + $0x4c] ss:$16 sps:$4 sm:$0xff]  }
 0x52a   : > { %5635 = vmatprep.subr.bf16.mxu1 %v7058_v44  ;;  %v7088_v44 = vld [vmem:[%s7813_s17 + $0x24c] ss:$16 sps:$4 sm:$0xff]  }
 0x52c   : > { %5595 = vmatpush1.bf16.msra.mxu0 %v7053_v9  ;;  %v7083_v9 = vld [vmem:[%s7813_s17 + $0x48] ss:$16 sps:$4 sm:$0xff]  }
 0x52d   : > { %5636 = vmatpush1.bf16.msra.mxu1 %v7056_v63  ;;  %5596 = vmatprep.subr.bf16.mxu0 %v7061_v1  ;;  %v7086_v63 = vld [vmem:[%s7813_s17 + $0x248] ss:$16 sps:$4 sm:$0xff]   ;;  %v7091_v1 = vld [vmem:[%s7813_s17 + $0x6c] ss:$16 sps:$4 sm:$0xff]  }
 0x52e   : > { %5637 = vmatprep.subr.bf16.mxu1 %v7064_v17  ;;  %v7092_v17 = vld [vmem:[%s7813_s17 + $0x268] ss:$16 sps:$4 sm:$0xff]  }
 0x530   : > { %5597 = vmatpush1.bf16.msra.mxu0 %v7059_v5  ;;  %v7097_v5 = vld [vmem:[%s7813_s17 + $0x8c] ss:$16 sps:$4 sm:$0xff]  }
 0x531   : > { %5638 = vmatpush1.bf16.msra.mxu1 %v7062_v7  ;;  %5598 = vmatprep.subr.bf16.mxu0 %v7067_v10  ;;  %v7100_v7 = vld [vmem:[%s7813_s17 + $0x28c] ss:$16 sps:$4 sm:$0xff]   ;;  %v7095_v10 = vld [vmem:[%s7813_s17 + $0x88] ss:$16 sps:$4 sm:$0xff]  }
 0x532   : > { %5639 = vmatprep.subr.bf16.mxu1 %v7070_v11  ;;  %v7098_v11 = vld [vmem:[%s7813_s17 + $0x288] ss:$16 sps:$4 sm:$0xff]  }
 0x534   : > { %5599 = vmatpush1.bf16.msra.mxu0 %v7065_v13  ;;  %v7103_v13 = vld [vmem:[%s7813_s17 + $0xac] ss:$16 sps:$4 sm:$0xff]  }
 0x535   : > { %5640 = vmatpush1.bf16.msra.mxu1 %v7068_v48  ;;  %5650 = vmatprep.subr.bf16.mxu0 %v7073_v15  ;;  %v7106_v48 = vld [vmem:[%s7813_s17 + $0x2ac] ss:$16 sps:$4 sm:$0xff]   ;;  %v7101_v15 = vld [vmem:[%s7813_s17 + $0xa8] ss:$16 sps:$4 sm:$0xff]  }
 0x536   : > { %5691 = vmatprep.subr.bf16.mxu1 %v7076_v16  ;;  %v7104_v16 = vld [vmem:[%s7813_s17 + $0x2a8] ss:$16 sps:$4 sm:$0xff]  }
 0x58a   : > { %v3654_v39 = vpop.f32.mrb[4].mxu0  ;;  %v3818_v34 = vpop.f32.mrb[4].mxu1 }
 0x58b   : > { %v3874_v23 = vmul.f32 %v3849_v26, %v3654_v39  ;;  %v3876_v58 = vmul.f32 %v3857_v27, %v3818_v34  ;;  %v3656_v24 = vpop.f32.mrb[5].mxu0  ;;  %v3820_v54 = vpop.f32.mrb[5].mxu1  ;;  %v7115_v26 = vld [vmem:[%s7813_s17 + $0xec] ss:$16 sps:$4 sm:$0xff]   ;;  %v7119_v39 = vld [vmem:[%s7813_s17 + $0x108] ss:$16 sps:$4 sm:$0xff]  }
 0x58c   : > { %v3875_v40 = vmul.f32 %v3853_v28, %v3656_v24  ;;  %v3877_v41 = vmul.f32 %v3861_v29, %v3820_v54  ;;  %v3658_v21 = vpop.f32.mrb[6].mxu0  ;;  %v3822_v2 = vpop.f32.mrb[6].mxu1  ;;  %v7118_v27 = vld [vmem:[%s7813_s17 + $0x2ec] ss:$16 sps:$4 sm:$0xff]   ;;  %v7113_v28 = vld [vmem:[%s7813_s17 + $0xe8] ss:$16 sps:$4 sm:$0xff]  }
 0x58d   : > { %v3926_v42 = vadd.f32 %v3901_v30, %v3874_v23  ;;  %v3928_v43 = vadd.f32 %v3909_v33, %v3876_v58  ;;  %v3659_v45 = vpop.f32.mrb[7].mxu0  ;;  %v3823_v47 = vpop.f32.mrb[7].mxu1  ;;  %v7116_v29 = vld [vmem:[%s7813_s17 + $0x2e8] ss:$16 sps:$4 sm:$0xff]   ;;  %v7121_v30 = vld [vmem:[%s7813_s17 + $0x10c] ss:$16 sps:$4 sm:$0xff]  }
 0x58e   : > { %v3927_v12 = vadd.f32 %v3905_v35, %v3875_v40  ;;  %v3929_v55 = vadd.f32 %v3913_v37, %v3877_v41  ;;  %v7124_v33 = vld [vmem:[%s7813_s17 + $0x30c] ss:$16 sps:$4 sm:$0xff]   ;;  %v7122_v34 = vld [vmem:[%s7813_s17 + $0x308] ss:$16 sps:$4 sm:$0xff]  }
 0x58f   : > { %v3934_v50 = vmax.f32 %v3926_v42, 0.0  ;;  %v3936_v14 = vmax.f32 %v3928_v43, 0.0  ;;  %v7127_v35 = vld [vmem:[%s7813_s17 + $0x12c] ss:$16 sps:$4 sm:$0xff]   ;;  %v7125_v23 = vld [vmem:[%s7813_s17 + $0x128] ss:$16 sps:$4 sm:$0xff]  }
 0x590   : > { %v3935_v51 = vmax.f32 %v3927_v12, 0.0  ;;  %v3937_v57 = vmax.f32 %v3929_v55, 0.0  ;;  %v7130_v37 = vld [vmem:[%s7813_s17 + $0x32c] ss:$16 sps:$4 sm:$0xff]   ;;  %v7128_v58 = vld [vmem:[%s7813_s17 + $0x328] ss:$16 sps:$4 sm:$0xff]  }
 0x591   : > { %v8405_v56 = vpack.c.bf16 %v3934_v50, %v3934_v50  ;;  %v8407_v62 = vpack.c.bf16 %v3936_v14, %v3936_v14  ;;  %v7133_v24 = vld [vmem:[%s7813_s17 + $0x14c] ss:$16 sps:$4 sm:$0xff]   ;;  %v7131_v40 = vld [vmem:[%s7813_s17 + $0x148] ss:$16 sps:$4 sm:$0xff]  }
 0x592   : > { %v8399_v22 = vpack.c.bf16 %v3935_v51, %v3935_v51  ;;  %v8401_v19 = vpack.c.bf16 %v3937_v57, %v3937_v57  ;;  %v7136_v54 = vld [vmem:[%s7813_s17 + $0x34c] ss:$16 sps:$4 sm:$0xff]   ;;  %v7134_v41 = vld [vmem:[%s7813_s17 + $0x348] ss:$16 sps:$4 sm:$0xff]  }
 0x593   : > { %v7139_v21 = vld [vmem:[%s7813_s17 + $0x16c] ss:$16 sps:$4 sm:$0xff]   ;;  %v7137_v42 = vld [vmem:[%s7813_s17 + $0x168] ss:$16 sps:$4 sm:$0xff]  }
 0x594   : > { %5600 = vmatprep.mubr.bf16.mxu0 %v8399_v22  ;;  %5641 = vmatprep.mubr.bf16.mxu1 %v8401_v19  ;;  %v7142_v2 = vld [vmem:[%s7813_s17 + $0x36c] ss:$16 sps:$4 sm:$0xff]   ;;  %v7140_v43 = vld [vmem:[%s7813_s17 + $0x368] ss:$16 sps:$4 sm:$0xff]  }
 0x595   : > { %5601 = vmatmul.mubr.bf16.vlgmr.msra.gmra.mrb[12].mxu0 %v8405_v56  ;;  %5642 = vmatmul.mubr.bf16.vlgmr.msra.gmra.mrb[12].mxu1 %v8407_v62  ;;  %v7145_v45 = vld [vmem:[%s7813_s17 + $0x18c] ss:$16 sps:$4 sm:$0xff]   ;;  %v7143_v12 = vld [vmem:[%s7813_s17 + $0x188] ss:$16 sps:$4 sm:$0xff]  }
 0x596   : > { %5651 = vmatpush1.bf16.msra.mxu0 %v7071_v52  ;;  %5692 = vmatpush1.bf16.msra.mxu1 %v7074_v53  ;;  %v7148_v47 = vld [vmem:[%s7813_s17 + $0x38c] ss:$16 sps:$4 sm:$0xff]   ;;  %v7146_v55 = vld [vmem:[%s7813_s17 + $0x388] ss:$16 sps:$4 sm:$0xff]  }
 0x597   : > { %5682 = vmatprep.mubr.bf16.mxu0 %v8231_v46  ;;  %5723 = vmatprep.mubr.bf16.mxu1 %v8235_v49  ;;  %v7094_v46 = vld [vmem:[%s7813_s17 + $0x26c] ss:$16 sps:$4 sm:$0xff]   ;;  %v7089_v49 = vld [vmem:[%s7813_s17 + $0x68] ss:$16 sps:$4 sm:$0xff]  }
 0x598   : > { %5652 = vmatprep.subr.bf16.mxu0 %v7079_v59  ;;  %5693 = vmatprep.subr.bf16.mxu1 %v7082_v20  ;;  %v7151_v50 = vld [vmem:[%s7813_s17 + $0x1ac] ss:$16 sps:$4 sm:$0xff]   ;;  %v7149_v51 = vld [vmem:[%s7813_s17 + $0x1a8] ss:$16 sps:$4 sm:$0xff]  }
 0x599   : > { %v7154_v14 = vld [vmem:[%s7813_s17 + $0x3ac] ss:$16 sps:$4 sm:$0xff]   ;;  %v7152_v57 = vld [vmem:[%s7813_s17 + $0x3a8] ss:$16 sps:$4 sm:$0xff]  }
 0x59a   : > { %5653 = vmatpush1.bf16.msra.mxu0 %v7077_v60  ;;  %5694 = vmatpush1.bf16.msra.mxu1 %v7080_v8  ;;  %v7157_v52 = vld [vmem:[%s7813_s17 + $0x1cc] ss:$16 sps:$4 sm:$0xff]   ;;  %v7155_v20 = vld [vmem:[%s7813_s17 + $0x1c8] ss:$16 sps:$4 sm:$0xff]  }
 0x59b   : > { %5654 = vmatprep.subr.bf16.mxu0 %v7085_v61  ;;  %5695 = vmatprep.subr.bf16.mxu1 %v7088_v44  ;;  %v7160_v53 = vld [vmem:[%s7813_s17 + $0x3cc] ss:$16 sps:$4 sm:$0xff]   ;;  %v7158_v60 = vld [vmem:[%s7813_s17 + $0x3c8] ss:$16 sps:$4 sm:$0xff]  }
 0x59c   : > { %v7163_v44 = vld [vmem:[%s7813_s17 + $0x1ec] ss:$16 sps:$4 sm:$0xff]  }
 0x59e   : > { %5655 = vmatpush1.bf16.msra.mxu0 %v7083_v9  ;;  %5696 = vmatpush1.bf16.msra.mxu1 %v7086_v63  ;;  %v7166_v9 = vld [vmem:[%s7813_s17 + $0x3ec] ss:$16 sps:$4 sm:$0xff]  }
 0x59f   : > { %5656 = vmatprep.subr.bf16.mxu0 %v7091_v1  ;;  %5697 = vmatprep.subr.bf16.mxu1 %v7094_v46 }
 0x5a2   : > { %5657 = vmatpush1.bf16.msra.mxu0 %v7089_v49  ;;  %5698 = vmatpush1.bf16.msra.mxu1 %v7092_v17 }
 0x5a3   : > { %5658 = vmatprep.subr.bf16.mxu0 %v7097_v5  ;;  %5699 = vmatprep.subr.bf16.mxu1 %v7100_v7 }
 0x5a6   : > { %5659 = vmatpush1.bf16.msra.mxu0 %v7095_v10  ;;  %5700 = vmatpush1.bf16.msra.mxu1 %v7098_v11  ;;  %v7161_v10 = vld [vmem:[%s7813_s17 + $0x1e8] ss:$16 sps:$4 sm:$0xff]  }
 0x5a7   : > { %5660 = vmatprep.subr.bf16.mxu0 %v7103_v13  ;;  %5701 = vmatprep.subr.bf16.mxu1 %v7106_v48  ;;  %v7164_v11 = vld [vmem:[%s7813_s17 + $0x3e8] ss:$16 sps:$4 sm:$0xff]   ;;  %v7169_v13 = vld [vmem:[%s7813_s17 + $0x40c] ss:$16 sps:$4 sm:$0xff]  }
 0x5a8   : > { %v7172_v48 = vld [vmem:[%s7813_s17 + $0x60c] ss:$16 sps:$4 sm:$0xff]  }
 0x5aa   : > { %5661 = vmatpush1.bf16.msra.mxu0 %v7101_v15  ;;  %5702 = vmatpush1.bf16.msra.mxu1 %v7104_v16  ;;  %v7167_v15 = vld [vmem:[%s7813_s17 + $0x408] ss:$16 sps:$4 sm:$0xff]  }
 0x5ab   : > { %5662 = vmatprep.subr.bf16.mxu0 %v7109_v32  ;;  %5703 = vmatprep.subr.bf16.mxu1 %v7112_v18  ;;  %v7170_v16 = vld [vmem:[%s7813_s17 + $0x608] ss:$16 sps:$4 sm:$0xff]   ;;  %v7175_v32 = vld [vmem:[%s7813_s17 + $0x42c] ss:$16 sps:$4 sm:$0xff]  }
 0x5ac   : > { %v7178_v18 = vld [vmem:[%s7813_s17 + $0x62c] ss:$16 sps:$4 sm:$0xff]  }
 0x5ae   : > { %5663 = vmatpush1.bf16.msra.mxu0 %v7107_v25  ;;  %5704 = vmatpush1.bf16.msra.mxu1 %v7110_v31  ;;  %v7173_v25 = vld [vmem:[%s7813_s17 + $0x428] ss:$16 sps:$4 sm:$0xff]  }
 0x5af   : > { %5664 = vmatprep.subr.bf16.mxu0 %v7115_v26  ;;  %5705 = vmatprep.subr.bf16.mxu1 %v7118_v27  ;;  %v7176_v31 = vld [vmem:[%s7813_s17 + $0x628] ss:$16 sps:$4 sm:$0xff]   ;;  %v7181_v26 = vld [vmem:[%s7813_s17 + $0x44c] ss:$16 sps:$4 sm:$0xff]  }
 0x5b0   : > { %v7187_v27 = vld [vmem:[%s7813_s17 + $0x46c] ss:$16 sps:$4 sm:$0xff]  }
 0x5b2   : > { %5665 = vmatpush1.bf16.msra.mxu0 %v7113_v28  ;;  %5706 = vmatpush1.bf16.msra.mxu1 %v7116_v29  ;;  %v7190_v28 = vld [vmem:[%s7813_s17 + $0x66c] ss:$16 sps:$4 sm:$0xff]   ;;  %v7188_v29 = vld [vmem:[%s7813_s17 + $0x668] ss:$16 sps:$4 sm:$0xff]  }
 0x5b3   : > { %5666 = vmatprep.subr.bf16.mxu0 %v7121_v30  ;;  %5707 = vmatprep.subr.bf16.mxu1 %v7124_v33  ;;  %v7193_v30 = vld [vmem:[%s7813_s17 + $0x48c] ss:$16 sps:$4 sm:$0xff]  }
 0x5b4   : > { %v7196_v33 = vld [vmem:[%s7813_s17 + $0x68c] ss:$16 sps:$4 sm:$0xff]  }
 0x5b6   : > { %5667 = vmatpush1.bf16.msra.mxu0 %v7119_v39  ;;  %5708 = vmatpush1.bf16.msra.mxu1 %v7122_v34  ;;  %v7191_v39 = vld [vmem:[%s7813_s17 + $0x488] ss:$16 sps:$4 sm:$0xff]  }
 0x5b7   : > { %5668 = vmatprep.subr.bf16.mxu0 %v7127_v35  ;;  %5709 = vmatprep.subr.bf16.mxu1 %v7130_v37  ;;  %v7194_v34 = vld [vmem:[%s7813_s17 + $0x688] ss:$16 sps:$4 sm:$0xff]   ;;  %v7199_v35 = vld [vmem:[%s7813_s17 + $0x4ac] ss:$16 sps:$4 sm:$0xff]  }
 0x5b8   : > { %v7202_v37 = vld [vmem:[%s7813_s17 + $0x6ac] ss:$16 sps:$4 sm:$0xff]  }
 0x5ba   : > { %5669 = vmatpush1.bf16.msra.mxu0 %v7125_v23  ;;  %5710 = vmatpush1.bf16.msra.mxu1 %v7128_v58  ;;  %v7197_v23 = vld [vmem:[%s7813_s17 + $0x4a8] ss:$16 sps:$4 sm:$0xff]  }
 0x5bb   : > { %5670 = vmatprep.subr.bf16.mxu0 %v7133_v24  ;;  %5711 = vmatprep.subr.bf16.mxu1 %v7136_v54  ;;  %v7200_v58 = vld [vmem:[%s7813_s17 + $0x6a8] ss:$16 sps:$4 sm:$0xff]   ;;  %v7205_v24 = vld [vmem:[%s7813_s17 + $0x4cc] ss:$16 sps:$4 sm:$0xff]  }
 0x5bc   : > { %v7208_v54 = vld [vmem:[%s7813_s17 + $0x6cc] ss:$16 sps:$4 sm:$0xff]  }
 0x5be   : > { %5671 = vmatpush1.bf16.msra.mxu0 %v7131_v40  ;;  %5712 = vmatpush1.bf16.msra.mxu1 %v7134_v41  ;;  %v7203_v40 = vld [vmem:[%s7813_s17 + $0x4c8] ss:$16 sps:$4 sm:$0xff]  }
 0x5bf   : > { %5672 = vmatprep.subr.bf16.mxu0 %v7139_v21  ;;  %5713 = vmatprep.subr.bf16.mxu1 %v7142_v2  ;;  %v7206_v41 = vld [vmem:[%s7813_s17 + $0x6c8] ss:$16 sps:$4 sm:$0xff]   ;;  %v7211_v21 = vld [vmem:[%s7813_s17 + $0x4ec] ss:$16 sps:$4 sm:$0xff]  }
 0x5c0   : > { %v7214_v2 = vld [vmem:[%s7813_s17 + $0x6ec] ss:$16 sps:$4 sm:$0xff]  }
 0x5c2   : > { %5673 = vmatpush1.bf16.msra.mxu0 %v7137_v42  ;;  %5714 = vmatpush1.bf16.msra.mxu1 %v7140_v43  ;;  %v7209_v42 = vld [vmem:[%s7813_s17 + $0x4e8] ss:$16 sps:$4 sm:$0xff]  }
 0x5c3   : > { %5674 = vmatprep.subr.bf16.mxu0 %v7145_v45  ;;  %5715 = vmatprep.subr.bf16.mxu1 %v7148_v47  ;;  %v7212_v43 = vld [vmem:[%s7813_s17 + $0x6e8] ss:$16 sps:$4 sm:$0xff]   ;;  %v7217_v45 = vld [vmem:[%s7813_s17 + $0x50c] ss:$16 sps:$4 sm:$0xff]  }
 0x5c4   : > { %v7220_v47 = vld [vmem:[%s7813_s17 + $0x70c] ss:$16 sps:$4 sm:$0xff]  }
 0x5c6   : > { %5675 = vmatpush1.bf16.msra.mxu0 %v7143_v12  ;;  %5716 = vmatpush1.bf16.msra.mxu1 %v7146_v55  ;;  %v7215_v12 = vld [vmem:[%s7813_s17 + $0x508] ss:$16 sps:$4 sm:$0xff]  }
 0x5c7   : > { %5676 = vmatprep.subr.bf16.mxu0 %v7151_v50  ;;  %5717 = vmatprep.subr.bf16.mxu1 %v7154_v14  ;;  %v7218_v55 = vld [vmem:[%s7813_s17 + $0x708] ss:$16 sps:$4 sm:$0xff]   ;;  %v7223_v50 = vld [vmem:[%s7813_s17 + $0x52c] ss:$16 sps:$4 sm:$0xff]  }
 0x5c8   : > { %v7226_v14 = vld [vmem:[%s7813_s17 + $0x72c] ss:$16 sps:$4 sm:$0xff]  }
 0x5ca   : > { %5677 = vmatpush1.bf16.msra.mxu0 %v7149_v51  ;;  %5718 = vmatpush1.bf16.msra.mxu1 %v7152_v57  ;;  %v5520_v59 = vpop.f32.mrb[8].mxu0  ;;  %v7221_v51 = vld [vmem:[%s7813_s17 + $0x528] ss:$16 sps:$4 sm:$0xff]  }
 0x5cb   : > { %v5561_v8 = vpop.f32.mrb[8].mxu1  ;;  %v5522_v61 = vpop.f32.mrb[9].mxu0  ;;  %5678 = vmatprep.subr.bf16.mxu0 %v7157_v52  ;;  %5719 = vmatprep.subr.bf16.mxu1 %v7160_v53  ;;  %v7224_v57 = vld [vmem:[%s7813_s17 + $0x728] ss:$16 sps:$4 sm:$0xff]   ;;  %v7229_v52 = vld [vmem:[%s7813_s17 + $0x54c] ss:$16 sps:$4 sm:$0xff]  }
 0x5cc   : > { %v8473_v63 = vadd.f32 %v5561_v8, %v5520_v59  ;;  %v5563_v1 = vpop.f32.mrb[9].mxu1  ;;  %v5524_v46 = vpop.f32.mrb[10].mxu0  ;;  %v7232_v53 = vld [vmem:[%s7813_s17 + $0x74c] ss:$16 sps:$4 sm:$0xff]   ;;  %v7227_v59 = vld [vmem:[%s7813_s17 + $0x548] ss:$16 sps:$4 sm:$0xff]  }
 0x5cd   : > { %v8475_v49 = vadd.f32 %v5563_v1, %v5522_v61  ;;  %v5565_v17 = vpop.f32.mrb[10].mxu1  ;;  %v5525_v5 = vpop.f32.mrb[11].mxu0  ;;  %v7238_v8 = vld [vmem:[%s7813_s17 + $0x76c] ss:$16 sps:$4 sm:$0xff]   ;;  %v7233_v61 = vld [vmem:[%s7813_s17 + $0x568] ss:$16 sps:$4 sm:$0xff]  }
 0x5ce   : > { %v5566_v7 = vpop.f32.mrb[11].mxu1  ;;  %5679 = vmatpush1.bf16.msra.mxu0 %v7155_v20  ;;  %5720 = vmatpush1.bf16.msra.mxu1 %v7158_v60  ;;  %v7230_v20 = vld [vmem:[%s7813_s17 + $0x748] ss:$16 sps:$4 sm:$0xff]   ;;  %v7235_v60 = vld [vmem:[%s7813_s17 + $0x56c] ss:$16 sps:$4 sm:$0xff]  }
 0x5cf   : > { %5680 = vmatprep.subr.bf16.mxu0 %v7163_v44  ;;  %5721 = vmatprep.subr.bf16.mxu1 %v7166_v9  ;;  %v7236_v44 = vld [vmem:[%s7813_s17 + $0x768] ss:$16 sps:$4 sm:$0xff]   ;;  %v7241_v9 = vld [vmem:[%s7813_s17 + $0x58c] ss:$16 sps:$4 sm:$0xff]  }
 0x5d0   : > { %v7244_v1 = vld [vmem:[%s7813_s17 + $0x78c] ss:$16 sps:$4 sm:$0xff]   ;;  %v7239_v46 = vld [vmem:[%s7813_s17 + $0x588] ss:$16 sps:$4 sm:$0xff]  }
 0x5d1   : > { %v7242_v17 = vld [vmem:[%s7813_s17 + $0x788] ss:$16 sps:$4 sm:$0xff]   ;;  %v7247_v5 = vld [vmem:[%s7813_s17 + $0x5ac] ss:$16 sps:$4 sm:$0xff]  }
 0x5d2   : > { %5681 = vmatpush1.bf16.msra.mxu0 %v7161_v10  ;;  %5722 = vmatpush1.bf16.msra.mxu1 %v7164_v11  ;;  %v7250_v7 = vld [vmem:[%s7813_s17 + $0x7ac] ss:$16 sps:$4 sm:$0xff]   ;;  %v7245_v10 = vld [vmem:[%s7813_s17 + $0x5a8] ss:$16 sps:$4 sm:$0xff]  }
 0x5d3   : > { %5732 = vmatprep.subr.bf16.mxu0 %v7169_v13  ;;  %5773 = vmatprep.subr.bf16.mxu1 %v7172_v48  ;;  %v7248_v11 = vld [vmem:[%s7813_s17 + $0x7a8] ss:$16 sps:$4 sm:$0xff]   ;;  %v7253_v13 = vld [vmem:[%s7813_s17 + $0x5cc] ss:$16 sps:$4 sm:$0xff]  }
 0x5d4   : > { %v7256_v48 = vld [vmem:[%s7813_s17 + $0x7cc] ss:$16 sps:$4 sm:$0xff]  }
 0x5d5   : > { %5683 = vmatmul.mubr.bf16.vlgmr.msra.gmra.mrb[16].mxu0 %v8318_v0  ;;  %5724 = vmatmul.mubr.bf16.vlgmr.msra.gmra.mrb[16].mxu1 %v8322_v3  ;;  %v7184_v0 = vld [vmem:[%s7813_s17 + $0x64c] ss:$16 sps:$4 sm:$0xff]   ;;  %v7179_v3 = vld [vmem:[%s7813_s17 + $0x448] ss:$16 sps:$4 sm:$0xff]  }
 0x5d6   : > { %5733 = vmatpush1.bf16.msra.mxu0 %v7167_v15  ;;  %5764 = vmatprep.mubr.bf16.mxu0 %v8399_v22  ;;  %v7182_v22 = vld [vmem:[%s7813_s17 + $0x648] ss:$16 sps:$4 sm:$0xff]  }
 0x5d7   : > { %5774 = vmatpush1.bf16.msra.mxu1 %v7170_v16  ;;  %5805 = vmatprep.mubr.bf16.mxu1 %v8401_v19  ;;  %v7185_v19 = vld [vmem:[%s7813_s17 + $0x468] ss:$16 sps:$4 sm:$0xff]  }
 0x5d8   : > { %5734 = vmatprep.subr.bf16.mxu0 %v7175_v32  ;;  %5775 = vmatprep.subr.bf16.mxu1 %v7178_v18  ;;  %v7251_v15 = vld [vmem:[%s7813_s17 + $0x5c8] ss:$16 sps:$4 sm:$0xff]   ;;  %v7259_v32 = vld [vmem:[%s7813_s17 + $0x5ec] ss:$16 sps:$4 sm:$0xff]  }
 0x5d9   : > { %v7254_v16 = vld [vmem:[%s7813_s17 + $0x7c8] ss:$16 sps:$4 sm:$0xff]   ;;  %v7262_v18 = vld [vmem:[%s7813_s17 + $0x7ec] ss:$16 sps:$4 sm:$0xff]  }
 0x5da   : > { %5735 = vmatpush1.bf16.msra.mxu0 %v7173_v25  ;;  %v7257_v25 = vld [vmem:[%s7813_s17 + $0x5e8] ss:$16 sps:$4 sm:$0xff]  }
 0x5db   : > { %5776 = vmatpush1.bf16.msra.mxu1 %v7176_v31  ;;  %5736 = vmatprep.subr.bf16.mxu0 %v7181_v26  ;;  %v7260_v31 = vld [vmem:[%s7813_s17 + $0x7e8] ss:$16 sps:$4 sm:$0xff]  }
 0x5dc   : > { %5777 = vmatprep.subr.bf16.mxu1 %v7184_v0 }
 0x5de   : > { %5737 = vmatpush1.bf16.msra.mxu0 %v7179_v3 }
 0x5df   : > { %5778 = vmatpush1.bf16.msra.mxu1 %v7182_v22  ;;  %5738 = vmatprep.subr.bf16.mxu0 %v7187_v27 }
 0x5e0   : > { %5779 = vmatprep.subr.bf16.mxu1 %v7190_v28  ;;  %v3946_v28 = vld [vmem:[#allocation3] sm:$0xff] }
 0x5e2   : > { %5739 = vmatpush1.bf16.msra.mxu0 %v7185_v19 }
 0x5e3   : > { %5780 = vmatpush1.bf16.msra.mxu1 %v7188_v29  ;;  %5740 = vmatprep.subr.bf16.mxu0 %v7193_v30 }
 0x5e4   : > { %5781 = vmatprep.subr.bf16.mxu1 %v7196_v33 }
 0x5e6   : > { %5741 = vmatpush1.bf16.msra.mxu0 %v7191_v39  ;;  %v3947_v39 = vld [vmem:[#allocation3 + $0x8] sm:$0xff] }
 0x5e7   : > { %5782 = vmatpush1.bf16.msra.mxu1 %v7194_v34  ;;  %5742 = vmatprep.subr.bf16.mxu0 %v7199_v35 }
 0x5e8   : > { %5783 = vmatprep.subr.bf16.mxu1 %v7202_v37 }
 0x5ea   : > { %5743 = vmatpush1.bf16.msra.mxu0 %v7197_v23 }
 0x5eb   : > { %5784 = vmatpush1.bf16.msra.mxu1 %v7200_v58  ;;  %5744 = vmatprep.subr.bf16.mxu0 %v7205_v24 }
 0x5ec   : > { %5785 = vmatprep.subr.bf16.mxu1 %v7208_v54 }
 0x5ee   : > { %5745 = vmatpush1.bf16.msra.mxu0 %v7203_v40 }
 0x5ef   : > { %5786 = vmatpush1.bf16.msra.mxu1 %v7206_v41  ;;  %5746 = vmatprep.subr.bf16.mxu0 %v7211_v21 }
 0x5f0   : > { %5787 = vmatprep.subr.bf16.mxu1 %v7214_v2 }
 0x5f2   : > { %5747 = vmatpush1.bf16.msra.mxu0 %v7209_v42 }
 0x5f3   : > { %5788 = vmatpush1.bf16.msra.mxu1 %v7212_v43  ;;  %5748 = vmatprep.subr.bf16.mxu0 %v7217_v45 }
 0x5f4   : > { %5789 = vmatprep.subr.bf16.mxu1 %v7220_v47 }
 0x5f6   : > { %5749 = vmatpush1.bf16.msra.mxu0 %v7215_v12  ;;  %v3948_v12 = vld [vmem:[#allocation3 + $0x10] sm:$0xff] }
 0x5f7   : > { %5790 = vmatpush1.bf16.msra.mxu1 %v7218_v55  ;;  %5750 = vmatprep.subr.bf16.mxu0 %v7223_v50 }
 0x5f8   : > { %5791 = vmatprep.subr.bf16.mxu1 %v7226_v14 }
 0x5fa   : > { %5751 = vmatpush1.bf16.msra.mxu0 %v7221_v51 }
 0x5fb   : > { %5792 = vmatpush1.bf16.msra.mxu1 %v7224_v57  ;;  %5752 = vmatprep.subr.bf16.mxu0 %v7229_v52  ;;  %v3949_v57 = vld [vmem:[#allocation3 + $0x18] sm:$0xff] }
 0x5fc   : > { %5793 = vmatprep.subr.bf16.mxu1 %v7232_v53 }
 0x5fe   : > { %5753 = vmatpush1.bf16.msra.mxu0 %v7227_v59 }
 0x5ff   : > { %5794 = vmatpush1.bf16.msra.mxu1 %v7230_v20  ;;  %5754 = vmatprep.subr.bf16.mxu0 %v7235_v60 }
 0x600   : > { %5795 = vmatprep.subr.bf16.mxu1 %v7238_v8 }
 0x602   : > { %5755 = vmatpush1.bf16.msra.mxu0 %v7233_v61 }
 0x603   : > { %5796 = vmatpush1.bf16.msra.mxu1 %v7236_v44  ;;  %5756 = vmatprep.subr.bf16.mxu0 %v7241_v9  ;;  %v5830_v44 = vld [vmem:[#allocation11 + $0x8] sm:$0xf] (!%p6694_p4)  ;;  %v7521_v9 = vmov (!%p6694_p4), 0  }
 0x604   : > { %5797 = vmatprep.subr.bf16.mxu1 %v7244_v1  ;;  %7263 = vset.pattern.permute.xlu0 (!%p6694_p4), %v7521_v9  ;;  %v5847_v1 = vrot.slane (!%p6694_p4), %v5830_v44, %v8209_v6 }
 0x606   : > { %5757 = vmatpush1.bf16.msra.mxu0 %v7239_v46  ;;  %v7522_v46 = vmov (!%p6694_p4), 2  }
 0x607   : > { %5798 = vmatpush1.bf16.msra.mxu1 %v7242_v17  ;;  %5758 = vmatprep.subr.bf16.mxu0 %v7247_v5 }
 0x608   : > { %5799 = vmatprep.subr.bf16.mxu1 %v7250_v7  ;;  %7265 = vset.pattern.permute.xlu1 (!%p6694_p4), %v7522_v46  ;;  %v7523_v7 = vmov (!%p6694_p4), 1  }
 0x60a   : > { %5759 = vmatpush1.bf16.msra.mxu0 %v7245_v10  ;;  %v5835_v10 = vrot.slane (!%p6694_p4), %v5830_v44, %v8283_v36 }
 0x60b   : > { %5800 = vmatpush1.bf16.msra.mxu1 %v7248_v11  ;;  %5760 = vmatprep.subr.bf16.mxu0 %v7253_v13  ;;  %v5857_v11 = vld [vmem:[#allocation12] ss:$8 sm:$0x7] (!%p6694_p4) }
 0x60c   : > { %5801 = vmatprep.subr.bf16.mxu1 %v7256_v48  ;;  %v5839_v48 = vrot.slane (!%p6694_p4), %v5830_v44, %v8205_v4 }
 0x60e   : > { %5761 = vmatpush1.bf16.msra.mxu0 %v7251_v15  ;;  %v5843_v15 = vrot.slane (!%p6694_p4), %v5830_v44, %v8288_v38 }
 0x60f   : > { %5802 = vmatpush1.bf16.msra.mxu1 %v7254_v16  ;;  %5762 = vmatprep.subr.bf16.mxu0 %v7259_v32  ;;  %v5946_v16 = vrot.slane (!%p6694_p4), %v5857_v11, %v8283_v36 }
 0x610   : > { %5803 = vmatprep.subr.bf16.mxu1 %v7262_v18 }
 0x612   : > { %5763 = vmatpush1.bf16.msra.mxu0 %v7257_v25  ;;  %v5950_v25 = vrot.slane (!%p6694_p4), %v5857_v11, %v8205_v4 }
 0x613   : > { %5804 = vmatpush1.bf16.msra.mxu1 %v7260_v31 }
 0x615   : > { %5765 = vmatmul.mubr.bf16.vlgmr.msra.gmra.mrb[20].mxu0 %v8405_v56 }
 0x616   : > { %5806 = vmatmul.mubr.bf16.vlgmr.msra.gmra.mrb[20].mxu1 %v8407_v62 }
 0x668   : > { %v5602_v26 = vpop.f32.mrb[12].mxu0  ;;  %v5643_v0 = vpop.f32.mrb[12].mxu1 }
 0x669   : > { %v5603_v3 = vadd.f32 %v5602_v26, %v8473_v63  ;;  %v5604_v22 = vpop.f32.mrb[13].mxu0  ;;  %v5645_v27 = vpop.f32.mrb[13].mxu1  ;;  %v5954_v26 = vrot.slane (!%p6694_p4), %v5857_v11, %v8288_v38 }
 0x66a   : > { %v5605_v19 = vadd.f32 %v5604_v22, %v8475_v49  ;;  %v5606_v29 = vpop.f32.mrb[14].mxu0  ;;  %v5647_v30 = vpop.f32.mrb[14].mxu1 }
 0x66b   : > { %v5644_v33 = vadd.f32 %v5643_v0, %v5603_v3  ;;  %v5607_v34 = vpop.f32.mrb[15].mxu0  ;;  %v5648_v35 = vpop.f32.mrb[15].mxu1 }
 0x66c   : > { %v5646_v37 = vadd.f32 %v5645_v27, %v5605_v19 }
 0x66d   : > { %v5814_v23 = vadd.f32 %v5644_v33, %v3946_v28 }
 0x66e   : > { %v5815_v56 = vadd.f32 %v5646_v37, %v3947_v39 }
 0x66f   : > { %5818 = vst [vmem:[#allocation3] sm:$0xff] %v5814_v23  ;;  %v5859_v23 = vld [vmem:[#allocation12 + $0x1] ss:$8 sm:$0x7] (!%p6694_p4) }
 0x670   : > { %5819 = vst [vmem:[#allocation3 + $0x8] sm:$0xff] %v5815_v56  ;;  %v5983_v56 = vrot.slane (!%p6694_p4), %v5859_v23, %v8283_v36 }
 0x676   : > { %v5826_v13 = vld [vmem:[#allocation3] sm:$0xff] (!%p6694_p4) }
 0x677   : > { %v5827_v6 = vld [vmem:[#allocation3 + $0x8] sm:$0xff] (!%p6694_p4)  ;;  %v5852_v18 = vadd.f32 (!%p6694_p4), %v5835_v10, %v5826_v13 }
 0x678   : > { %v5853_v31 = vadd.f32 (!%p6694_p4), %v5839_v48, %v5827_v6 }
 0x679   : > { %v5958_v3 = vadd.f32 (!%p6694_p4), %v5946_v16, %v5852_v18 }
 0x67a   : > { %v5959_v22 = vadd.f32 (!%p6694_p4), %v5950_v25, %v5853_v31 }
 0x67b   : > { %v6695_v28 = vmul.f32 (!%p6694_p4), -1.442695, %v5958_v3 }
 0x67c   : > { %v6696_v19 = vmul.f32 (!%p6694_p4), -1.442695, %v5959_v22 }
 0x6a8   : > { %v5684_v62 = vpop.f32.mrb[16].mxu0  ;;  %v5725_v58 = vpop.f32.mrb[16].mxu1 }
 0x6a9   : > { %v5726_v24 = vadd.f32 %v5725_v58, %v5684_v62  ;;  %v5686_v63 = vpop.f32.mrb[17].mxu0  ;;  %v5727_v54 = vpop.f32.mrb[17].mxu1  ;;  %v5861_v58 = vld [vmem:[#allocation12 + $0x2] ss:$8 sm:$0x7] (!%p6694_p4) }
 0x6aa   : > { %v5728_v40 = vadd.f32 %v5727_v54, %v5686_v63  ;;  %v5688_v41 = vpop.f32.mrb[18].mxu0  ;;  %v5729_v21 = vpop.f32.mrb[18].mxu1  ;;  %v5887_v54 = vld [vmem:[#allocation12 + $0x3] ss:$8 sm:$0x7] (!%p6694_p4) }
 0x6ab   : > { %v5689_v49 = vpop.f32.mrb[19].mxu0  ;;  %v5730_v2 = vpop.f32.mrb[19].mxu1  ;;  %v5991_v41 = vrot.slane (!%p6694_p4), %v5859_v23, %v8288_v38 }
 0x6ac   : > { %v5871_v49 = vrot.slane (!%p6694_p4), %v5861_v58, %v8283_v36 }
 0x6e8   : > { %v5766_v42 = vpop.f32.mrb[20].mxu0 }
 0x6e9   : > { %v5767_v43 = vadd.f32 %v5766_v42, %v5726_v24  ;;  %v5807_v45 = vpop.f32.mrb[20].mxu1  ;;  %v5768_v47 = vpop.f32.mrb[21].mxu0  ;;  %v5915_v24 = vld [vmem:[#allocation12 + $0x4] ss:$8 sm:$0x7] (!%p6694_p4) }
 0x6ea   : > { %v5769_v55 = vadd.f32 %v5768_v47, %v5728_v40  ;;  %v5809_v50 = vpop.f32.mrb[21].mxu1  ;;  %v5770_v14 = vpop.f32.mrb[22].mxu0  ;;  %5825 = sbr.rel (%p6694_p4) target bundleno = 1948 (0x79c), region = 80  ;;  %v5987_v40 = vrot.slane (!%p6694_p4), %v5859_v23, %v8205_v4  ;;  %v5924_v47 = vrot.slane (!%p6694_p4), %v5915_v24, %v8283_v36 }
 0x6eb   : > { %v5808_v51 = vadd.f32 %v5807_v45, %v5767_v43  ;;  %v5811_v52 = vpop.f32.mrb[22].mxu1  ;;  %v5771_v53 = vpop.f32.mrb[23].mxu0  ;;  %v5875_v43 = vrot.slane (!%p6694_p4), %v5861_v58, %v8205_v4  ;;  %v5879_v45 = vrot.slane (!%p6694_p4), %v5861_v58, %v8288_v38  ;;  %v5904_v14 = vrot.slane (!%p6694_p4), %v5887_v54, %v8288_v38 }
 0x6ec   : > { %v5810_v59 = vadd.f32 %v5809_v50, %v5769_v55  ;;  %v5812_v20 = vpop.f32.mrb[23].mxu1  ;;  %v5896_v55 = vrot.slane (!%p6694_p4), %v5887_v54, %v8283_v36  ;;  %v5900_v50 = vrot.slane (!%p6694_p4), %v5887_v54, %v8205_v4 }
 0x6ed   : > { %v5816_v60 = vadd.f32 %v5808_v51, %v3948_v12  ;;  %v5928_v12 = vrot.slane (!%p6694_p4), %v5915_v24, %v8205_v4  ;;  %v5932_v51 = vrot.slane (!%p6694_p4), %v5915_v24, %v8288_v38 }
 0x6ee   : > { %v5817_v8 = vadd.f32 %v5810_v59, %v3949_v57 }
 0x6ef   : > { %5820 = vst [vmem:[#allocation3 + $0x10] sm:$0xff] %v5816_v60 }
 0x6f0   : > { %5821 = vst [vmem:[#allocation3 + $0x18] sm:$0xff] %v5817_v8 }
 0x6f6   : > { %v5828_v32 = vld [vmem:[#allocation3 + $0x10] sm:$0xff] }
 0x6f7   : > { %v5829_v61 = vld [vmem:[#allocation3 + $0x18] sm:$0xff]  ;;  %v5854_v0 = vadd.f32 %v5843_v15, %v5828_v32 }
 0x6f8   : > { %v5855_v17 = vadd.f32 %v5847_v1, %v5829_v61 }
 0x6f9   : > { %v5960_v27 = vadd.f32 %v5954_v26, %v5854_v0 }
 0x6fa   : > { %7267 = vtanh.f32 %v5855_v17 }
 0x6fb   : > { %v6697_v29 = vmul.f32 -1.442695, %v5960_v27  ;;  %7269 = vpow2.f32 %v6695_v28 }
 0x6fc   : > { %7271 = vpow2.f32 %v6696_v19 }
 0x6fd   : > { %7273 = vpow2.f32 %v6697_v29 }
 0x704   : > { %v7268_v5 = vpop.eup %7267 }
 0x705   : > { %5864 = vperm.xlu0 %7263, %v7268_v5   ;;  %5917 = vperm.xlu1 %7265, %v7268_v5   ;;  %v7270_v30 = vpop.eup %7269 }
 0x706   : > { %v7272_v33 = vpop.eup %7271  ;;  %v5970_v34 = vadd.f32 1.0, %v7270_v30 }
 0x707   : > { %v7274_v39 = vpop.eup %7273  ;;  %v5971_v35 = vadd.f32 1.0, %v7272_v33 }
 0x708   : > { %v5972_v37 = vadd.f32 1.0, %v7274_v39  ;;  %7275 = vrcp.f32 %v5970_v34 }
 0x709   : > { %7264 = vset.pattern.permute.xlu0 %v7523_v7  ;;  %7277 = vrcp.f32 %v5971_v35 }
 0x70a   : > { %5889 = vperm.xlu0 %7264, %v7268_v5   ;;  %7279 = vrcp.f32 %v5972_v37 }
 0x70e   : > { %7266 = vset.pattern.permute.xlu0 %v7522_v46 }
 0x712   : > { %v7276_v62 = vpop.eup %7275 }
 0x713   : > { %v7278_v63 = vpop.eup %7277  ;;  %v5995_v42 = vmul.f32 %v7276_v62, %v5983_v56 }
 0x714   : > { %v7280_v21 = vpop.eup %7279  ;;  %v5996_v52 = vmul.f32 %v7278_v63, %v5987_v40 }
 0x715   : > { %v5997_v53 = vmul.f32 %v7280_v21, %v5991_v41  ;;  %v6007_v20 = vsub.f32 0.0, %v5995_v42  ;;  %v5998_v38 = vmax.f32 %v5995_v42, 0.0 }
 0x716   : > { %v6008_v5 = vsub.f32 0.0, %v5996_v52  ;;  %v5999_v13 = vmax.f32 %v5996_v52, 0.0 }
 0x717   : > { %v6009_v4 = vsub.f32 0.0, %v5997_v53  ;;  %v6000_v48 = vmax.f32 %v5997_v53, 0.0  ;;  %v6010_v32 = vmax.f32 %v6007_v20, 0.0 }
 0x718   : > { %v6011_v18 = vmax.f32 %v6008_v5, 0.0 }
 0x719   : > { %v6012_v25 = vmax.f32 %v6009_v4, 0.0 }
 0x784   : > { %v5865_v2 = vpop.permute.xlu0 %5864  ;;  %v5918_v57 = vpop.permute.xlu1 %5917 }
 0x785   : > { %v5883_v59 = vmul.f32 %v5871_v49, %v5865_v2  ;;  %v5884_v60 = vmul.f32 %v5875_v43, %v5865_v2  ;;  %v5885_v8 = vmul.f32 %v5879_v45, %v5865_v2  ;;  %v5936_v44 = vmul.f32 %v5924_v47, %v5918_v57 }
 0x786   : > { %v5937_v9 = vmul.f32 %v5928_v12, %v5918_v57  ;;  %v5938_v36 = vmul.f32 %v5932_v51, %v5918_v57 }
 0x789   : > { %v5890_v61 = vpop.permute.xlu0 %5889 }
 0x78a   : > { %v5908_v1 = vmul.f32 %v5896_v55, %v5890_v61  ;;  %v5909_v46 = vmul.f32 %v5900_v50, %v5890_v61  ;;  %v5910_v17 = vmul.f32 %v5904_v14, %v5890_v61 }
 0x78c   : > { %v5911_v7 = vadd.f32 %v5908_v1, %v5883_v59  ;;  %v5912_v10 = vadd.f32 %v5909_v46, %v5884_v60  ;;  %v5913_v11 = vadd.f32 %v5910_v17, %v5885_v8 }
 0x78e   : > { %v5939_v15 = vadd.f32 %v5936_v44, %v5911_v7  ;;  %v5940_v6 = vadd.f32 %v5937_v9, %v5912_v10  ;;  %v5941_v16 = vadd.f32 %v5938_v36, %v5913_v11 }
 0x790   : > { %v6001_v31 = vsub.f32 1.0, %v5939_v15  ;;  %v6002_v26 = vsub.f32 1.0, %v5940_v6  ;;  %v6003_v0 = vsub.f32 1.0, %v5941_v16  ;;  %v6013_v3 = vadd.f32 1.0, %v5939_v15 }
 0x791   : > { %v6014_v22 = vadd.f32 1.0, %v5940_v6  ;;  %v6015_v27 = vadd.f32 1.0, %v5941_v16 }
 0x792   : > { %v6004_v28 = vmul.f32 %v6001_v31, %v5998_v38  ;;  %v6005_v19 = vmul.f32 %v6002_v26, %v5999_v13  ;;  %v6006_v29 = vmul.f32 %v6003_v0, %v6000_v48  ;;  %v6016_v30 = vmul.f32 %v6013_v3, %v6010_v32 }
 0x793   : > { %v6017_v33 = vmul.f32 %v6014_v22, %v6011_v18  ;;  %v6018_v39 = vmul.f32 %v6015_v27, %v6012_v25 }
 0x794   : > { %v6019_v34 = vsub.f32 %v6004_v28, %v6016_v30 }
 0x795   : > { %v6020_v35 = vsub.f32 %v6005_v19, %v6017_v33  ;;  %v6021_v37 = vsub.f32 %v6006_v29, %v6018_v39 }
 0x796   : > { %v6022_v23 = vadd.f32 %v6019_v34, %v5939_v15 }
 0x797   : > { %v6023_v56 = vadd.f32 %v6020_v35, %v5940_v6  ;;  %v6024_v62 = vadd.f32 %v6021_v37, %v5941_v16 }
 0x798   : > { %v6025_v58 = vmul.f32 0.5, %v6022_v23 }
 0x799   : > { %v6026_v24 = vmul.f32 0.5, %v6023_v56  ;;  %v6027_v63 = vmul.f32 0.5, %v6024_v62 }
 0x79a   : > { %6028 = vst [vmem:[%s8657_s27] sm:$0xff] %v6025_v58 }
 0x79b   : > { %6029 = vst [vmem:[%s8658_s8 + $0x8] sm:$0xff] %v6026_v24  ;;  %6030 = vst [vmem:[%s8658_s8 + $0x10] sm:$0xff] %v6027_v63 }
 0x79c PF: > { %s8659_s27 = sld [smem:[#allocation19_spill]]  ;;  %s8660_s2 = sld [smem:[#allocation20_spill]] }
 0x79d   : > { %s8661_s24 = smov %s7497_s25  ;;  %s8662_s25 = smov %s7501_s26 }
 0x7a2   : > { %p22_p6 = scmp.ge.s32.totalorder %s8659_s27, 4   ;;  %s8663_s26 = smov %s8660_s2 }
 0x7a4   :  { %24 = sbr.rel (!%p22_p6) target bundleno = 12 (0xc), region = 134 }
 0x7ab   :  { %6042 = vsyncpa [#allocation5], 1 }
 0x7ac   :  { %6044 = vsyncpa [#allocation5 + $0x1], 1 }
 0x7ad   :  { %6045 = vsyncpa [#allocation7], 1 }
 0x7ae   :  { %6047 = vsyncpa [#allocation7 + $0x1], 1 }
 0x7af   :  { %6048 = vsyncpa [#allocation10], 1 }
 0x7b0   :  { %6050 = vsyncpa [#allocation10 + $0x1], 1 }
 0x7b1   :  { %6051 = vsyncpa [#allocation13], 1 }

</bundles_post_ra>
